<compile_context>
chip_gen: v7x
topology: tpu7x:2x2x1
jax: 0.10.0
libtpu: 0.0.40
codegen_flags: <defaults>
</compile_context>

<pallas_src>
import functools

import jax
import jax.numpy as jnp
from jax.experimental import pallas as pl
from jax.experimental.pallas import tpu as pltpu

EXPANSION = 4
BN_EPS = 1e-5
LANE = 128
COMPUTE_DTYPE = jnp.bfloat16          # MXU-native input dtype; accumulation stays f32


def _detect_vmem_limits():
    """Scoped-VMEM limit + tile-selection budget, gated on physical VMEM size."""
    cap = 64 * 1024 * 1024
    try:
        cap = int(pltpu.get_tpu_info().vmem_capacity_bytes)
    except Exception:
        pass
    if cap >= 96 * 1024 * 1024:                   # v5e / v6e: 128 MiB physical VMEM
        return 64 * 1024 * 1024, 48 * 1024 * 1024
    return 32 * 1024 * 1024, 20 * 1024 * 1024     # v7x: 64 MiB physical VMEM


VMEM_LIMIT, VMEM_BUDGET = _detect_vmem_limits()


def _round_up(x, m):
    return (x + m - 1) // m * m


def _pad_to(a, shape):
    pads = [(0, t - s) for s, t in zip(a.shape, shape)]
    return jnp.pad(a, pads)


def _choose_tm(M, row_bytes_in, row_bytes_out, fixed_bytes, min_steps=2):
    """Largest M-tile whose double-buffered tiles + resident blocks fit the VMEM
    budget, then shrunk so the (parallel) grid has >= min_steps steps when possible."""
    tm = 128
    for cand in (1024, 512, 256, 128):
        if 2 * cand * (row_bytes_in + row_bytes_out) + fixed_bytes <= VMEM_BUDGET:
            tm = cand
            break
    tm = min(tm, _round_up(M, 128))
    while tm > 128 and _round_up(M, tm) // tm < min_steps:
        tm //= 2
    return tm


# ----------------------------------------------------------------------------
# Pallas kernels
# ----------------------------------------------------------------------------
def _matmul_bias_kernel(x_ref, w_ref, b_ref, o_ref, *, relu):
    # (tm, K) @ (K, Cout) on the MXU (bf16 in, f32 accumulate) + folded-BN bias.
    acc = jnp.dot(x_ref[...], w_ref[...], preferred_element_type=jnp.float32)
    acc = acc + b_ref[...]
    if relu:
        acc = jnp.maximum(acc, 0.0)
    o_ref[...] = acc.astype(o_ref.dtype)


def _fused_conv12_kernel(x_ref, w1_ref, b1_ref, w2_ref, b2_ref, o_ref,
                         pad_ref, acc_ref, *, H, W, Wp2):
    """relu(bn2(conv2_3x3(relu(bn1(conv1_1x1(x)))))) for one image (stride 1).

    x_ref : (1, H, W, Cin_p)   w1_ref: (Cin_p, mid)   w2_ref: (9, mid, mid)
    pad_ref: (H+3, Wp2, mid) bf16 scratch (spatially padded out1, Wp2 = rup(W+2, 8))
    acc_ref: (H*Wp2, mid) f32 scratch
    o_ref : (1, H, W, mid)
    """
    mid = pad_ref.shape[-1]

    # conv1 (1x1) + bn1 + relu, written straight into the zero-padded halo scratch.
    pad_ref[...] = jnp.zeros_like(pad_ref)
    x3d = x_ref[0]
    x2d = x3d.reshape(H * W, x3d.shape[-1])
    out1 = jnp.dot(x2d, w1_ref[...], preferred_element_type=jnp.float32) + b1_ref[...]
    out1 = jnp.maximum(out1, 0.0).astype(pad_ref.dtype)
    pad_ref[1:H + 1, 1:W + 1, :] = out1.reshape(H, W, mid)

    # conv2 (3x3, stride 1, pad 1): 9 accumulating matmuls over a FLAT view of the
    # padded scratch -- every tap is a contiguous row-slice (offset kh*Wp2+kw); the
    # junk columns W..Wp2-1 per output row are discarded at the final store.
    flat = pad_ref[...].reshape((H + 3) * Wp2, mid)
    for k in range(9):
        kh, kw = k // 3, k % 3
        off = kh * Wp2 + kw
        tap = flat[off:off + H * Wp2, :]
        part = jnp.dot(tap, w2_ref[k], preferred_element_type=jnp.float32)
        if k == 0:
            acc_ref[...] = part
        else:
            acc_ref[...] += part

    res = jnp.maximum(acc_ref[...] + b2_ref[...], 0.0).astype(o_ref.dtype)
    o_ref[0] = res.reshape(H, Wp2, mid)[:, :W, :]


def _conv3x3_bn_relu_kernel(x_ref, w_ref, b_ref, o_ref, *, stride, Ho, Wo):
    # Legacy (stride-2) path: 3x3 conv as 9 accumulating matmuls over a
    # phase-decomposed, spatially padded NHWC block resident in VMEM.
    #   x_ref: (1, s*s, Hp, Wp, Cp)   w_ref: (9, Cp, Coutp)
    #   b_ref: (1, Coutp)             o_ref: (1, Ho*Wo, Coutp)
    s = stride
    acc = None
    for kh in range(3):
        for kw in range(3):
            ph, ih = kh % s, kh // s
            pw, iw = kw % s, kw // s
            xt = x_ref[0, ph * s + pw, ih:ih + Ho, iw:iw + Wo, :]
            xt = xt.reshape(Ho * Wo, xt.shape[-1])
            part = jnp.dot(xt, w_ref[kh * 3 + kw],
                           preferred_element_type=jnp.float32)
            acc = part if acc is None else acc + part
    acc = acc + b_ref[...]
    o_ref[0, :, :] = jnp.maximum(acc, 0.0).astype(o_ref.dtype)


def _conv3_residual_kernel(*refs, has_proj, emit_preact):
    # bn3(conv3(x)) [+ fused bns(convs(x_in)) | + identity x_in] -> preact; relu -> out.
    if has_proj:
        x_ref, w_ref, b_ref, xs_ref, ws_ref, bs_ref = refs[:6]
        out_refs = refs[6:]
    else:
        x_ref, w_ref, b_ref, sc_ref = refs[:4]
        out_refs = refs[4:]

    acc = jnp.dot(x_ref[...], w_ref[...], preferred_element_type=jnp.float32)
    acc = acc + b_ref[...]
    if has_proj:
        acc = acc + jnp.dot(xs_ref[...], ws_ref[...],
                            preferred_element_type=jnp.float32)
        acc = acc + bs_ref[...]
    else:
        acc = acc + sc_ref[...].astype(jnp.float32)
    if emit_preact:
        out_refs[1][...] = acc.astype(out_refs[1].dtype)
    out_refs[0][...] = jnp.maximum(acc, 0.0).astype(out_refs[0].dtype)


# ----------------------------------------------------------------------------
# pallas_call wrappers
# ----------------------------------------------------------------------------
def _fused_conv12_fits(H, W, cin_p, mid_p):
    Wp2 = _round_up(W + 2, 8)
    per_step = (2 * H * W * cin_p * 2                    # x block (double-buffered)
                + 2 * H * W * mid_p * 2                  # out block (double-buffered)
                + 2 * (cin_p * mid_p + 9 * mid_p * mid_p) * 2   # weight blocks
                + (H + 3) * Wp2 * mid_p * 2              # padded-out1 scratch (bf16)
                + H * Wp2 * mid_p * 4)                   # f32 accumulator scratch
    return per_step <= VMEM_BUDGET


def fused_conv12(x_nhwc_p, w1, b1, w2, b2):
    """Fused conv1(1x1)+bn1+relu + conv2(3x3, stride 1)+bn2+relu, one image per step."""
    N, H, W, Cin_p = x_nhwc_p.shape
    mid_p = w1.shape[1]
    Wp2 = _round_up(W + 2, 8)
    # TODO(synk): tile over output-row bands (with halo) instead of whole images so
    # N=1 inference still gets >=2 parallel grid steps on v7x.
    return pl.pallas_call(
        functools.partial(_fused_conv12_kernel, H=H, W=W, Wp2=Wp2),
        out_shape=jax.ShapeDtypeStruct((N, H, W, mid_p), COMPUTE_DTYPE),
        grid_spec=pltpu.PrefetchScalarGridSpec(
            num_scalar_prefetch=0,
            grid=(N,),
            in_specs=[
                pl.BlockSpec((1, H, W, Cin_p), lambda n: (n, 0, 0, 0)),
                pl.BlockSpec((Cin_p, mid_p), lambda n: (0, 0)),
                pl.BlockSpec((1, mid_p), lambda n: (0, 0)),
                pl.BlockSpec((9, mid_p, mid_p), lambda n: (0, 0, 0)),
                pl.BlockSpec((1, mid_p), lambda n: (0, 0)),
            ],
            out_specs=pl.BlockSpec((1, H, W, mid_p), lambda n: (n, 0, 0, 0)),
            scratch_shapes=[
                pltpu.VMEM((H + 3, Wp2, mid_p), COMPUTE_DTYPE),
                pltpu.VMEM((H * Wp2, mid_p), jnp.float32),
            ]),
        compiler_params=pltpu.CompilerParams(
            dimension_semantics=("parallel",), vmem_limit_bytes=VMEM_LIMIT),
    )(x_nhwc_p.astype(COMPUTE_DTYPE), w1, b1, w2, b2)


def matmul_bn_act(x2d, w, bias, relu):
    """x2d: (M, K); w: (K, Cout) bf16 with BN scale folded in; bias: (1, Cout) f32."""
    M, K = x2d.shape
    Cout = w.shape[1]
    tm = _choose_tm(M, K * 2, Cout * 2 + Cout * 4, 2 * K * Cout * 2 + 4 * Cout * 4)
    Mp = _round_up(M, tm)
    xp = x2d.astype(COMPUTE_DTYPE)
    if Mp != M:
        xp = jnp.pad(xp, ((0, Mp - M), (0, 0)))

    out = pl.pallas_call(
        functools.partial(_matmul_bias_kernel, relu=relu),
        out_shape=jax.ShapeDtypeStruct((Mp, Cout), COMPUTE_DTYPE),
        grid_spec=pltpu.PrefetchScalarGridSpec(
            num_scalar_prefetch=0,
            grid=(Mp // tm,),
            in_specs=[
                pl.BlockSpec((tm, K), lambda i: (i, 0)),
                pl.BlockSpec((K, Cout), lambda i: (0, 0)),
                pl.BlockSpec((1, Cout), lambda i: (0, 0)),
            ],
            out_specs=pl.BlockSpec((tm, Cout), lambda i: (i, 0)),
        ),
        compiler_params=pltpu.CompilerParams(
            dimension_semantics=("parallel",), vmem_limit_bytes=VMEM_LIMIT),
    )(xp, w, bias)
    return out[:M]


def conv3x3_bn_relu(x_nhwc, w9, bias, stride):
    """Legacy 3x3 / pad=1 / stride conv + folded BN + ReLU (used for stride-2 blocks).

    x_nhwc: (N, H, W, Cp); w9: (9, Cp, Coutp) bf16; bias: (1, Coutp) f32.
    Returns ((N, Ho*Wo, Coutp) bf16, Ho, Wo).
    """
    assert stride in (1, 2)
    N, H, W, Cp = x_nhwc.shape
    Coutp = w9.shape[2]
    s = stride
    Ho = (H - 1) // s + 1
    Wo = (W - 1) // s + 1
    Hp = Ho + (2 // s)
    Wp = Wo + (2 // s)

    # TODO(synk): this path still pays an XLA-side pad/phase-stack read+write of out1;
    # fold the halo/phase handling into the kernel like the stride-1 fused path.
    xp = jnp.pad(x_nhwc.astype(COMPUTE_DTYPE), ((0, 0), (1, 1), (1, 1), (0, 0)))
    phases = []
    for ph in range(s):
        for pw in range(s):
            p = xp[:, ph::s, pw::s, :][:, :Hp, :Wp, :]
            p = jnp.pad(p, ((0, 0), (0, Hp - p.shape[1]), (0, Wp - p.shape[2]), (0, 0)))
            phases.append(p)
    phases = jnp.stack(phases, axis=1)                      # (N, s*s, Hp, Wp, Cp)

    out = pl.pallas_call(
        functools.partial(_conv3x3_bn_relu_kernel, stride=s, Ho=Ho, Wo=Wo),
        out_shape=jax.ShapeDtypeStruct((N, Ho * Wo, Coutp), COMPUTE_DTYPE),
        grid_spec=pltpu.PrefetchScalarGridSpec(
            num_scalar_prefetch=0,
            grid=(N,),
            in_specs=[
                pl.BlockSpec((1, s * s, Hp, Wp, Cp), lambda n: (n, 0, 0, 0, 0)),
                pl.BlockSpec((9, Cp, Coutp), lambda n: (0, 0, 0)),
                pl.BlockSpec((1, Coutp), lambda n: (0, 0)),
            ],
            out_specs=pl.BlockSpec((1, Ho * Wo, Coutp), lambda n: (n, 0, 0)),
        ),
        compiler_params=pltpu.CompilerParams(
            dimension_semantics=("parallel",), vmem_limit_bytes=VMEM_LIMIT),
    )(phases, w9, bias)
    return out, Ho, Wo


def conv3_residual(x2d, w3, b3, shortcut, emit_preact):
    """Fused conv3(1x1)+bn3 + shortcut add (identity or fused 1x1 projection) + ReLU.

    Post-ReLU output is bf16; preact is emitted in f32 only when requested."""
    M, Kp = x2d.shape
    Coutp = w3.shape[1]
    has_proj = shortcut[0] == "proj"

    row_in = Kp * 2
    fixed = 2 * Kp * Coutp * 2 + 4 * Coutp * 4
    if has_proj:
        xs2d, ws, bs = shortcut[1], shortcut[2], shortcut[3]
        Kps = ws.shape[0]
        row_in += Kps * 2
        fixed += 2 * Kps * Coutp * 2
    else:
        sc2d = shortcut[1]
        row_in += Coutp * 2                      # identity shortcut is bf16 now
    row_out = Coutp * 2 + Coutp * 4              # bf16 out + f32 accumulator estimate
    if emit_preact:
        row_out += Coutp * 4
    tm = _choose_tm(M, row_in, row_out, fixed)
    Mp = _round_up(M, tm)

    def pad_rows(a):
        a = a.astype(COMPUTE_DTYPE)
        if Mp != M:
            a = jnp.pad(a, ((0, Mp - M), (0, 0)))
        return a

    inputs = [pad_rows(x2d), w3, b3]
    in_specs = [
        pl.BlockSpec((tm, Kp), lambda i: (i, 0)),
        pl.BlockSpec((Kp, Coutp), lambda i: (0, 0)),
        pl.BlockSpec((1, Coutp), lambda i: (0, 0)),
    ]
    if has_proj:
        inputs += [pad_rows(xs2d), ws, bs]
        in_specs += [
            pl.BlockSpec((tm, Kps), lambda i: (i, 0)),
            pl.BlockSpec((Kps, Coutp), lambda i: (0, 0)),
            pl.BlockSpec((1, Coutp), lambda i: (0, 0)),
        ]
    else:
        inputs += [pad_rows(sc2d)]
        in_specs += [pl.BlockSpec((tm, Coutp), lambda i: (i, 0))]

    out_shape = [jax.ShapeDtypeStruct((Mp, Coutp), COMPUTE_DTYPE)]
    out_specs = [pl.BlockSpec((tm, Coutp), lambda i: (i, 0))]
    if emit_preact:
        out_shape.append(jax.ShapeDtypeStruct((Mp, Coutp), jnp.float32))
        out_specs.append(pl.BlockSpec((tm, Coutp), lambda i: (i, 0)))

    res = pl.pallas_call(
        functools.partial(_conv3_residual_kernel,
                          has_proj=has_proj, emit_preact=emit_preact),
        out_shape=tuple(out_shape),
        grid_spec=pltpu.PrefetchScalarGridSpec(
            num_scalar_prefetch=0,
            grid=(Mp // tm,),
            in_specs=in_specs,
            out_specs=out_specs,
        ),
        compiler_params=pltpu.CompilerParams(
            dimension_semantics=("parallel",), vmem_limit_bytes=VMEM_LIMIT),
    )(*inputs)
    return tuple(r[:M] for r in res)


# ----------------------------------------------------------------------------
# Glue: BN folding, parameter init, forward
# ----------------------------------------------------------------------------
def _bn_fold(bn, eps=BN_EPS):
    scale = bn["gamma"] / jnp.sqrt(bn["var"] + eps)
    bias = bn["beta"] - bn["mean"] * scale
    return scale, bias


def _fold_conv1x1_bn(w, bn):
    # (Cout, Cin, 1, 1) conv weight + BN -> (Cin, Cout) matmul weight + (1, Cout) bias.
    scale, bias = _bn_fold(bn)
    cout, cin = w.shape[:2]
    wm = w.reshape(cout, cin).T * scale[None, :]
    return wm, bias.reshape(1, -1)


def init_bottleneck_params(key, in_planes, planes, stride):
    out_planes = EXPANSION * planes
    ks = jax.random.split(key, 8)

    def bn_init(k, c):
        k1, k2, k3, k4 = jax.random.split(k, 4)
        return dict(
            gamma=1.0 + 0.1 * jax.random.normal(k1, (c,), jnp.float32),
            beta=0.1 * jax.random.normal(k2, (c,), jnp.float32),
            mean=0.1 * jax.random.normal(k3, (c,), jnp.float32),
            var=0.5 + jnp.abs(jax.random.normal(k4, (c,), jnp.float32)),
        )

    p = {
        "w1": 0.2 * jax.random.normal(ks[0], (planes, in_planes, 1, 1), jnp.float32),
        "bn1": bn_init(ks[1], planes),
        "w2": 0.2 * jax.random.normal(ks[2], (planes, planes, 3, 3), jnp.float32),
        "bn2": bn_init(ks[3], planes),
        "w3": 0.2 * jax.random.normal(ks[4], (out_planes, planes, 1, 1), jnp.float32),
        "bn3": bn_init(ks[5], out_planes),
    }
    if stride != 1 or in_planes != out_planes:
        p["ws"] = 0.2 * jax.random.normal(ks[6], (out_planes, in_planes, 1, 1), jnp.float32)
        p["bns"] = bn_init(ks[7], out_planes)
    return p


def bottleneck_forward_nhwc(x, params, stride, is_last):
    """Core forward: NHWC in, NHWC out (out in bf16, preact in f32 when is_last)."""
    assert stride in (1, 2)
    N, H, W, Cin = x.shape
    planes = params["w1"].shape[0]
    out_planes = EXPANSION * planes

    cin_p = _round_up(Cin, LANE)
    mid_p = _round_up(planes, LANE)
    out_p = _round_up(out_planes, LANE)

    # Fold BN into the weights (scale -> columns, shift -> bias), pad every channel
    # dim to a lane multiple (zero pads are exact no-ops), weights in bf16.
    w1, b1 = _fold_conv1x1_bn(params["w1"], params["bn1"])
    w1 = _pad_to(w1, (cin_p, mid_p)).astype(COMPUTE_DTYPE)
    b1 = _pad_to(b1, (1, mid_p))

    s2, b2v = _bn_fold(params["bn2"])
    w2 = jnp.transpose(params["w2"], (2, 3, 1, 0)).reshape(9, planes, planes)
    w2 = w2 * s2[None, None, :]
    w2 = _pad_to(w2, (9, mid_p, mid_p)).astype(COMPUTE_DTYPE)
    b2 = _pad_to(b2v.reshape(1, -1), (1, mid_p))

    w3, b3 = _fold_conv1x1_bn(params["w3"], params["bn3"])
    w3 = _pad_to(w3, (mid_p, out_p)).astype(COMPUTE_DTYPE)
    b3 = _pad_to(b3, (1, out_p))

    x_p = _pad_to(x, (N, H, W, cin_p)).astype(COMPUTE_DTYPE)

    if stride == 1 and _fused_conv12_fits(H, W, cin_p, mid_p):
        # conv1 + bn1 + relu + conv2 + bn2 + relu in ONE kernel (no out1 round trip).
        out2 = fused_conv12(x_p, w1, b1, w2, b2)            # (N, H, W, mid_p) bf16
        Ho, Wo = H, W
        out2 = out2.reshape(N * Ho * Wo, mid_p)
    else:
        # Legacy path (stride 2, or oversize images): separate conv1 kernel + phase
        # decomposition + conv2 kernel.
        out1 = matmul_bn_act(x_p.reshape(N * H * W, cin_p), w1, b1, relu=True)
        out1 = out1.reshape(N, H, W, mid_p)
        out2, Ho, Wo = conv3x3_bn_relu(out1, w2, b2, stride)
        out2 = out2.reshape(N * Ho * Wo, mid_p)

    # shortcut + conv3 (1x1) + bn3 + add + relu, fused in one kernel
    if "ws" in params:
        ws, bs = _fold_conv1x1_bn(params["ws"], params["bns"])
        ws = _pad_to(ws, (cin_p, out_p)).astype(COMPUTE_DTYPE)
        bs = _pad_to(bs, (1, out_p))
        xs = x_p if stride == 1 else x_p[:, ::stride, ::stride, :]
        xs = xs.reshape(N * Ho * Wo, cin_p)
        shortcut = ("proj", xs, ws, bs)
    else:
        assert stride == 1 and cin_p == out_p, "identity shortcut needs matching shapes"
        shortcut = ("identity", x_p.reshape(N * Ho * Wo, out_p))

    res = conv3_residual(out2, w3, b3, shortcut, emit_preact=is_last)

    out = res[0][:, :out_planes].reshape(N, Ho, Wo, out_planes)
    if is_last:
        preact = res[1][:, :out_planes].reshape(N, Ho, Wo, out_planes)
        return out, preact
    return out


def bottleneck_forward(x_nchw, params, stride, is_last):
    """PyTorch-convention wrapper: NCHW f32 in / NCHW f32 out.

    In a full network, the NCHW<->NHWC transposes and the f32 casts should be hoisted
    to the network boundary and `bottleneck_forward_nhwc` chained directly so
    activations stay bf16 NHWC between blocks."""
    x = jnp.transpose(x_nchw, (0, 2, 3, 1))

    def to_nchw(a):
        return jnp.transpose(a, (0, 3, 1, 2)).astype(jnp.float32)

    res = bottleneck_forward_nhwc(x, params, stride, is_last)
    if is_last:
        return to_nchw(res[0]), to_nchw(res[1])
    return to_nchw(res)


# ----------------------------------------------------------------------------
# Plain-JAX reference (mirrors the PyTorch forward, inference-mode BN, f32)
# ----------------------------------------------------------------------------
def _ref_bn(y_nchw, bn):
    scale = bn["gamma"] / jnp.sqrt(bn["var"] + BN_EPS)
    bias = bn["beta"] - bn["mean"] * scale
    return y_nchw * scale[None, :, None, None] + bias[None, :, None, None]


def bottleneck_reference(x, params, stride):
    def conv(inp, w, s, pad):
        return jax.lax.conv_general_dilated(
            inp, w, (s, s), pad, dimension_numbers=("NCHW", "OIHW", "NCHW"))

    out = jax.nn.relu(_ref_bn(conv(x, params["w1"], 1, "VALID"), params["bn1"]))
    out = jax.nn.relu(_ref_bn(conv(out, params["w2"], stride, [(1, 1), (1, 1)]), params["bn2"]))
    out = _ref_bn(conv(out, params["w3"], 1, "VALID"), params["bn3"])
    if "ws" in params:
        sc = _ref_bn(conv(x, params["ws"], stride, "VALID"), params["bns"])
    else:
        sc = x
    preact = out + sc
    return jax.nn.relu(preact), preact


# ----------------------------------------------------------------------------
if __name__ == "__main__":
    key = jax.random.PRNGKey(0)
    fwd = jax.jit(bottleneck_forward, static_argnums=(2, 3))

    # (in_planes, planes, stride, is_last):
    #   fused path + projection / fused path + identity / legacy strided path
    configs = [(4, 4, 1, True), (16, 4, 1, False), (4, 4, 2, True)]
    for cfg_i, (in_planes, planes, stride, is_last) in enumerate(configs):
        key, k_x, k_p = jax.random.split(key, 3)
        x = jax.random.normal(k_x, (2, in_planes, 16, 16), jnp.float32)   # NCHW
        params = init_bottleneck_params(k_p, in_planes, planes, stride)

        res = fwd(x, params, stride, is_last)
        res = jax.block_until_ready(res)

        ref_out, ref_pre = bottleneck_reference(x, params, stride)
        if is_last:
            out, pre = res
        else:
            out, pre = res, None
        # bf16 MXU inputs / bf16 activation streams vs f32 reference => loose tolerance
        assert jnp.allclose(out, ref_out, rtol=5e-2, atol=5e-2), f"out mismatch (cfg {cfg_i})"
        if pre is not None:
            assert jnp.allclose(pre, ref_pre, rtol=5e-2, atol=5e-2), f"preact mismatch (cfg {cfg_i})"

    print("KERNEL_OK")
</pallas_src>

<mosaic_0001>
module attributes {stable_mosaic.version = 11 : i64} {
  func.func @_fused_conv12_kernel(%arg0: i32, %arg1: memref<1x16x16x128xbf16, #tpu.memory_space<vmem>>, %arg2: memref<128x128xbf16, #tpu.memory_space<vmem>>, %arg3: memref<1x128xf32, #tpu.memory_space<vmem>>, %arg4: memref<9x128x128xbf16, #tpu.memory_space<vmem>>, %arg5: memref<1x128xf32, #tpu.memory_space<vmem>>, %arg6: memref<1x16x16x128xbf16, #tpu.memory_space<vmem>>, %arg7: memref<19x24x128xbf16, #tpu.memory_space<vmem>>, %arg8: memref<384x128xf32, #tpu.memory_space<vmem>>) attributes {dimension_semantics = [#tpu.dimension_semantics<parallel>], iteration_bounds = array<i64: 2>, scalar_prefetch = 0 : i64, scratch_operands = 2 : i64, tpu.core_type = #tpu.core_type<tc>, window_params = [{transform_indices = @transform_0, window_bounds = array<i64: 1, 16, 16, 128>}, {pipeline_mode = #tpu.pipeline_mode<synchronous>, transform_indices = @transform_1, window_bounds = array<i64: 128, 128>}, {pipeline_mode = #tpu.pipeline_mode<synchronous>, transform_indices = @transform_2, window_bounds = array<i64: 1, 128>}, {pipeline_mode = #tpu.pipeline_mode<synchronous>, transform_indices = @transform_3, window_bounds = array<i64: 9, 128, 128>}, {pipeline_mode = #tpu.pipeline_mode<synchronous>, transform_indices = @transform_4, window_bounds = array<i64: 1, 128>}, {transform_indices = @transform_5, window_bounds = array<i64: 1, 16, 16, 128>}]} {
    %cst = arith.constant 0.000000e+00 : bf16
    %0 = vector.broadcast %cst : bf16 to vector<19x24x128xbf16>
    %c0 = arith.constant 0 : index
    %c0_0 = arith.constant 0 : index
    %c0_1 = arith.constant 0 : index
    %1 = vector.load %arg7[%c0, %c0_0, %c0_1] : memref<19x24x128xbf16, #tpu.memory_space<vmem>>, vector<19x24x128xbf16>
    tpu.vector_store %arg7[%c0, %c0_0, %c0_1], %0 {strides = array<i32>} : memref<19x24x128xbf16, #tpu.memory_space<vmem>>, vector<19x24x128xbf16>,
    %c0_2 = arith.constant 0 : index
    %c0_3 = arith.constant 0 : index
    %c0_4 = arith.constant 0 : index
    %c0_5 = arith.constant 0 : index
    %2 = vector.load %arg1[%c0_2, %c0_3, %c0_4, %c0_5] : memref<1x16x16x128xbf16, #tpu.memory_space<vmem>>, vector<1x16x16x128xbf16>
    %3 = vector.shape_cast %2 : vector<1x16x16x128xbf16> to vector<16x16x128xbf16>
    %4 = vector.shape_cast %3 : vector<16x16x128xbf16> to vector<256x128xbf16>
    %c0_6 = arith.constant 0 : index
    %c0_7 = arith.constant 0 : index
    %5 = vector.load %arg2[%c0_6, %c0_7] : memref<128x128xbf16, #tpu.memory_space<vmem>>, vector<128x128xbf16>
    %cst_8 = arith.constant dense<0.000000e+00> : vector<256x128xf32>
    %6 = tpu.matmul %4, %5, %cst_8 {dimension_numbers = #tpu.dot_dimension_numbers<[1], [0], [0], [1], [0, 0, 1, 1], [], []>} : vector<256x128xbf16>, vector<128x128xbf16>, vector<256x128xf32> -> vector<256x128xf32>
    %c0_9 = arith.constant 0 : index
    %c0_10 = arith.constant 0 : index
    %7 = vector.load %arg3[%c0_9, %c0_10] : memref<1x128xf32, #tpu.memory_space<vmem>>, vector<1x128xf32>
    %8 = vector.broadcast %7 : vector<1x128xf32> to vector<256x128xf32>
    %9 = arith.addf %6, %8 : vector<256x128xf32>
    %cst_11 = arith.constant 0.000000e+00 : f32
    %10 = vector.broadcast %cst_11 : f32 to vector<256x128xf32>
    %11 = arith.maximumf %9, %10 : vector<256x128xf32>
    %12 = arith.truncf %11 : vector<256x128xf32> to vector<256x128xbf16>
    %13 = vector.shape_cast %12 : vector<256x128xbf16> to vector<16x16x128xbf16>
    %c1 = arith.constant 1 : index
    %c1_12 = arith.constant 1 : index
    %c0_13 = arith.constant 0 : index
    %14 = vector.load %arg7[%c1, %c1_12, %c0_13] : memref<19x24x128xbf16, #tpu.memory_space<vmem>>, vector<16x16x128xbf16>
    tpu.vector_store %arg7[%c1, %c1_12, %c0_13], %13 {strides = array<i32>} : memref<19x24x128xbf16, #tpu.memory_space<vmem>>, vector<16x16x128xbf16>,
    %c0_14 = arith.constant 0 : index
    %c0_15 = arith.constant 0 : index
    %c0_16 = arith.constant 0 : index
    %15 = vector.load %arg7[%c0_14, %c0_15, %c0_16] : memref<19x24x128xbf16, #tpu.memory_space<vmem>>, vector<19x24x128xbf16>
    %16 = vector.shape_cast %15 : vector<19x24x128xbf16> to vector<456x128xbf16>
    %17 = vector.extract_strided_slice %16 {offsets = [0, 0], sizes = [384, 128], strides = [1, 1]} : vector<456x128xbf16> to vector<384x128xbf16>
    %c0_17 = arith.constant 0 : index
    %c0_18 = arith.constant 0 : index
    %c0_19 = arith.constant 0 : index
    %18 = vector.load %arg4[%c0_17, %c0_18, %c0_19] : memref<9x128x128xbf16, #tpu.memory_space<vmem>>, vector<1x128x128xbf16>
    %19 = vector.shape_cast %18 : vector<1x128x128xbf16> to vector<128x128xbf16>
    %cst_20 = arith.constant dense<0.000000e+00> : vector<384x128xf32>
    %20 = tpu.matmul %17, %19, %cst_20 {dimension_numbers = #tpu.dot_dimension_numbers<[1], [0], [0], [1], [0, 0, 1, 1], [], []>} : vector<384x128xbf16>, vector<128x128xbf16>, vector<384x128xf32> -> vector<384x128xf32>
    %c0_21 = arith.constant 0 : index
    %c0_22 = arith.constant 0 : index
    %21 = vector.load %arg8[%c0_21, %c0_22] : memref<384x128xf32, #tpu.memory_space<vmem>>, vector<384x128xf32>
    tpu.vector_store %arg8[%c0_21, %c0_22], %20 {strides = array<i32>} : memref<384x128xf32, #tpu.memory_space<vmem>>, vector<384x128xf32>,
    %22 = vector.extract_strided_slice %16 {offsets = [1, 0], sizes = [384, 128], strides = [1, 1]} : vector<456x128xbf16> to vector<384x128xbf16>
    %c1_23 = arith.constant 1 : index
    %c0_24 = arith.constant 0 : index
    %c0_25 = arith.constant 0 : index
    %23 = vector.load %arg4[%c1_23, %c0_24, %c0_25] : memref<9x128x128xbf16, #tpu.memory_space<vmem>>, vector<1x128x128xbf16>
    %24 = vector.shape_cast %23 : vector<1x128x128xbf16> to vector<128x128xbf16>
    %cst_26 = arith.constant dense<0.000000e+00> : vector<384x128xf32>
    %25 = tpu.matmul %22, %24, %cst_26 {dimension_numbers = #tpu.dot_dimension_numbers<[1], [0], [0], [1], [0, 0, 1, 1], [], []>} : vector<384x128xbf16>, vector<128x128xbf16>, vector<384x128xf32> -> vector<384x128xf32>
    %c0_27 = arith.constant 0 : index
    %c0_28 = arith.constant 0 : index
    %26 = vector.load %arg8[%c0_27, %c0_28] : memref<384x128xf32, #tpu.memory_space<vmem>>, vector<384x128xf32>
    %27 = arith.addf %26, %25 : vector<384x128xf32>
    %c0_29 = arith.constant 0 : index
    %c0_30 = arith.constant 0 : index
    %28 = vector.load %arg8[%c0_29, %c0_30] : memref<384x128xf32, #tpu.memory_space<vmem>>, vector<384x128xf32>
    tpu.vector_store %arg8[%c0_29, %c0_30], %27 {strides = array<i32>} : memref<384x128xf32, #tpu.memory_space<vmem>>, vector<384x128xf32>,
    %29 = vector.extract_strided_slice %16 {offsets = [2, 0], sizes = [384, 128], strides = [1, 1]} : vector<456x128xbf16> to vector<384x128xbf16>
    %c2 = arith.constant 2 : index
    %c0_31 = arith.constant 0 : index
    %c0_32 = arith.constant 0 : index
    %30 = vector.load %arg4[%c2, %c0_31, %c0_32] : memref<9x128x128xbf16, #tpu.memory_space<vmem>>, vector<1x128x128xbf16>
    %31 = vector.shape_cast %30 : vector<1x128x128xbf16> to vector<128x128xbf16>
    %cst_33 = arith.constant dense<0.000000e+00> : vector<384x128xf32>
    %32 = tpu.matmul %29, %31, %cst_33 {dimension_numbers = #tpu.dot_dimension_numbers<[1], [0], [0], [1], [0, 0, 1, 1], [], []>} : vector<384x128xbf16>, vector<128x128xbf16>, vector<384x128xf32> -> vector<384x128xf32>
    %c0_34 = arith.constant 0 : index
    %c0_35 = arith.constant 0 : index
    %33 = vector.load %arg8[%c0_34, %c0_35] : memref<384x128xf32, #tpu.memory_space<vmem>>, vector<384x128xf32>
    %34 = arith.addf %33, %32 : vector<384x128xf32>
    %c0_36 = arith.constant 0 : index
    %c0_37 = arith.constant 0 : index
    %35 = vector.load %arg8[%c0_36, %c0_37] : memref<384x128xf32, #tpu.memory_space<vmem>>, vector<384x128xf32>
    tpu.vector_store %arg8[%c0_36, %c0_37], %34 {strides = array<i32>} : memref<384x128xf32, #tpu.memory_space<vmem>>, vector<384x128xf32>,
    %36 = vector.extract_strided_slice %16 {offsets = [24, 0], sizes = [384, 128], strides = [1, 1]} : vector<456x128xbf16> to vector<384x128xbf16>
    %c3 = arith.constant 3 : index
    %c0_38 = arith.constant 0 : index
    %c0_39 = arith.constant 0 : index
    %37 = vector.load %arg4[%c3, %c0_38, %c0_39] : memref<9x128x128xbf16, #tpu.memory_space<vmem>>, vector<1x128x128xbf16>
    %38 = vector.shape_cast %37 : vector<1x128x128xbf16> to vector<128x128xbf16>
    %cst_40 = arith.constant dense<0.000000e+00> : vector<384x128xf32>
    %39 = tpu.matmul %36, %38, %cst_40 {dimension_numbers = #tpu.dot_dimension_numbers<[1], [0], [0], [1], [0, 0, 1, 1], [], []>} : vector<384x128xbf16>, vector<128x128xbf16>, vector<384x128xf32> -> vector<384x128xf32>
    %c0_41 = arith.constant 0 : index
    %c0_42 = arith.constant 0 : index
    %40 = vector.load %arg8[%c0_41, %c0_42] : memref<384x128xf32, #tpu.memory_space<vmem>>, vector<384x128xf32>
    %41 = arith.addf %40, %39 : vector<384x128xf32>
    %c0_43 = arith.constant 0 : index
    %c0_44 = arith.constant 0 : index
    %42 = vector.load %arg8[%c0_43, %c0_44] : memref<384x128xf32, #tpu.memory_space<vmem>>, vector<384x128xf32>
    tpu.vector_store %arg8[%c0_43, %c0_44], %41 {strides = array<i32>} : memref<384x128xf32, #tpu.memory_space<vmem>>, vector<384x128xf32>,
    %43 = vector.extract_strided_slice %16 {offsets = [25, 0], sizes = [384, 128], strides = [1, 1]} : vector<456x128xbf16> to vector<384x128xbf16>
    %c4 = arith.constant 4 : index
    %c0_45 = arith.constant 0 : index
    %c0_46 = arith.constant 0 : index
    %44 = vector.load %arg4[%c4, %c0_45, %c0_46] : memref<9x128x128xbf16, #tpu.memory_space<vmem>>, vector<1x128x128xbf16>
    %45 = vector.shape_cast %44 : vector<1x128x128xbf16> to vector<128x128xbf16>
    %cst_47 = arith.constant dense<0.000000e+00> : vector<384x128xf32>
    %46 = tpu.matmul %43, %45, %cst_47 {dimension_numbers = #tpu.dot_dimension_numbers<[1], [0], [0], [1], [0, 0, 1, 1], [], []>} : vector<384x128xbf16>, vector<128x128xbf16>, vector<384x128xf32> -> vector<384x128xf32>
    %c0_48 = arith.constant 0 : index
    %c0_49 = arith.constant 0 : index
    %47 = vector.load %arg8[%c0_48, %c0_49] : memref<384x128xf32, #tpu.memory_space<vmem>>, vector<384x128xf32>
    %48 = arith.addf %47, %46 : vector<384x128xf32>
    %c0_50 = arith.constant 0 : index
    %c0_51 = arith.constant 0 : index
    %49 = vector.load %arg8[%c0_50, %c0_51] : memref<384x128xf32, #tpu.memory_space<vmem>>, vector<384x128xf32>
    tpu.vector_store %arg8[%c0_50, %c0_51], %48 {strides = array<i32>} : memref<384x128xf32, #tpu.memory_space<vmem>>, vector<384x128xf32>,
    %50 = vector.extract_strided_slice %16 {offsets = [26, 0], sizes = [384, 128], strides = [1, 1]} : vector<456x128xbf16> to vector<384x128xbf16>
    %c5 = arith.constant 5 : index
    %c0_52 = arith.constant 0 : index
    %c0_53 = arith.constant 0 : index
    %51 = vector.load %arg4[%c5, %c0_52, %c0_53] : memref<9x128x128xbf16, #tpu.memory_space<vmem>>, vector<1x128x128xbf16>
    %52 = vector.shape_cast %51 : vector<1x128x128xbf16> to vector<128x128xbf16>
    %cst_54 = arith.constant dense<0.000000e+00> : vector<384x128xf32>
    %53 = tpu.matmul %50, %52, %cst_54 {dimension_numbers = #tpu.dot_dimension_numbers<[1], [0], [0], [1], [0, 0, 1, 1], [], []>} : vector<384x128xbf16>, vector<128x128xbf16>, vector<384x128xf32> -> vector<384x128xf32>
    %c0_55 = arith.constant 0 : index
    %c0_56 = arith.constant 0 : index
    %54 = vector.load %arg8[%c0_55, %c0_56] : memref<384x128xf32, #tpu.memory_space<vmem>>, vector<384x128xf32>
    %55 = arith.addf %54, %53 : vector<384x128xf32>
    %c0_57 = arith.constant 0 : index
    %c0_58 = arith.constant 0 : index
    %56 = vector.load %arg8[%c0_57, %c0_58] : memref<384x128xf32, #tpu.memory_space<vmem>>, vector<384x128xf32>
    tpu.vector_store %arg8[%c0_57, %c0_58], %55 {strides = array<i32>} : memref<384x128xf32, #tpu.memory_space<vmem>>, vector<384x128xf32>,
    %57 = vector.extract_strided_slice %16 {offsets = [48, 0], sizes = [384, 128], strides = [1, 1]} : vector<456x128xbf16> to vector<384x128xbf16>
    %c6 = arith.constant 6 : index
    %c0_59 = arith.constant 0 : index
    %c0_60 = arith.constant 0 : index
    %58 = vector.load %arg4[%c6, %c0_59, %c0_60] : memref<9x128x128xbf16, #tpu.memory_space<vmem>>, vector<1x128x128xbf16>
    %59 = vector.shape_cast %58 : vector<1x128x128xbf16> to vector<128x128xbf16>
    %cst_61 = arith.constant dense<0.000000e+00> : vector<384x128xf32>
    %60 = tpu.matmul %57, %59, %cst_61 {dimension_numbers = #tpu.dot_dimension_numbers<[1], [0], [0], [1], [0, 0, 1, 1], [], []>} : vector<384x128xbf16>, vector<128x128xbf16>, vector<384x128xf32> -> vector<384x128xf32>
    %c0_62 = arith.constant 0 : index
    %c0_63 = arith.constant 0 : index
    %61 = vector.load %arg8[%c0_62, %c0_63] : memref<384x128xf32, #tpu.memory_space<vmem>>, vector<384x128xf32>
    %62 = arith.addf %61, %60 : vector<384x128xf32>
    %c0_64 = arith.constant 0 : index
    %c0_65 = arith.constant 0 : index
    %63 = vector.load %arg8[%c0_64, %c0_65] : memref<384x128xf32, #tpu.memory_space<vmem>>, vector<384x128xf32>
    tpu.vector_store %arg8[%c0_64, %c0_65], %62 {strides = array<i32>} : memref<384x128xf32, #tpu.memory_space<vmem>>, vector<384x128xf32>,
    %64 = vector.extract_strided_slice %16 {offsets = [49, 0], sizes = [384, 128], strides = [1, 1]} : vector<456x128xbf16> to vector<384x128xbf16>
    %c7 = arith.constant 7 : index
    %c0_66 = arith.constant 0 : index
    %c0_67 = arith.constant 0 : index
    %65 = vector.load %arg4[%c7, %c0_66, %c0_67] : memref<9x128x128xbf16, #tpu.memory_space<vmem>>, vector<1x128x128xbf16>
    %66 = vector.shape_cast %65 : vector<1x128x128xbf16> to vector<128x128xbf16>
    %cst_68 = arith.constant dense<0.000000e+00> : vector<384x128xf32>
    %67 = tpu.matmul %64, %66, %cst_68 {dimension_numbers = #tpu.dot_dimension_numbers<[1], [0], [0], [1], [0, 0, 1, 1], [], []>} : vector<384x128xbf16>, vector<128x128xbf16>, vector<384x128xf32> -> vector<384x128xf32>
    %c0_69 = arith.constant 0 : index
    %c0_70 = arith.constant 0 : index
    %68 = vector.load %arg8[%c0_69, %c0_70] : memref<384x128xf32, #tpu.memory_space<vmem>>, vector<384x128xf32>
    %69 = arith.addf %68, %67 : vector<384x128xf32>
    %c0_71 = arith.constant 0 : index
    %c0_72 = arith.constant 0 : index
    %70 = vector.load %arg8[%c0_71, %c0_72] : memref<384x128xf32, #tpu.memory_space<vmem>>, vector<384x128xf32>
    tpu.vector_store %arg8[%c0_71, %c0_72], %69 {strides = array<i32>} : memref<384x128xf32, #tpu.memory_space<vmem>>, vector<384x128xf32>,
    %71 = vector.extract_strided_slice %16 {offsets = [50, 0], sizes = [384, 128], strides = [1, 1]} : vector<456x128xbf16> to vector<384x128xbf16>
    %c8 = arith.constant 8 : index
    %c0_73 = arith.constant 0 : index
    %c0_74 = arith.constant 0 : index
    %72 = vector.load %arg4[%c8, %c0_73, %c0_74] : memref<9x128x128xbf16, #tpu.memory_space<vmem>>, vector<1x128x128xbf16>
    %73 = vector.shape_cast %72 : vector<1x128x128xbf16> to vector<128x128xbf16>
    %cst_75 = arith.constant dense<0.000000e+00> : vector<384x128xf32>
    %74 = tpu.matmul %71, %73, %cst_75 {dimension_numbers = #tpu.dot_dimension_numbers<[1], [0], [0], [1], [0, 0, 1, 1], [], []>} : vector<384x128xbf16>, vector<128x128xbf16>, vector<384x128xf32> -> vector<384x128xf32>
    %c0_76 = arith.constant 0 : index
    %c0_77 = arith.constant 0 : index
    %75 = vector.load %arg8[%c0_76, %c0_77] : memref<384x128xf32, #tpu.memory_space<vmem>>, vector<384x128xf32>
    %76 = arith.addf %75, %74 : vector<384x128xf32>
    %c0_78 = arith.constant 0 : index
    %c0_79 = arith.constant 0 : index
    %77 = vector.load %arg8[%c0_78, %c0_79] : memref<384x128xf32, #tpu.memory_space<vmem>>, vector<384x128xf32>
    tpu.vector_store %arg8[%c0_78, %c0_79], %76 {strides = array<i32>} : memref<384x128xf32, #tpu.memory_space<vmem>>, vector<384x128xf32>,
    %c0_80 = arith.constant 0 : index
    %c0_81 = arith.constant 0 : index
    %78 = vector.load %arg8[%c0_80, %c0_81] : memref<384x128xf32, #tpu.memory_space<vmem>>, vector<384x128xf32>
    %c0_82 = arith.constant 0 : index
    %c0_83 = arith.constant 0 : index
    %79 = vector.load %arg5[%c0_82, %c0_83] : memref<1x128xf32, #tpu.memory_space<vmem>>, vector<1x128xf32>
    %80 = vector.broadcast %79 : vector<1x128xf32> to vector<384x128xf32>
    %81 = arith.addf %78, %80 : vector<384x128xf32>
    %cst_84 = arith.constant 0.000000e+00 : f32
    %82 = vector.broadcast %cst_84 : f32 to vector<384x128xf32>
    %83 = arith.maximumf %81, %82 : vector<384x128xf32>
    %84 = arith.truncf %83 : vector<384x128xf32> to vector<384x128xbf16>
    %85 = vector.shape_cast %84 : vector<384x128xbf16> to vector<16x24x128xbf16>
    %86 = vector.extract_strided_slice %85 {offsets = [0, 0, 0], sizes = [16, 16, 128], strides = [1, 1, 1]} : vector<16x24x128xbf16> to vector<16x16x128xbf16>
    %c0_85 = arith.constant 0 : index
    %c0_86 = arith.constant 0 : index
    %c0_87 = arith.constant 0 : index
    %c0_88 = arith.constant 0 : index
    %87 = vector.load %arg6[%c0_85, %c0_86, %c0_87, %c0_88] : memref<1x16x16x128xbf16, #tpu.memory_space<vmem>>, vector<1x16x16x128xbf16>
    %88 = vector.shape_cast %87 : vector<1x16x16x128xbf16> to vector<16x16x128xbf16>
    %89 = vector.shape_cast %86 : vector<16x16x128xbf16> to vector<1x16x16x128xbf16>
    tpu.vector_store %arg6[%c0_85, %c0_86, %c0_87, %c0_88], %89 {strides = array<i32>} : memref<1x16x16x128xbf16, #tpu.memory_space<vmem>>, vector<1x16x16x128xbf16>,
    return
  }
  func.func @transform_0(%arg0: i32) -> (i32, i32, i32, i32) {
    %c0_i32 = arith.constant 0 : i32
    %c0_i32_0 = arith.constant 0 : i32
    %c0_i32_1 = arith.constant 0 : i32
    %c0_i32_2 = arith.constant 0 : i32
    return %arg0, %c0_i32, %c0_i32_0, %c0_i32_1 : i32, i32, i32, i32
  }
  func.func @transform_1(%arg0: i32) -> (i32, i32) {
    %c0_i32 = arith.constant 0 : i32
    %c0_i32_0 = arith.constant 0 : i32
    %c0_i32_1 = arith.constant 0 : i32
    return %c0_i32, %c0_i32_0 : i32, i32
  }
  func.func @transform_2(%arg0: i32) -> (i32, i32) {
    %c0_i32 = arith.constant 0 : i32
    %c0_i32_0 = arith.constant 0 : i32
    %c0_i32_1 = arith.constant 0 : i32
    return %c0_i32, %c0_i32_0 : i32, i32
  }
  func.func @transform_3(%arg0: i32) -> (i32, i32, i32) {
    %c0_i32 = arith.constant 0 : i32
    %c0_i32_0 = arith.constant 0 : i32
    %c0_i32_1 = arith.constant 0 : i32
    %c0_i32_2 = arith.constant 0 : i32
    return %c0_i32, %c0_i32_0, %c0_i32_1 : i32, i32, i32
  }
  func.func @transform_4(%arg0: i32) -> (i32, i32) {
    %c0_i32 = arith.constant 0 : i32
    %c0_i32_0 = arith.constant 0 : i32
    %c0_i32_1 = arith.constant 0 : i32
    return %c0_i32, %c0_i32_0 : i32, i32
  }
  func.func @transform_5(%arg0: i32) -> (i32, i32, i32, i32) {
    %c0_i32 = arith.constant 0 : i32
    %c0_i32_0 = arith.constant 0 : i32
    %c0_i32_1 = arith.constant 0 : i32
    %c0_i32_2 = arith.constant 0 : i32
    return %arg0, %c0_i32, %c0_i32_0, %c0_i32_1 : i32, i32, i32, i32
  }
}

module attributes {stable_mosaic.version = 11 : i64} {
  func.func @_conv3_residual_kernel(%arg0: i32, %arg1: memref<256x128xbf16, #tpu.memory_space<vmem>>, %arg2: memref<128x128xbf16, #tpu.memory_space<vmem>>, %arg3: memref<1x128xf32, #tpu.memory_space<vmem>>, %arg4: memref<256x128xbf16, #tpu.memory_space<vmem>>, %arg5: memref<128x128xbf16, #tpu.memory_space<vmem>>, %arg6: memref<1x128xf32, #tpu.memory_space<vmem>>, %arg7: memref<256x128xbf16, #tpu.memory_space<vmem>>, %arg8: memref<256x128xf32, #tpu.memory_space<vmem>>) attributes {dimension_semantics = [#tpu.dimension_semantics<parallel>], iteration_bounds = array<i64: 2>, scalar_prefetch = 0 : i64, scratch_operands = 0 : i64, tpu.core_type = #tpu.core_type<tc>, window_params = [{transform_indices = @transform_0, window_bounds = array<i64: 256, 128>}, {pipeline_mode = #tpu.pipeline_mode<synchronous>, transform_indices = @transform_1, window_bounds = array<i64: 128, 128>}, {pipeline_mode = #tpu.pipeline_mode<synchronous>, transform_indices = @transform_2, window_bounds = array<i64: 1, 128>}, {transform_indices = @transform_3, window_bounds = array<i64: 256, 128>}, {pipeline_mode = #tpu.pipeline_mode<synchronous>, transform_indices = @transform_4, window_bounds = array<i64: 128, 128>}, {pipeline_mode = #tpu.pipeline_mode<synchronous>, transform_indices = @transform_5, window_bounds = array<i64: 1, 128>}, {transform_indices = @transform_6, window_bounds = array<i64: 256, 128>}, {transform_indices = @transform_7, window_bounds = array<i64: 256, 128>}]} {
    %c0 = arith.constant 0 : index
    %c0_0 = arith.constant 0 : index
    %0 = vector.load %arg1[%c0, %c0_0] : memref<256x128xbf16, #tpu.memory_space<vmem>>, vector<256x128xbf16>
    %c0_1 = arith.constant 0 : index
    %c0_2 = arith.constant 0 : index
    %1 = vector.load %arg2[%c0_1, %c0_2] : memref<128x128xbf16, #tpu.memory_space<vmem>>, vector<128x128xbf16>
    %cst = arith.constant dense<0.000000e+00> : vector<256x128xf32>
    %2 = tpu.matmul %0, %1, %cst {dimension_numbers = #tpu.dot_dimension_numbers<[1], [0], [0], [1], [0, 0, 1, 1], [], []>} : vector<256x128xbf16>, vector<128x128xbf16>, vector<256x128xf32> -> vector<256x128xf32>
    %c0_3 = arith.constant 0 : index
    %c0_4 = arith.constant 0 : index
    %3 = vector.load %arg3[%c0_3, %c0_4] : memref<1x128xf32, #tpu.memory_space<vmem>>, vector<1x128xf32>
    %4 = vector.broadcast %3 : vector<1x128xf32> to vector<256x128xf32>
    %5 = arith.addf %2, %4 : vector<256x128xf32>
    %c0_5 = arith.constant 0 : index
    %c0_6 = arith.constant 0 : index
    %6 = vector.load %arg4[%c0_5, %c0_6] : memref<256x128xbf16, #tpu.memory_space<vmem>>, vector<256x128xbf16>
    %c0_7 = arith.constant 0 : index
    %c0_8 = arith.constant 0 : index
    %7 = vector.load %arg5[%c0_7, %c0_8] : memref<128x128xbf16, #tpu.memory_space<vmem>>, vector<128x128xbf16>
    %cst_9 = arith.constant dense<0.000000e+00> : vector<256x128xf32>
    %8 = tpu.matmul %6, %7, %cst_9 {dimension_numbers = #tpu.dot_dimension_numbers<[1], [0], [0], [1], [0, 0, 1, 1], [], []>} : vector<256x128xbf16>, vector<128x128xbf16>, vector<256x128xf32> -> vector<256x128xf32>
    %9 = arith.addf %5, %8 : vector<256x128xf32>
    %c0_10 = arith.constant 0 : index
    %c0_11 = arith.constant 0 : index
    %10 = vector.load %arg6[%c0_10, %c0_11] : memref<1x128xf32, #tpu.memory_space<vmem>>, vector<1x128xf32>
    %11 = vector.broadcast %10 : vector<1x128xf32> to vector<256x128xf32>
    %12 = arith.addf %9, %11 : vector<256x128xf32>
    %c0_12 = arith.constant 0 : index
    %c0_13 = arith.constant 0 : index
    %13 = vector.load %arg8[%c0_12, %c0_13] : memref<256x128xf32, #tpu.memory_space<vmem>>, vector<256x128xf32>
    tpu.vector_store %arg8[%c0_12, %c0_13], %12 {strides = array<i32>} : memref<256x128xf32, #tpu.memory_space<vmem>>, vector<256x128xf32>,
    %cst_14 = arith.constant 0.000000e+00 : f32
    %14 = vector.broadcast %cst_14 : f32 to vector<256x128xf32>
    %15 = arith.maximumf %12, %14 : vector<256x128xf32>
    %16 = arith.truncf %15 : vector<256x128xf32> to vector<256x128xbf16>
    %c0_15 = arith.constant 0 : index
    %c0_16 = arith.constant 0 : index
    %17 = vector.load %arg7[%c0_15, %c0_16] : memref<256x128xbf16, #tpu.memory_space<vmem>>, vector<256x128xbf16>
    tpu.vector_store %arg7[%c0_15, %c0_16], %16 {strides = array<i32>} : memref<256x128xbf16, #tpu.memory_space<vmem>>, vector<256x128xbf16>,
    return
  }
  func.func @transform_0(%arg0: i32) -> (i32, i32) {
    %c0_i32 = arith.constant 0 : i32
    %c0_i32_0 = arith.constant 0 : i32
    return %arg0, %c0_i32 : i32, i32
  }
  func.func @transform_1(%arg0: i32) -> (i32, i32) {
    %c0_i32 = arith.constant 0 : i32
    %c0_i32_0 = arith.constant 0 : i32
    %c0_i32_1 = arith.constant 0 : i32
    return %c0_i32, %c0_i32_0 : i32, i32
  }
  func.func @transform_2(%arg0: i32) -> (i32, i32) {
    %c0_i32 = arith.constant 0 : i32
    %c0_i32_0 = arith.constant 0 : i32
    %c0_i32_1 = arith.constant 0 : i32
    return %c0_i32, %c0_i32_0 : i32, i32
  }
  func.func @transform_3(%arg0: i32) -> (i32, i32) {
    %c0_i32 = arith.constant 0 : i32
    %c0_i32_0 = arith.constant 0 : i32
    return %arg0, %c0_i32 : i32, i32
  }
  func.func @transform_4(%arg0: i32) -> (i32, i32) {
    %c0_i32 = arith.constant 0 : i32
    %c0_i32_0 = arith.constant 0 : i32
    %c0_i32_1 = arith.constant 0 : i32
    return %c0_i32, %c0_i32_0 : i32, i32
  }
  func.func @transform_5(%arg0: i32) -> (i32, i32) {
    %c0_i32 = arith.constant 0 : i32
    %c0_i32_0 = arith.constant 0 : i32
    %c0_i32_1 = arith.constant 0 : i32
    return %c0_i32, %c0_i32_0 : i32, i32
  }
  func.func @transform_6(%arg0: i32) -> (i32, i32) {
    %c0_i32 = arith.constant 0 : i32
    %c0_i32_0 = arith.constant 0 : i32
    return %arg0, %c0_i32 : i32, i32
  }
  func.func @transform_7(%arg0: i32) -> (i32, i32) {
    %c0_i32 = arith.constant 0 : i32
    %c0_i32_0 = arith.constant 0 : i32
    return %arg0, %c0_i32 : i32, i32
  }
}

</mosaic_0001>

<bundles_post_ra>
// kernel: bottleneck_forward.3
= control target key start
LH: loop header
LB: loop body
LE: loop exit
PB: predicated region body
PF: predicated region fallthrough
CT: control target
= control target key end

     0   :  { %s1965_s24 = smov 0   ;;  %s2207_s0 = inlined_call_operand.vmem [shape: bf16[512,128], index: 0, kind: input, shape index: {}]   ;;  %s2208_s1 = inlined_call_operand.vmem [shape: bf16[128,128], index: 1, kind: input, shape index: {}]   ;;  %s2209_s2 = inlined_call_operand.vmem [shape: f32[1,128], index: 2, kind: input, shape index: {}]   ;;  %s2210_s3 = inlined_call_operand.vmem [shape: bf16[512,128], index: 3, kind: input, shape index: {}]   ;;  %s2211_s4 = inlined_call_operand.vmem [shape: bf16[128,128], index: 4, kind: input, shape index: {}]   ;;  %s2212_s5 = inlined_call_operand.vmem [shape: f32[1,128], index: 5, kind: input, shape index: {}]   ;;  %s2213_s6 = inlined_call_operand.vmem [shape: bf16[512,128], index: 6, kind: output, shape index: {0}]   ;;  %s2214_s7 = inlined_call_operand.vmem [shape: f32[512,128], index: 7, kind: output, shape index: {1}]  }
   0x1 LB: > { %s1429_s25 = sadd.s32 4294967295, %s1923_s24   ;;  %p1433_p0 = scmp.ge.s32.totalorder %s1923_s24, 1  ;;  %s1923_s24 = sphi %s1965_s24, %s18_s24  }
   0x2   : > { %p252_p1 = scmp.lt.s32.totalorder %s1923_s24, 3 }
   0x4   : > { %p253_p2 = pnand %p1433_p0, %p252_p1 }
   0x5   : > { %v1869_v0 = vld [vmem:[%s2208_s1] sm:$0xff] (!%p253_p2)   ;;  %s1434_s28 = sshll.u32 (!%p253_p2), %s1429_s25, 5  ;;  %v1871_v2 = vld [vmem:[%s2208_s1 + $0x8] sm:$0xff] (!%p253_p2)   ;;  %v1873_v4 = vld [vmem:[%s2208_s1 + $0x10] sm:$0xff] (!%p253_p2)  }
   0x6   : > { %256 = sbr.rel (%p253_p2) target bundleno = 320 (0x140), region = 44  ;;  %v1870_v1 = vld [vmem:[%s2211_s4] sm:$0xff] (!%p253_p2)   ;;  %1701 = vmatprep.subr.bf16.mxu1 (!%p253_p2), %v1869_v0  ;;  %p295_p3 = scmp.lt.s32.totalorder (!%p253_p2), %s1434_s28, 63  ;;  %v1872_v3 = vld [vmem:[%s2211_s4 + $0x8] sm:$0xff] (!%p253_p2)   ;;  %v1874_v5 = vld [vmem:[%s2211_s4 + $0x10] sm:$0xff] (!%p253_p2)  }
   0x7   : > { %1749 = vmatprep.subr.bf16.mxu0 (!%p253_p2), %v1870_v1  ;;  %1702 = vmatpush3.bf16.msra.mxu1 (!%p253_p2), %v1869_v0  ;;  %v1875_v6 = vld [vmem:[%s2208_s1 + $0x18] sm:$0xff] (!%p253_p2)   ;;  %v1877_v8 = vld [vmem:[%s2208_s1 + $0x20] sm:$0xff] (!%p253_p2)   ;;  %v1879_v10 = vld [vmem:[%s2208_s1 + $0x28] sm:$0xff] (!%p253_p2)  }
   0x8   : > { %1750 = vmatpush3.bf16.msra.mxu0 (!%p253_p2), %v1870_v1  ;;  %1703 = vmatprep.subr.bf16.mxu1 (!%p253_p2), %v1871_v2  ;;  %v1876_v7 = vld [vmem:[%s2211_s4 + $0x18] sm:$0xff] (!%p253_p2)   ;;  %v1878_v9 = vld [vmem:[%s2211_s4 + $0x20] sm:$0xff] (!%p253_p2)   ;;  %v1880_v11 = vld [vmem:[%s2211_s4 + $0x28] sm:$0xff] (!%p253_p2)  }
   0x9   : > { %1751 = vmatprep.subr.bf16.mxu0 (!%p253_p2), %v1872_v3  ;;  %v1881_v14 = vld [vmem:[%s2208_s1 + $0x30] sm:$0xff] (!%p253_p2)   ;;  %v1883_v16 = vld [vmem:[%s2208_s1 + $0x38] sm:$0xff] (!%p253_p2)   ;;  %v2073_v48 = vld [vmem:[%s2209_s2] ss:$0 sm:$0xff] (!%p253_p2) }
   0xa   : > { %v1882_v15 = vld [vmem:[%s2211_s4 + $0x30] sm:$0xff] (!%p253_p2)   ;;  %v1884_v17 = vld [vmem:[%s2211_s4 + $0x38] sm:$0xff] (!%p253_p2)   ;;  %v2080_v53 = vld [vmem:[%s2212_s5] ss:$0 sm:$0xff] (!%p253_p2) }
   0xb   : > { %1704 = vmatpush3.bf16.msra.mxu1 (!%p253_p2), %v1871_v2 }
   0xc   : > { %1752 = vmatpush3.bf16.msra.mxu0 (!%p253_p2), %v1872_v3  ;;  %1705 = vmatprep.subr.bf16.mxu1 (!%p253_p2), %v1873_v4 }
   0xd   : > { %s2216_s28 = smov (!%p295_p3, %s1434_s28), 63  ;;  %1753 = vmatprep.subr.bf16.mxu0 %v1874_v5 }
   0xe   : > { %s2000_s20 = sshll.u32 %s2216_s28, 2  ;;  %s1441_s26 = sshll.u32 %s2216_s28, 3 }
   0xf   : > { %1706 = vmatpush3.bf16.msra.mxu1 %v1873_v4  ;;  %s2012_s29 = scalar_lea.vmem %s2207_s0, %s2000_s20  ;;  %s2021_s11 = scalar_lea.vmem %s2210_s3, %s2000_s20 }
  0x10   : > { %1754 = vmatpush3.bf16.msra.mxu0 %v1874_v5  ;;  %1707 = vmatprep.subr.bf16.mxu1 %v1875_v6  ;;  %v1885_v12 = vld [vmem:[%s2012_s29] sm:$0xff]   ;;  %v1887_v18 = vld [vmem:[%s2012_s29 + $0x8] sm:$0xff]   ;;  %v1889_v20 = vld [vmem:[%s2012_s29 + $0x10] sm:$0xff]   ;;  %s2087_s28 = scalar_lea.vmem %s2214_s7, %s1441_s26 }
  0x11   : > { %1755 = vmatprep.subr.bf16.mxu0 %v1876_v7  ;;  %v1886_v13 = vld [vmem:[%s2021_s11] sm:$0xff]   ;;  %1717 = vmatprep.mubr.bf16.mxu1 %v1885_v12  ;;  %v1888_v19 = vld [vmem:[%s2021_s11 + $0x8] sm:$0xff]   ;;  %v1890_v21 = vld [vmem:[%s2021_s11 + $0x10] sm:$0xff]  }
  0x12   : > { %1765 = vmatprep.mubr.bf16.mxu0 %v1886_v13  ;;  %v1891_v22 = vld [vmem:[%s2012_s29 + $0x18] sm:$0xff]   ;;  %v1893_v24 = vld [vmem:[%s2012_s29 + $0x20] sm:$0xff]   ;;  %v1895_v26 = vld [vmem:[%s2012_s29 + $0x28] sm:$0xff]  }
  0x13   : > { %1708 = vmatpush3.bf16.msra.mxu1 %v1875_v6  ;;  %v1892_v23 = vld [vmem:[%s2021_s11 + $0x18] sm:$0xff]   ;;  %v1894_v25 = vld [vmem:[%s2021_s11 + $0x20] sm:$0xff]   ;;  %v1896_v27 = vld [vmem:[%s2021_s11 + $0x28] sm:$0xff]  }
  0x14   : > { %1756 = vmatpush3.bf16.msra.mxu0 %v1876_v7  ;;  %1709 = vmatprep.subr.bf16.mxu1 %v1877_v8  ;;  %v1897_v28 = vld [vmem:[%s2012_s29 + $0x30] sm:$0xff]   ;;  %v1899_v30 = vld [vmem:[%s2012_s29 + $0x38] sm:$0xff]   ;;  %v1901_v32 = vld [vmem:[%s2012_s29 + $0x40] sm:$0xff]  }
  0x15   : > { %1757 = vmatprep.subr.bf16.mxu0 %v1878_v9  ;;  %v1898_v29 = vld [vmem:[%s2021_s11 + $0x30] sm:$0xff]   ;;  %v1900_v31 = vld [vmem:[%s2021_s11 + $0x38] sm:$0xff]   ;;  %v1902_v33 = vld [vmem:[%s2021_s11 + $0x40] sm:$0xff]  }
  0x16   : > { %v1903_v34 = vld [vmem:[%s2012_s29 + $0x48] sm:$0xff]   ;;  %v1905_v36 = vld [vmem:[%s2012_s29 + $0x50] sm:$0xff]   ;;  %v1907_v38 = vld [vmem:[%s2012_s29 + $0x58] sm:$0xff]  }
  0x17   : > { %1710 = vmatpush3.bf16.msra.mxu1 %v1877_v8  ;;  %v1904_v35 = vld [vmem:[%s2021_s11 + $0x48] sm:$0xff]   ;;  %v1906_v37 = vld [vmem:[%s2021_s11 + $0x50] sm:$0xff]   ;;  %v1908_v39 = vld [vmem:[%s2021_s11 + $0x58] sm:$0xff]  }
  0x18   : > { %1758 = vmatpush3.bf16.msra.mxu0 %v1878_v9  ;;  %1711 = vmatprep.subr.bf16.mxu1 %v1879_v10  ;;  %v1909_v40 = vld [vmem:[%s2012_s29 + $0x60] sm:$0xff]   ;;  %v1911_v42 = vld [vmem:[%s2012_s29 + $0x68] sm:$0xff]   ;;  %v1913_v44 = vld [vmem:[%s2012_s29 + $0x70] sm:$0xff]  }
  0x19   : > { %1759 = vmatprep.subr.bf16.mxu0 %v1880_v11  ;;  %v1910_v41 = vld [vmem:[%s2021_s11 + $0x60] sm:$0xff]   ;;  %v1912_v43 = vld [vmem:[%s2021_s11 + $0x68] sm:$0xff]   ;;  %v1914_v45 = vld [vmem:[%s2021_s11 + $0x70] sm:$0xff]  }
  0x1a   : > { %v1915_v46 = vld [vmem:[%s2012_s29 + $0x78] sm:$0xff]  }
  0x1b   : > { %1712 = vmatpush3.bf16.msra.mxu1 %v1879_v10  ;;  %v1916_v47 = vld [vmem:[%s2021_s11 + $0x78] sm:$0xff]   ;;  %s2102_s11 = scalar_lea.vmem %s2213_s6, %s2000_s20 }
  0x1c   : > { %1760 = vmatpush3.bf16.msra.mxu0 %v1880_v11  ;;  %1713 = vmatprep.subr.bf16.mxu1 %v1881_v14 }
  0x1d   : > { %1761 = vmatprep.subr.bf16.mxu0 %v1882_v15 }
  0x1f   : > { %1714 = vmatpush3.bf16.msra.mxu1 %v1881_v14 }
  0x20   : > { %1762 = vmatpush3.bf16.msra.mxu0 %v1882_v15  ;;  %1715 = vmatprep.subr.bf16.mxu1 %v1883_v16 }
  0x21   : > { %1763 = vmatprep.subr.bf16.mxu0 %v1884_v17 }
  0x23   : > { %1716 = vmatpush3.bf16.msra.mxu1 %v1883_v16 }
  0x24   : > { %1764 = vmatpush3.bf16.msra.mxu0 %v1884_v17 }
  0x26   : > { %1718 = vmatmul.mubr.bf16.vlgmr.msra.gmra.mrb[0].mxu1 %v1887_v18 }
  0x27   : > { %1766 = vmatmul.mubr.bf16.vlgmr.msra.gmra.mrb[0].mxu0 %v1888_v19  ;;  %1721 = vmatprep.mubr.bf16.mxu1 %v1889_v20 }
  0x28   : > { %1769 = vmatprep.mubr.bf16.mxu0 %v1890_v21 }
  0x2e   : > { %1722 = vmatmul.mubr.bf16.gmra.mrb[4].mxu1 %v1891_v22 }
  0x2f   : > { %1770 = vmatmul.mubr.bf16.gmra.mrb[4].mxu0 %v1892_v23  ;;  %1725 = vmatprep.mubr.bf16.mxu1 %v1893_v24 }
  0x30   : > { %1773 = vmatprep.mubr.bf16.mxu0 %v1894_v25 }
  0x36   : > { %1726 = vmatmul.mubr.bf16.gmra.mrb[8].mxu1 %v1895_v26 }
  0x37   : > { %1774 = vmatmul.mubr.bf16.gmra.mrb[8].mxu0 %v1896_v27  ;;  %1729 = vmatprep.mubr.bf16.mxu1 %v1897_v28 }
  0x38   : > { %1777 = vmatprep.mubr.bf16.mxu0 %v1898_v29 }
  0x3e   : > { %1730 = vmatmul.mubr.bf16.gmra.mrb[12].mxu1 %v1899_v30 }
  0x3f   : > { %1778 = vmatmul.mubr.bf16.gmra.mrb[12].mxu0 %v1900_v31  ;;  %1733 = vmatprep.mubr.bf16.mxu1 %v1901_v32 }
  0x40   : > { %1781 = vmatprep.mubr.bf16.mxu0 %v1902_v33 }
  0x46   : > { %1734 = vmatmul.mubr.bf16.gmra.mrb[16].mxu1 %v1903_v34 }
  0x47   : > { %1782 = vmatmul.mubr.bf16.gmra.mrb[16].mxu0 %v1904_v35  ;;  %1737 = vmatprep.mubr.bf16.mxu1 %v1905_v36 }
  0x48   : > { %1785 = vmatprep.mubr.bf16.mxu0 %v1906_v37 }
  0x4e   : > { %1738 = vmatmul.mubr.bf16.gmra.mrb[20].mxu1 %v1907_v38 }
  0x4f   : > { %1786 = vmatmul.mubr.bf16.gmra.mrb[20].mxu0 %v1908_v39  ;;  %1741 = vmatprep.mubr.bf16.mxu1 %v1909_v40 }
  0x50   : > { %1789 = vmatprep.mubr.bf16.mxu0 %v1910_v41 }
  0x56   : > { %1742 = vmatmul.mubr.bf16.gmra.mrb[24].mxu1 %v1911_v42 }
  0x57   : > { %1790 = vmatmul.mubr.bf16.gmra.mrb[24].mxu0 %v1912_v43  ;;  %1745 = vmatprep.mubr.bf16.mxu1 %v1913_v44 }
  0x58   : > { %1793 = vmatprep.mubr.bf16.mxu0 %v1914_v45 }
  0x5e   : > { %1746 = vmatmul.mubr.bf16.gmra.mrb[28].mxu1 %v1915_v46 }
  0x5f   : > { %1794 = vmatmul.mubr.bf16.gmra.mrb[28].mxu0 %v1916_v47 }
  0xf9   : > { %v1719_v49 = vpop.f32.mrb[0].mxu1 }
  0xfa   : > { %v561_v50 = vadd.f32 %v1719_v49, %v2073_v48  ;;  %v1767_v51 = vpop.f32.mrb[0].mxu0  ;;  %v552_v52 = vpop.f32.mrb[1].mxu1 }
  0xfb   : > { %v553_v54 = vadd.f32 %v2073_v48, %v552_v52  ;;  %v905_v55 = vpop.f32.mrb[1].mxu0  ;;  %v1720_v56 = vpop.f32.mrb[2].mxu1 }
  0xfc   : > { %v1034_v57 = vadd.f32 %v1767_v51, %v561_v50  ;;  %v564_v58 = vadd.f32 %v1720_v56, %v2073_v48  ;;  %v1768_v59 = vpop.f32.mrb[2].mxu0  ;;  %v555_v60 = vpop.f32.mrb[3].mxu1 }
  0xfd   : > { %v1032_v61 = vadd.f32 %v905_v55, %v553_v54  ;;  %v556_v62 = vadd.f32 %v2073_v48, %v555_v60  ;;  %v908_v63 = vpop.f32.mrb[3].mxu0 }
  0xfe   : > { %v1073_v0 = vadd.f32 %v2080_v53, %v1034_v57  ;;  %v1035_v1 = vadd.f32 %v1768_v59, %v564_v58 }
  0xff   : > { %v1071_v2 = vadd.f32 %v2080_v53, %v1032_v61  ;;  %v1033_v3 = vadd.f32 %v908_v63, %v556_v62 }
 0x100   : > { %1105 = vst [vmem:[%s2087_s28 + $0x10] sm:$0xff] %v1073_v0  ;;  %v1074_v4 = vadd.f32 %v2080_v53, %v1035_v1  ;;  %v1137_v7 = vmax.f32 %v1073_v0, 0.0 }
 0x101   : > { %1103 = vst [vmem:[%s2087_s28] sm:$0xff] %v1071_v2  ;;  %v1072_v5 = vadd.f32 %v2080_v53, %v1033_v3  ;;  %v1723_v6 = vpop.f32.mrb[4].mxu1  ;;  %v1135_v12 = vmax.f32 %v1071_v2, 0.0 }
 0x102   : > { %1106 = vst [vmem:[%s2087_s28 + $0x18] sm:$0xff] %v1074_v4  ;;  %v1138_v8 = vmax.f32 %v1074_v4, 0.0  ;;  %v577_v9 = vadd.f32 %v1723_v6, %v2073_v48  ;;  %v1771_v10 = vpop.f32.mrb[4].mxu0  ;;  %v568_v11 = vpop.f32.mrb[5].mxu1 }
 0x103   : > { %1104 = vst [vmem:[%s2087_s28 + $0x8] sm:$0xff] %v1072_v5  ;;  %v1136_v13 = vmax.f32 %v1072_v5, 0.0  ;;  %v569_v14 = vadd.f32 %v2073_v48, %v568_v11  ;;  %v921_v15 = vpop.f32.mrb[5].mxu0  ;;  %v1724_v16 = vpop.f32.mrb[6].mxu1 }
 0x104   : > { %v1566_v17 = vpack.c.bf16 %v1138_v8, %v1137_v7  ;;  %v1038_v18 = vadd.f32 %v1771_v10, %v577_v9  ;;  %v580_v19 = vadd.f32 %v1724_v16, %v2073_v48  ;;  %v1772_v20 = vpop.f32.mrb[6].mxu0  ;;  %v571_v21 = vpop.f32.mrb[7].mxu1 }
 0x105   : > { %v1561_v22 = vpack.c.bf16 %v1136_v13, %v1135_v12  ;;  %v1036_v23 = vadd.f32 %v921_v15, %v569_v14  ;;  %v572_v24 = vadd.f32 %v2073_v48, %v571_v21  ;;  %v924_v25 = vpop.f32.mrb[7].mxu0 }
 0x106   : > { %1638 = vst [vmem:[%s2102_s11 + $0x8] sm:$0xff] %v1566_v17   ;;  %v1077_v26 = vadd.f32 %v2080_v53, %v1038_v18  ;;  %v1039_v27 = vadd.f32 %v1772_v20, %v580_v19 }
 0x107   : > { %1562 = vst [vmem:[%s2102_s11] sm:$0xff] %v1561_v22   ;;  %v1075_v28 = vadd.f32 %v2080_v53, %v1036_v23  ;;  %v1037_v29 = vadd.f32 %v924_v25, %v572_v24 }
 0x108   : > { %1109 = vst [vmem:[%s2087_s28 + $0x30] sm:$0xff] %v1077_v26  ;;  %v1078_v30 = vadd.f32 %v2080_v53, %v1039_v27  ;;  %v1141_v33 = vmax.f32 %v1077_v26, 0.0 }
 0x109   : > { %1107 = vst [vmem:[%s2087_s28 + $0x20] sm:$0xff] %v1075_v28  ;;  %v1076_v31 = vadd.f32 %v2080_v53, %v1037_v29  ;;  %v1727_v32 = vpop.f32.mrb[8].mxu1  ;;  %v1139_v38 = vmax.f32 %v1075_v28, 0.0 }
 0x10a   : > { %1110 = vst [vmem:[%s2087_s28 + $0x38] sm:$0xff] %v1078_v30  ;;  %v1142_v34 = vmax.f32 %v1078_v30, 0.0  ;;  %v593_v35 = vadd.f32 %v1727_v32, %v2073_v48  ;;  %v1775_v36 = vpop.f32.mrb[8].mxu0  ;;  %v584_v37 = vpop.f32.mrb[9].mxu1 }
 0x10b   : > { %1108 = vst [vmem:[%s2087_s28 + $0x28] sm:$0xff] %v1076_v31  ;;  %v1140_v39 = vmax.f32 %v1076_v31, 0.0  ;;  %v585_v40 = vadd.f32 %v2073_v48, %v584_v37  ;;  %v937_v41 = vpop.f32.mrb[9].mxu0  ;;  %v1728_v42 = vpop.f32.mrb[10].mxu1 }
 0x10c   : > { %v1576_v43 = vpack.c.bf16 %v1142_v34, %v1141_v33  ;;  %v1042_v44 = vadd.f32 %v1775_v36, %v593_v35  ;;  %v596_v45 = vadd.f32 %v1728_v42, %v2073_v48  ;;  %v1776_v46 = vpop.f32.mrb[10].mxu0  ;;  %v587_v47 = vpop.f32.mrb[11].mxu1 }
 0x10d   : > { %v1571_v49 = vpack.c.bf16 %v1140_v39, %v1139_v38  ;;  %v1040_v50 = vadd.f32 %v937_v41, %v585_v40  ;;  %v588_v51 = vadd.f32 %v2073_v48, %v587_v47  ;;  %v940_v52 = vpop.f32.mrb[11].mxu0 }
 0x10e   : > { %1640 = vst [vmem:[%s2102_s11 + $0x18] sm:$0xff] %v1576_v43   ;;  %v1081_v54 = vadd.f32 %v2080_v53, %v1042_v44  ;;  %v1043_v55 = vadd.f32 %v1776_v46, %v596_v45 }
 0x10f   : > { %1639 = vst [vmem:[%s2102_s11 + $0x10] sm:$0xff] %v1571_v49   ;;  %v1079_v56 = vadd.f32 %v2080_v53, %v1040_v50  ;;  %v1041_v57 = vadd.f32 %v940_v52, %v588_v51 }
 0x110   : > { %1113 = vst [vmem:[%s2087_s28 + $0x50] sm:$0xff] %v1081_v54  ;;  %v1082_v58 = vadd.f32 %v2080_v53, %v1043_v55  ;;  %v1145_v61 = vmax.f32 %v1081_v54, 0.0 }
 0x111   : > { %1111 = vst [vmem:[%s2087_s28 + $0x40] sm:$0xff] %v1079_v56  ;;  %v1080_v59 = vadd.f32 %v2080_v53, %v1041_v57  ;;  %v1731_v60 = vpop.f32.mrb[12].mxu1  ;;  %v1143_v2 = vmax.f32 %v1079_v56, 0.0 }
 0x112   : > { %1114 = vst [vmem:[%s2087_s28 + $0x58] sm:$0xff] %v1082_v58  ;;  %v1146_v62 = vmax.f32 %v1082_v58, 0.0  ;;  %v609_v63 = vadd.f32 %v1731_v60, %v2073_v48  ;;  %v1779_v0 = vpop.f32.mrb[12].mxu0  ;;  %v600_v1 = vpop.f32.mrb[13].mxu1 }
 0x113   : > { %1112 = vst [vmem:[%s2087_s28 + $0x48] sm:$0xff] %v1080_v59  ;;  %v1144_v3 = vmax.f32 %v1080_v59, 0.0  ;;  %v601_v4 = vadd.f32 %v2073_v48, %v600_v1  ;;  %v953_v5 = vpop.f32.mrb[13].mxu0  ;;  %v1732_v6 = vpop.f32.mrb[14].mxu1 }
 0x114   : > { %v1586_v7 = vpack.c.bf16 %v1146_v62, %v1145_v61  ;;  %v1046_v8 = vadd.f32 %v1779_v0, %v609_v63  ;;  %v612_v9 = vadd.f32 %v1732_v6, %v2073_v48  ;;  %v1780_v10 = vpop.f32.mrb[14].mxu0  ;;  %v603_v11 = vpop.f32.mrb[15].mxu1 }
 0x115   : > { %v1581_v12 = vpack.c.bf16 %v1144_v3, %v1143_v2  ;;  %v1044_v13 = vadd.f32 %v953_v5, %v601_v4  ;;  %v604_v14 = vadd.f32 %v2073_v48, %v603_v11  ;;  %v956_v15 = vpop.f32.mrb[15].mxu0 }
 0x116   : > { %1642 = vst [vmem:[%s2102_s11 + $0x28] sm:$0xff] %v1586_v7   ;;  %v1085_v16 = vadd.f32 %v2080_v53, %v1046_v8  ;;  %v1047_v17 = vadd.f32 %v1780_v10, %v612_v9 }
 0x117   : > { %1641 = vst [vmem:[%s2102_s11 + $0x20] sm:$0xff] %v1581_v12   ;;  %v1083_v18 = vadd.f32 %v2080_v53, %v1044_v13  ;;  %v1045_v19 = vadd.f32 %v956_v15, %v604_v14 }
 0x118   : > { %1117 = vst [vmem:[%s2087_s28 + $0x70] sm:$0xff] %v1085_v16  ;;  %v1086_v20 = vadd.f32 %v2080_v53, %v1047_v17  ;;  %v1149_v23 = vmax.f32 %v1085_v16, 0.0 }
 0x119   : > { %1115 = vst [vmem:[%s2087_s28 + $0x60] sm:$0xff] %v1083_v18  ;;  %v1084_v21 = vadd.f32 %v2080_v53, %v1045_v19  ;;  %v1735_v22 = vpop.f32.mrb[16].mxu1  ;;  %v1147_v28 = vmax.f32 %v1083_v18, 0.0 }
 0x11a   : > { %1118 = vst [vmem:[%s2087_s28 + $0x78] sm:$0xff] %v1086_v20  ;;  %v1150_v24 = vmax.f32 %v1086_v20, 0.0  ;;  %v625_v25 = vadd.f32 %v1735_v22, %v2073_v48  ;;  %v1783_v26 = vpop.f32.mrb[16].mxu0  ;;  %v616_v27 = vpop.f32.mrb[17].mxu1 }
 0x11b   : > { %1116 = vst [vmem:[%s2087_s28 + $0x68] sm:$0xff] %v1084_v21  ;;  %v1148_v29 = vmax.f32 %v1084_v21, 0.0  ;;  %v617_v30 = vadd.f32 %v2073_v48, %v616_v27  ;;  %v969_v31 = vpop.f32.mrb[17].mxu0  ;;  %v1736_v32 = vpop.f32.mrb[18].mxu1 }
 0x11c   : > { %v1596_v33 = vpack.c.bf16 %v1150_v24, %v1149_v23  ;;  %v1050_v34 = vadd.f32 %v1783_v26, %v625_v25  ;;  %v628_v35 = vadd.f32 %v1736_v32, %v2073_v48  ;;  %v1784_v36 = vpop.f32.mrb[18].mxu0  ;;  %v619_v37 = vpop.f32.mrb[19].mxu1 }
 0x11d   : > { %v1591_v38 = vpack.c.bf16 %v1148_v29, %v1147_v28  ;;  %v1048_v39 = vadd.f32 %v969_v31, %v617_v30  ;;  %v620_v40 = vadd.f32 %v2073_v48, %v619_v37  ;;  %v972_v41 = vpop.f32.mrb[19].mxu0 }
 0x11e   : > { %1644 = vst [vmem:[%s2102_s11 + $0x38] sm:$0xff] %v1596_v33   ;;  %v1089_v42 = vadd.f32 %v2080_v53, %v1050_v34  ;;  %v1051_v43 = vadd.f32 %v1784_v36, %v628_v35 }
 0x11f   : > { %1643 = vst [vmem:[%s2102_s11 + $0x30] sm:$0xff] %v1591_v38   ;;  %v1087_v44 = vadd.f32 %v2080_v53, %v1048_v39  ;;  %v1049_v45 = vadd.f32 %v972_v41, %v620_v40 }
 0x120   : > { %1121 = vst [vmem:[%s2087_s28 + $0x90] sm:$0xff] %v1089_v42  ;;  %v1090_v46 = vadd.f32 %v2080_v53, %v1051_v43  ;;  %v1153_v50 = vmax.f32 %v1089_v42, 0.0 }
 0x121   : > { %1119 = vst [vmem:[%s2087_s28 + $0x80] sm:$0xff] %v1087_v44  ;;  %v1088_v47 = vadd.f32 %v2080_v53, %v1049_v45  ;;  %v1739_v49 = vpop.f32.mrb[20].mxu1  ;;  %v1151_v56 = vmax.f32 %v1087_v44, 0.0 }
 0x122   : > { %1122 = vst [vmem:[%s2087_s28 + $0x98] sm:$0xff] %v1090_v46  ;;  %v1154_v51 = vmax.f32 %v1090_v46, 0.0  ;;  %v641_v52 = vadd.f32 %v1739_v49, %v2073_v48  ;;  %v1787_v54 = vpop.f32.mrb[20].mxu0  ;;  %v632_v55 = vpop.f32.mrb[21].mxu1 }
 0x123   : > { %1120 = vst [vmem:[%s2087_s28 + $0x88] sm:$0xff] %v1088_v47  ;;  %v1152_v57 = vmax.f32 %v1088_v47, 0.0  ;;  %v633_v58 = vadd.f32 %v2073_v48, %v632_v55  ;;  %v985_v59 = vpop.f32.mrb[21].mxu0  ;;  %v1740_v60 = vpop.f32.mrb[22].mxu1 }
 0x124   : > { %v1606_v61 = vpack.c.bf16 %v1154_v51, %v1153_v50  ;;  %v1054_v62 = vadd.f32 %v1787_v54, %v641_v52  ;;  %v644_v63 = vadd.f32 %v1740_v60, %v2073_v48  ;;  %v1788_v0 = vpop.f32.mrb[22].mxu0  ;;  %v635_v1 = vpop.f32.mrb[23].mxu1 }
 0x125   : > { %v1601_v2 = vpack.c.bf16 %v1152_v57, %v1151_v56  ;;  %v1052_v3 = vadd.f32 %v985_v59, %v633_v58  ;;  %v636_v4 = vadd.f32 %v2073_v48, %v635_v1  ;;  %v988_v5 = vpop.f32.mrb[23].mxu0 }
 0x126   : > { %1646 = vst [vmem:[%s2102_s11 + $0x48] sm:$0xff] %v1606_v61   ;;  %v1093_v6 = vadd.f32 %v2080_v53, %v1054_v62  ;;  %v1055_v7 = vadd.f32 %v1788_v0, %v644_v63 }
 0x127   : > { %1645 = vst [vmem:[%s2102_s11 + $0x40] sm:$0xff] %v1601_v2   ;;  %v1091_v8 = vadd.f32 %v2080_v53, %v1052_v3  ;;  %v1053_v9 = vadd.f32 %v988_v5, %v636_v4 }
 0x128   : > { %1125 = vst [vmem:[%s2087_s28 + $0xb0] sm:$0xff] %v1093_v6  ;;  %v1094_v10 = vadd.f32 %v2080_v53, %v1055_v7  ;;  %v1157_v13 = vmax.f32 %v1093_v6, 0.0 }
 0x129   : > { %1123 = vst [vmem:[%s2087_s28 + $0xa0] sm:$0xff] %v1091_v8  ;;  %v1092_v11 = vadd.f32 %v2080_v53, %v1053_v9  ;;  %v1743_v12 = vpop.f32.mrb[24].mxu1  ;;  %v1155_v18 = vmax.f32 %v1091_v8, 0.0 }
 0x12a   : > { %1126 = vst [vmem:[%s2087_s28 + $0xb8] sm:$0xff] %v1094_v10  ;;  %v1158_v14 = vmax.f32 %v1094_v10, 0.0  ;;  %v657_v15 = vadd.f32 %v1743_v12, %v2073_v48  ;;  %v1791_v16 = vpop.f32.mrb[24].mxu0  ;;  %v648_v17 = vpop.f32.mrb[25].mxu1 }
 0x12b   : > { %1124 = vst [vmem:[%s2087_s28 + $0xa8] sm:$0xff] %v1092_v11  ;;  %v1156_v19 = vmax.f32 %v1092_v11, 0.0  ;;  %v649_v20 = vadd.f32 %v2073_v48, %v648_v17  ;;  %v1001_v21 = vpop.f32.mrb[25].mxu0  ;;  %v1744_v22 = vpop.f32.mrb[26].mxu1 }
 0x12c   : > { %v1616_v23 = vpack.c.bf16 %v1158_v14, %v1157_v13  ;;  %v1058_v24 = vadd.f32 %v1791_v16, %v657_v15  ;;  %v660_v25 = vadd.f32 %v1744_v22, %v2073_v48  ;;  %v1792_v26 = vpop.f32.mrb[26].mxu0  ;;  %v651_v27 = vpop.f32.mrb[27].mxu1 }
 0x12d   : > { %v1611_v28 = vpack.c.bf16 %v1156_v19, %v1155_v18  ;;  %v1056_v29 = vadd.f32 %v1001_v21, %v649_v20  ;;  %v652_v30 = vadd.f32 %v2073_v48, %v651_v27  ;;  %v1004_v31 = vpop.f32.mrb[27].mxu0 }
 0x12e   : > { %1648 = vst [vmem:[%s2102_s11 + $0x58] sm:$0xff] %v1616_v23   ;;  %v1097_v32 = vadd.f32 %v2080_v53, %v1058_v24  ;;  %v1059_v33 = vadd.f32 %v1792_v26, %v660_v25 }
 0x12f   : > { %1647 = vst [vmem:[%s2102_s11 + $0x50] sm:$0xff] %v1611_v28   ;;  %v1095_v34 = vadd.f32 %v2080_v53, %v1056_v29  ;;  %v1057_v35 = vadd.f32 %v1004_v31, %v652_v30 }
 0x130   : > { %1129 = vst [vmem:[%s2087_s28 + $0xd0] sm:$0xff] %v1097_v32  ;;  %v1098_v36 = vadd.f32 %v2080_v53, %v1059_v33  ;;  %v1161_v39 = vmax.f32 %v1097_v32, 0.0 }
 0x131   : > { %1127 = vst [vmem:[%s2087_s28 + $0xc0] sm:$0xff] %v1095_v34  ;;  %v1096_v37 = vadd.f32 %v2080_v53, %v1057_v35  ;;  %v1747_v38 = vpop.f32.mrb[28].mxu1  ;;  %v1159_v44 = vmax.f32 %v1095_v34, 0.0 }
 0x132   : > { %1130 = vst [vmem:[%s2087_s28 + $0xd8] sm:$0xff] %v1098_v36  ;;  %v1162_v40 = vmax.f32 %v1098_v36, 0.0  ;;  %v673_v41 = vadd.f32 %v1747_v38, %v2073_v48  ;;  %v1795_v42 = vpop.f32.mrb[28].mxu0  ;;  %v664_v43 = vpop.f32.mrb[29].mxu1 }
 0x133   : > { %1128 = vst [vmem:[%s2087_s28 + $0xc8] sm:$0xff] %v1096_v37  ;;  %v1160_v45 = vmax.f32 %v1096_v37, 0.0  ;;  %v665_v46 = vadd.f32 %v2073_v48, %v664_v43  ;;  %v1017_v47 = vpop.f32.mrb[29].mxu0  ;;  %v1748_v49 = vpop.f32.mrb[30].mxu1 }
 0x134   : > { %v1626_v50 = vpack.c.bf16 %v1162_v40, %v1161_v39  ;;  %v1062_v51 = vadd.f32 %v1795_v42, %v673_v41  ;;  %v676_v52 = vadd.f32 %v1748_v49, %v2073_v48  ;;  %v1796_v54 = vpop.f32.mrb[30].mxu0  ;;  %v667_v55 = vpop.f32.mrb[31].mxu1 }
 0x135   : > { %v1621_v56 = vpack.c.bf16 %v1160_v45, %v1159_v44  ;;  %v1060_v57 = vadd.f32 %v1017_v47, %v665_v46  ;;  %v668_v58 = vadd.f32 %v2073_v48, %v667_v55  ;;  %v1020_v59 = vpop.f32.mrb[31].mxu0 }
 0x136   : > { %1650 = vst [vmem:[%s2102_s11 + $0x68] sm:$0xff] %v1626_v50   ;;  %v1101_v60 = vadd.f32 %v2080_v53, %v1062_v51  ;;  %v1063_v61 = vadd.f32 %v1796_v54, %v676_v52 }
 0x137   : > { %1649 = vst [vmem:[%s2102_s11 + $0x60] sm:$0xff] %v1621_v56   ;;  %v1099_v62 = vadd.f32 %v2080_v53, %v1060_v57  ;;  %v1061_v63 = vadd.f32 %v1020_v59, %v668_v58 }
 0x138   : > { %1133 = vst [vmem:[%s2087_s28 + $0xf0] sm:$0xff] %v1101_v60  ;;  %v1102_v0 = vadd.f32 %v2080_v53, %v1063_v61  ;;  %v1165_v2 = vmax.f32 %v1101_v60, 0.0 }
 0x139   : > { %1131 = vst [vmem:[%s2087_s28 + $0xe0] sm:$0xff] %v1099_v62  ;;  %v1100_v1 = vadd.f32 %v2080_v53, %v1061_v63  ;;  %v1163_v3 = vmax.f32 %v1099_v62, 0.0 }
 0x13a   : > { %1134 = vst [vmem:[%s2087_s28 + $0xf8] sm:$0xff] %v1102_v0  ;;  %v1166_v48 = vmax.f32 %v1102_v0, 0.0 }
 0x13b   : > { %1132 = vst [vmem:[%s2087_s28 + $0xe8] sm:$0xff] %v1100_v1  ;;  %v1164_v4 = vmax.f32 %v1100_v1, 0.0 }
 0x13c   : > { %v1636_v5 = vpack.c.bf16 %v1166_v48, %v1165_v2 }
 0x13d   : > { %v1631_v6 = vpack.c.bf16 %v1164_v4, %v1163_v3 }
 0x13e   : > { %1652 = vst [vmem:[%s2102_s11 + $0x78] sm:$0xff] %v1636_v5  }
 0x13f   : > { %1651 = vst [vmem:[%s2102_s11 + $0x70] sm:$0xff] %v1631_v6  }
 0x140 PF: > { %s18_s24 = sadd.s32 1, %s1923_s24  }
 0x141   : > { %p15_p4 = scmp.ge.s32.totalorder %s18_s24, 4  }
 0x143   :  { %17 = sbr.rel (!%p15_p4) target bundleno = 1 (0x1), region = 89 }

// kernel: bottleneck_forward.2
= control target key start
LH: loop header
LB: loop body
LE: loop exit
PB: predicated region body
PF: predicated region fallthrough
CT: control target
= control target key end

     0   :  { %s7978_s18 = smov 0   ;;  %s9906_s0 = inlined_call_operand.vmem [shape: bf16[2,16,16,128], index: 0, kind: input, shape index: {}]   ;;  %s9907_s1 = inlined_call_operand.vmem [shape: bf16[128,128], index: 1, kind: input, shape index: {}]   ;;  %s9908_s2 = inlined_call_operand.vmem [shape: f32[1,128], index: 2, kind: input, shape index: {}]   ;;  %s9909_s3 = inlined_call_operand.vmem [shape: bf16[9,128,128], index: 3, kind: input, shape index: {}]   ;;  %s9910_s4 = inlined_call_operand.vmem [shape: f32[1,128], index: 4, kind: input, shape index: {}]   ;;  %s9911_s5 = inlined_call_operand.vmem [shape: bf16[2,16,16,128], index: 5, kind: output, shape index: {}]  }
   0x1 LB: > { %s6306_s19 = sadd.s32 4294967295, %s7945_s18   ;;  %p6310_p0 = scmp.ge.s32.totalorder %s7945_s18, 1  ;;  %s7945_s18 = sphi %s7978_s18, %s15_s18  }
   0x2   : > { %p187_p1 = scmp.lt.s32.totalorder %s7945_s18, 3 }
   0x4   : > { %p188_p2 = pnand %p6310_p0, %p187_p1 }
   0x6   : > { %191 = sbr.rel (%p188_p2) target bundleno = 983 (0x3d7), region = 40 }
   0xd   : > { %v7783_v0 = vld [vmem:[%s9907_s1] sm:$0xff]   ;;  %p215_p3 = scmp.lt.s32.totalorder %s6306_s19, 1  ;;  %v7992_v1 = vld [vmem:[%s9907_s1 + $0x8] sm:$0xff]   ;;  %v7947_v2 = vmov 0   ;;  %v7785_v3 = vld [vmem:[%s9907_s1 + $0x10] sm:$0xff]   ;;  %vm1095_vm0 = vcmask 1043456  }
   0xe   : > { %7134 = vmatprep.subr.bf16.mxu0 %v7783_v0  ;;  %232 = vst [vmem:[#allocation2 + $0x18] sm:$0xf] %v7947_v2  ;;  %226 = vst [vmem:[#allocation2] sm:$0xf] %v7947_v2  ;;  %v7786_v4 = vld [vmem:[%s9907_s1 + $0x18] sm:$0xff]   ;;  %v7787_v6 = vld [vmem:[%s9907_s1 + $0x20] sm:$0xff]  }
   0xf   : > { %s10178_s19 = smov (!%p215_p3, %s6306_s19), 1  ;;  %227 = vst [vmem:[#allocation2 + $0x4] sm:$0xf] %v7947_v2  ;;  %228 = vst [vmem:[#allocation2 + $0x8] sm:$0xf] %v7947_v2  ;;  %7135 = vmatpush3.bf16.msra.mxu0 %v7783_v0  ;;  %v7788_v7 = vld [vmem:[%s9907_s1 + $0x28] sm:$0xff]  }
  0x10   : > { %229 = vst [vmem:[#allocation2 + $0xc] sm:$0xf] %v7947_v2  ;;  %230 = vst [vmem:[#allocation2 + $0x10] sm:$0xf] %v7947_v2  ;;  %7136 = vmatprep.subr.bf16.mxu0 %v7992_v1  ;;  %s6661_s26 = sshll.u32 %s10178_s19, 7  ;;  %v7789_v8 = vld [vmem:[%s9907_s1 + $0x30] sm:$0xff]  }
  0x11   : > { %231 = vst [vmem:[#allocation2 + $0x14] sm:$0xf] %v7947_v2  ;;  %233 = vst [vmem:[#allocation2 + $0x1c] sm:$0xf] %v7947_v2  ;;  %s8006_s29 = scalar_lea.vmem %s9906_s0, %s6661_s26  ;;  %v7790_v9 = vld [vmem:[%s9907_s1 + $0x38] sm:$0xff]   ;;  %v7807_v10 = vld [vmem:[%s9909_s3] sm:$0xff]   ;;  %s9825_s13 = scalar_lea.vmem %s9911_s5, %s6661_s26 }
  0x12   : > { %234 = vst [vmem:[#allocation2 + $0x20] sm:$0xf] %v7947_v2  ;;  %235 = vst [vmem:[#allocation2 + $0x24] sm:$0xf] %v7947_v2  ;;  %v7791_v5 = vld [vmem:[%s8006_s29] sm:$0xff]   ;;  %v7808_v11 = vld [vmem:[%s9909_s3 + $0x8] sm:$0xff]   ;;  %7182 = vmatprep.subr.bf16.mxu1 %v7807_v10 }
  0x13   : > { %236 = vst [vmem:[#allocation2 + $0x28] sm:$0xf] %v7947_v2  ;;  %237 = vst [vmem:[#allocation2 + $0x2c] sm:$0xf] %v7947_v2  ;;  %7137 = vmatpush3.bf16.msra.mxu0 %v7992_v1  ;;  %7150 = vmatprep.mubr.bf16.mxu0 %v7791_v5  ;;  %v7792_v12 = vld [vmem:[%s8006_s29 + $0x8] sm:$0xff]   ;;  %v7793_v13 = vld [vmem:[%s8006_s29 + $0x10] sm:$0xff]  }
  0x14   : > { %238 = vst [vmem:[#allocation2 + $0x30] sm:$0xf] %v7947_v2  ;;  %239 = vst [vmem:[#allocation2 + $0x34] sm:$0xf] %v7947_v2  ;;  %7138 = vmatprep.subr.bf16.mxu0 %v7785_v3  ;;  %7183 = vmatpush3.bf16.msra.mxu1 %v7807_v10  ;;  %v7794_v14 = vld [vmem:[%s8006_s29 + $0x18] sm:$0xff]   ;;  %v7795_v15 = vld [vmem:[%s8006_s29 + $0x20] sm:$0xff]  }
  0x15   : > { %240 = vst [vmem:[#allocation2 + $0x38] sm:$0xf] %v7947_v2  ;;  %241 = vst [vmem:[#allocation2 + $0x3c] sm:$0xf] %v7947_v2  ;;  %7184 = vmatprep.subr.bf16.mxu1 %v7808_v11  ;;  %v7796_v16 = vld [vmem:[%s8006_s29 + $0x28] sm:$0xff]   ;;  %v7797_v17 = vld [vmem:[%s8006_s29 + $0x30] sm:$0xff]  }
  0x16   : > { %242 = vst [vmem:[#allocation2 + $0x40] sm:$0xf] %v7947_v2  ;;  %243 = vst [vmem:[#allocation2 + $0x44] sm:$0xf] %v7947_v2  ;;  %v7798_v18 = vld [vmem:[%s8006_s29 + $0x38] sm:$0xff]   ;;  %v7799_v19 = vld [vmem:[%s8006_s29 + $0x40] sm:$0xff]  }
  0x17   : > { %244 = vst [vmem:[#allocation2 + $0x48] sm:$0xf] %v7947_v2  ;;  %245 = vst [vmem:[#allocation2 + $0x4c] sm:$0xf] %v7947_v2  ;;  %7139 = vmatpush3.bf16.msra.mxu0 %v7785_v3  ;;  %v7800_v20 = vld [vmem:[%s8006_s29 + $0x48] sm:$0xff]   ;;  %v7801_v21 = vld [vmem:[%s8006_s29 + $0x50] sm:$0xff]  }
  0x18   : > { %246 = vst [vmem:[#allocation2 + $0x50] sm:$0xf] %v7947_v2  ;;  %247 = vst [vmem:[#allocation2 + $0x54] sm:$0xf] %v7947_v2  ;;  %7140 = vmatprep.subr.bf16.mxu0 %v7786_v4  ;;  %7185 = vmatpush3.bf16.msra.mxu1 %v7808_v11  ;;  %v7802_v22 = vld [vmem:[%s8006_s29 + $0x58] sm:$0xff]   ;;  %v7803_v23 = vld [vmem:[%s8006_s29 + $0x60] sm:$0xff]  }
  0x19   : > { %248 = vst [vmem:[#allocation2 + $0x58] sm:$0xf] %v7947_v2  ;;  %249 = vst [vmem:[#allocation2 + $0x5c] sm:$0xf] %v7947_v2  ;;  %v7804_v24 = vld [vmem:[%s8006_s29 + $0x68] sm:$0xff]   ;;  %v7805_v25 = vld [vmem:[%s8006_s29 + $0x70] sm:$0xff]  }
  0x1a   : > { %250 = vst [vmem:[#allocation2 + $0x60] sm:$0xf] %v7947_v2  ;;  %251 = vst [vmem:[#allocation2 + $0x64] sm:$0xf] %v7947_v2  ;;  %v7806_v26 = vld [vmem:[%s8006_s29 + $0x78] sm:$0xff]   ;;  %v7810_v27 = vld [vmem:[%s9909_s3 + $0x40] sm:$0xff]  }
  0x1b   : > { %252 = vst [vmem:[#allocation2 + $0x68] sm:$0xf] %v7947_v2  ;;  %253 = vst [vmem:[#allocation2 + $0x6c] sm:$0xf] %v7947_v2  ;;  %7141 = vmatpush3.bf16.msra.mxu0 %v7786_v4  ;;  %v7809_v28 = vld [vmem:[%s9909_s3 + $0x10] sm:$0xff]   ;;  %v7812_v29 = vld [vmem:[%s9909_s3 + $0x48] sm:$0xff]  }
  0x1c   : > { %254 = vst [vmem:[#allocation2 + $0x70] sm:$0xf] %v7947_v2  ;;  %255 = vst [vmem:[#allocation2 + $0x74] sm:$0xf] %v7947_v2  ;;  %7142 = vmatprep.subr.bf16.mxu0 %v7787_v6  ;;  %7186 = vmatprep.subr.bf16.mxu1 %v7809_v28  ;;  %v7811_v30 = vld [vmem:[%s9909_s3 + $0x18] sm:$0xff]   ;;  %v7814_v31 = vld [vmem:[%s9909_s3 + $0x50] sm:$0xff]  }
  0x1d   : > { %256 = vst [vmem:[#allocation2 + $0x78] sm:$0xf] %v7947_v2  ;;  %257 = vst [vmem:[#allocation2 + $0x7c] sm:$0xf] %v7947_v2  ;;  %7187 = vmatpush3.bf16.msra.mxu1 %v7809_v28  ;;  %v7813_v32 = vld [vmem:[%s9909_s3 + $0x20] sm:$0xff]   ;;  %v7816_v33 = vld [vmem:[%s9909_s3 + $0x58] sm:$0xff]  }
  0x1e   : > { %258 = vst [vmem:[#allocation2 + $0x80] sm:$0xf] %v7947_v2  ;;  %259 = vst [vmem:[#allocation2 + $0x84] sm:$0xf] %v7947_v2  ;;  %7188 = vmatprep.subr.bf16.mxu1 %v7811_v30  ;;  %v7815_v34 = vld [vmem:[%s9909_s3 + $0x28] sm:$0xff]   ;;  %v7818_v35 = vld [vmem:[%s9909_s3 + $0x60] sm:$0xff]  }
  0x1f   : > { %260 = vst [vmem:[#allocation2 + $0x88] sm:$0xf] %v7947_v2  ;;  %261 = vst [vmem:[#allocation2 + $0x8c] sm:$0xf] %v7947_v2  ;;  %7143 = vmatpush3.bf16.msra.mxu0 %v7787_v6  ;;  %v7817_v36 = vld [vmem:[%s9909_s3 + $0x30] sm:$0xff]   ;;  %v7820_v37 = vld [vmem:[%s9909_s3 + $0x68] sm:$0xff]  }
  0x20   : > { %262 = vst [vmem:[#allocation2 + $0x90] sm:$0xf] %v7947_v2  ;;  %263 = vst [vmem:[#allocation2 + $0x94] sm:$0xf] %v7947_v2  ;;  %7144 = vmatprep.subr.bf16.mxu0 %v7788_v7  ;;  %v7819_v38 = vld [vmem:[%s9909_s3 + $0x38] sm:$0xff]   ;;  %v8082_v39 = vld [vmem:[#allocation2] sm:$0xff]  }
  0x21   : > { %264 = vst [vmem:[#allocation2 + $0x98] sm:$0xf] %v7947_v2  ;;  %265 = vst [vmem:[#allocation2 + $0x9c] sm:$0xf] %v7947_v2  ;;  %7189 = vmatpush3.bf16.msra.mxu1 %v7811_v30  ;;  %v7822_v40 = vld [vmem:[%s9909_s3 + $0x70] sm:$0xff]   ;;  %7198 = vmatprep.mubr.bf16.mxu1 %v8082_v39  ;;  %v7828_v41 = vld [vmem:[%s9909_s3 + $0x78] sm:$0xff]  }
  0x22   : > { %266 = vst [vmem:[#allocation2 + $0xa0] sm:$0xf] %v7947_v2  ;;  %267 = vst [vmem:[#allocation2 + $0xa4] sm:$0xf] %v7947_v2  ;;  %7190 = vmatprep.subr.bf16.mxu1 %v7813_v32  ;;  %v8094_v42 = vld [vmem:[%s9909_s3 + $0x80] sm:$0xff]   ;;  %v1772_v53 = vshll.u32 %v8082_v39, 16 }
  0x23   : > { %268 = vst [vmem:[#allocation2 + $0xa8] sm:$0xf] %v7947_v2  ;;  %269 = vst [vmem:[#allocation2 + $0xac] sm:$0xf] %v7947_v2  ;;  %7145 = vmatpush3.bf16.msra.mxu0 %v7788_v7  ;;  %v8100_v43 = vld [vmem:[%s9909_s3 + $0xc0] sm:$0xff]   ;;  %vm1102_vm4 = vcmask 1040384  }
  0x24   : > { %270 = vst [vmem:[#allocation2 + $0xb0] sm:$0xf] %v7947_v2  ;;  %271 = vst [vmem:[#allocation2 + $0xb4] sm:$0xf] %v7947_v2  ;;  %7146 = vmatprep.subr.bf16.mxu0 %v7789_v8  ;;  %v8106_v44 = vld [vmem:[%s9908_s2] ss:$0 sm:$0xff] }
  0x25   : > { %272 = vst [vmem:[#allocation2 + $0xb8] sm:$0xf] %v7947_v2  ;;  %273 = vst [vmem:[#allocation2 + $0xbc] sm:$0xf] %v7947_v2  ;;  %7191 = vmatpush3.bf16.msra.mxu1 %v7813_v32  ;;  %vm1096_vm1 = vsmask.f32 7938 }
  0x26   : > { %274 = vst [vmem:[#allocation2 + $0xc0] sm:$0xf] %v7947_v2  ;;  %275 = vst [vmem:[#allocation2 + $0xc4] sm:$0xf] %v7947_v2  ;;  %7192 = vmatprep.subr.bf16.mxu1 %v7815_v34  ;;  %vm771_vm2 = vsmask.f32 256 }
  0x27   : > { %276 = vst [vmem:[#allocation2 + $0xc8] sm:$0xf] %v7947_v2  ;;  %277 = vst [vmem:[#allocation2 + $0xcc] sm:$0xf] %v7947_v2  ;;  %7147 = vmatpush3.bf16.msra.mxu0 %v7789_v8  ;;  %vm772_vm3 = vsmask.f32 4368 }
  0x28   : > { %278 = vst [vmem:[#allocation2 + $0xd0] sm:$0xf] %v7947_v2  ;;  %279 = vst [vmem:[#allocation2 + $0xd4] sm:$0xf] %v7947_v2  ;;  %7148 = vmatprep.subr.bf16.mxu0 %v7790_v9  ;;  %v1770_v62 = vshrl.u32 %v8082_v39, 16  ;;  %v8114_v63 = vrot.slane %v1772_v53, 1 }
  0x29   : > { %280 = vst [vmem:[#allocation2 + $0xd8] sm:$0xf] %v7947_v2  ;;  %7193 = vmatpush3.bf16.msra.mxu1 %v7815_v34  ;;  %vm8119_vm5 = vmand %vm1095_vm0, %vm1096_vm1  ;;  %v1107_v11 = vld [vmem:[#allocation2 + $0x18] sm:$0xf]  ;;  %vm1768_vm8 = vsmask.f32 7424 }
  0x2a   : > { %7194 = vmatprep.subr.bf16.mxu1 %v7817_v36  ;;  %vm8126_vm6 = vmor %vm771_vm2, %vm772_vm3  ;;  %vm2423_vm9 = vcmask 1046528  }
  0x2b   : > { %7149 = vmatpush3.bf16.msra.mxu0 %v7790_v9  ;;  %vm8132_vm7 = vmand %vm1102_vm4, %vm771_vm2 }
  0x2c   : > { %7246 = vmatprep.subr.bf16.mxu0 %v7810_v27 }
  0x2d   : > { %7195 = vmatpush3.bf16.msra.mxu1 %v7817_v36 }
  0x2e   : > { %7151 = vmatmul.mubr.bf16.vlgmr.msra.gmra.mrb[0].mxu0 %v7792_v12  ;;  %7196 = vmatprep.subr.bf16.mxu1 %v7819_v38 }
  0x2f   : > { %7154 = vmatprep.mubr.bf16.mxu0 %v7793_v13  ;;  %7247 = vmatpush3.bf16.msra.mxu0 %v7810_v27  ;;  %v1111_v27 = vld [vmem:[#allocation2 + $0x20] sm:$0x1] }
  0x30   : > { %7248 = vmatprep.subr.bf16.mxu0 %v7812_v29 }
  0x31   : > { %7197 = vmatpush3.bf16.msra.mxu1 %v7819_v38 }
  0x32   : > { %7310 = vmatprep.subr.bf16.mxu1 %v8094_v42 }
  0x33   : > { %7249 = vmatpush3.bf16.msra.mxu0 %v7812_v29 }
  0x34   : > { %7250 = vmatprep.subr.bf16.mxu0 %v7814_v31 }
  0x36   : > { %7155 = vmatmul.mubr.bf16.gmra.mrb[4].mxu0 %v7794_v14 }
  0x37   : > { %7158 = vmatprep.mubr.bf16.mxu0 %v7795_v15  ;;  %7251 = vmatpush3.bf16.msra.mxu0 %v7814_v31 }
  0x38   : > { %7252 = vmatprep.subr.bf16.mxu0 %v7816_v33 }
  0x3b   : > { %7253 = vmatpush3.bf16.msra.mxu0 %v7816_v33  ;;  %v1104_v33 = vld [vmem:[#allocation2 + $0x14] sm:$0x1] }
  0x3c   : > { %7254 = vmatprep.subr.bf16.mxu0 %v7818_v35 }
  0x3e   : > { %7159 = vmatmul.mubr.bf16.gmra.mrb[8].mxu0 %v7796_v16 }
  0x3f   : > { %7162 = vmatprep.mubr.bf16.mxu0 %v7797_v17  ;;  %7255 = vmatpush3.bf16.msra.mxu0 %v7818_v35 }
  0x40   : > { %7256 = vmatprep.subr.bf16.mxu0 %v7820_v37 }
  0x43   : > { %7257 = vmatpush3.bf16.msra.mxu0 %v7820_v37 }
  0x44   : > { %7258 = vmatprep.subr.bf16.mxu0 %v7822_v40 }
  0x46   : > { %7163 = vmatmul.mubr.bf16.gmra.mrb[12].mxu0 %v7798_v18 }
  0x47   : > { %7166 = vmatprep.mubr.bf16.mxu0 %v7799_v19  ;;  %7259 = vmatpush3.bf16.msra.mxu0 %v7822_v40  ;;  %v1098_v19 = vld [vmem:[#allocation2 + $0xc] sm:$0xf] }
  0x48   : > { %7260 = vmatprep.subr.bf16.mxu0 %v7828_v41 }
  0x4b   : > { %7261 = vmatpush3.bf16.msra.mxu0 %v7828_v41 }
  0x4c   : > { %7374 = vmatprep.subr.bf16.mxu0 %v8100_v43 }
  0x4e   : > { %7167 = vmatmul.mubr.bf16.gmra.mrb[16].mxu0 %v7800_v20 }
  0x4f   : > { %7170 = vmatprep.mubr.bf16.mxu0 %v7801_v21 }
  0x56   : > { %7171 = vmatmul.mubr.bf16.gmra.mrb[20].mxu0 %v7802_v22 }
  0x57   : > { %7174 = vmatprep.mubr.bf16.mxu0 %v7803_v23 }
  0x5e   : > { %7175 = vmatmul.mubr.bf16.gmra.mrb[24].mxu0 %v7804_v24 }
  0x5f   : > { %7178 = vmatprep.mubr.bf16.mxu0 %v7805_v25 }
  0x66   : > { %7179 = vmatmul.mubr.bf16.gmra.mrb[28].mxu0 %v7806_v26 }
 0x101   : > { %v7152_v45 = vpop.f32.mrb[0].mxu0 }
 0x102   : > { %v525_v46 = vadd.f32 %v7152_v45, %v8106_v44  ;;  %v516_v47 = vpop.f32.mrb[1].mxu0 }
 0x103   : > { %v517_v48 = vadd.f32 %v8106_v44, %v516_v47  ;;  %v7153_v49 = vpop.f32.mrb[2].mxu0 }
 0x104   : > { %v645_v50 = vmax.f32 %v525_v46, 0.0  ;;  %v528_v51 = vadd.f32 %v7153_v49, %v8106_v44  ;;  %v519_v52 = vpop.f32.mrb[3].mxu0 }
 0x105   : > { %v643_v54 = vmax.f32 %v517_v48, 0.0  ;;  %v520_v55 = vadd.f32 %v8106_v44, %v519_v52 }
 0x106   : > { %v6665_v56 = vpack.c.bf16 %v645_v50, %v645_v50  ;;  %v646_v57 = vmax.f32 %v528_v51, 0.0 }
 0x107   : > { %v6663_v58 = vpack.c.bf16 %v643_v54, %v643_v54  ;;  %v644_v59 = vmax.f32 %v520_v55, 0.0 }
 0x108   : > { %v792_v60 = vshrl.u32 %v6665_v56, 16  ;;  %v6666_v61 = vpack.c.bf16 %v646_v57, %v646_v57  ;;  %v795_v0 = vshll.u32 %v6665_v56, 16  ;;  %v1121_v57 = vld [vmem:[#allocation2 + $0x30] sm:$0xf] }
 0x109   : > { %v775_v1 = vshrl.u32 %v6663_v58, 16  ;;  %v778_v2 = vshll.u32 %v6663_v58, 16  ;;  %v6664_v3 = vpack.c.bf16 %v644_v59, %v644_v59  ;;  %v7156_v4 = vpop.f32.mrb[4].mxu0 }
 0x10a   : > { %v794_v5 = vrot.slane %v792_v60, 7  ;;  %v800_v6 = vshrl.u32 %v6666_v61, 16  ;;  %v803_v7 = vshll.u32 %v6666_v61, 16  ;;  %v541_v8 = vadd.f32 %v7156_v4, %v8106_v44  ;;  %v532_v9 = vpop.f32.mrb[5].mxu0 }
 0x10b   : > { %v777_v12 = vrot.slane %v775_v1, 7  ;;  %v783_v13 = vshrl.u32 %v6664_v3, 16  ;;  %v786_v14 = vshll.u32 %v6664_v3, 16  ;;  %v533_v15 = vadd.f32 %v8106_v44, %v532_v9  ;;  %v7157_v16 = vpop.f32.mrb[6].mxu0 }
 0x10c   : > { %v797_v17 = vor.u32 %v795_v0, %v794_v5  ;;  %v798_v18 = vrot.slane %v794_v5, 4  ;;  %v802_v21 = vrot.slane %v800_v6, 7  ;;  %v649_v22 = vmax.f32 %v541_v8, 0.0  ;;  %v535_v23 = vpop.f32.mrb[7].mxu0 }
 0x10d   : > { %v780_v24 = vor.u32 %v778_v2, %v777_v12  ;;  %v781_v25 = vrot.slane %v777_v12, 4  ;;  %v785_v28 = vrot.slane %v783_v13, 7  ;;  %v647_v29 = vmax.f32 %v533_v15, 0.0  ;;  %v1114_v2 = vld [vmem:[#allocation2 + $0x24] sm:$0xf] }
 0x10e   : > { %v1108_v30 = vsel %vm8119_vm5, %v797_v17, %v1107_v11  ;;  %v805_v31 = vor.u32 %v803_v7, %v802_v21  ;;  %v807_v32 = vrot.slane %v802_v21, 4  ;;  %v6669_v34 = vpack.c.bf16 %v649_v22, %v649_v22  ;;  %v1125_v21 = vld [vmem:[#allocation2 + $0x38] sm:$0x1]  ;;  %v1118_v22 = vld [vmem:[#allocation2 + $0x2c] sm:$0x1] }
 0x10f   : > { %1109 = vst [vmem:[#allocation2 + $0x18] sm:$0xf] %v1108_v30  ;;  %v1099_v35 = vsel %vm8119_vm5, %v780_v24, %v1098_v19  ;;  %v788_v36 = vor.u32 %v786_v14, %v785_v28  ;;  %v790_v37 = vrot.slane %v785_v28, 4  ;;  %v6667_v38 = vpack.c.bf16 %v647_v29, %v647_v29 }
 0x110   : > { %1100 = vst [vmem:[#allocation2 + $0xc] sm:$0xf] %v1099_v35  ;;  %v806_v40 = vsel %vm8126_vm6, %v798_v18, %v805_v31  ;;  %v1112_v41 = vsel %vm8132_vm7, %v807_v32, %v1111_v27  ;;  %v826_v45 = vshrl.u32 %v6669_v34, 16  ;;  %v829_v46 = vshll.u32 %v6669_v34, 16  ;;  %v1135_v35 = vld [vmem:[#allocation2 + $0x48] sm:$0xf] }
 0x111   : > { %1110 = vst [vmem:[#allocation2 + $0x1c] sm:$0xf] %v806_v40  ;;  %1113 = vst [vmem:[#allocation2 + $0x20] sm:$0x1] %v1112_v41  ;;  %v789_v47 = vsel %vm8126_vm6, %v781_v25, %v788_v36  ;;  %v1105_v48 = vsel %vm8132_vm7, %v790_v37, %v1104_v33  ;;  %v809_v49 = vshrl.u32 %v6667_v38, 16  ;;  %v812_v50 = vshll.u32 %v6667_v38, 16 }
 0x112   : > { %v7160_v51 = vpop.f32.mrb[8].mxu0  ;;  %1101 = vst [vmem:[#allocation2 + $0x10] sm:$0xf] %v789_v47  ;;  %1106 = vst [vmem:[#allocation2 + $0x14] sm:$0x1] %v1105_v48  ;;  %v8148_v52 = vrot.slane %v826_v45, 7  ;;  %v544_v53 = vadd.f32 %v7157_v16, %v8106_v44  ;;  %v536_v54 = vadd.f32 %v8106_v44, %v535_v23  ;;  %v8157_v61 = vor.u32 %v8114_v63, %v1770_v62 }
 0x113   : > { %v557_v55 = vadd.f32 %v7160_v51, %v8106_v44  ;;  %v548_v56 = vpop.f32.mrb[9].mxu0  ;;  %v811_v58 = vrot.slane %v809_v49, 7  ;;  %v1128_v48 = vld [vmem:[#allocation2 + $0x3c] sm:$0xf] }
 0x114   : > { %v549_v59 = vadd.f32 %v8106_v44, %v548_v56  ;;  %v7161_v60 = vpop.f32.mrb[10].mxu0  ;;  %v831_v0 = vor.u32 %v829_v46, %v8148_v52  ;;  %v832_v1 = vrot.slane %v8148_v52, 4  ;;  %v650_v3 = vmax.f32 %v544_v53, 0.0 }
 0x115   : > { %v648_v4 = vmax.f32 %v536_v54, 0.0  ;;  %v551_v5 = vpop.f32.mrb[11].mxu0  ;;  %v814_v6 = vor.u32 %v812_v50, %v811_v58  ;;  %v815_v7 = vrot.slane %v811_v58, 4  ;;  %v653_v8 = vmax.f32 %v557_v55, 0.0  ;;  %v1214_v54 = vld [vmem:[#allocation2 + $0x8] sm:$0xf] }
 0x116   : > { %v651_v9 = vmax.f32 %v549_v59, 0.0  ;;  %v1122_v11 = vsel %vm8119_vm5, %v831_v0, %v1121_v57  ;;  %v6670_v12 = vpack.c.bf16 %v650_v3, %v650_v3  ;;  %v560_v62 = vadd.f32 %v7161_v60, %v8106_v44 }
 0x117   : > { %v6668_v39 = vpack.c.bf16 %v648_v4, %v648_v4  ;;  %1123 = vst [vmem:[#allocation2 + $0x30] sm:$0xf] %v1122_v11  ;;  %v1115_v63 = vsel %vm8119_vm5, %v814_v6, %v1114_v2  ;;  %v6673_v13 = vpack.c.bf16 %v653_v8, %v653_v8  ;;  %v552_v15 = vadd.f32 %v8106_v44, %v551_v5  ;;  %v1215_v55 = vld [vmem:[#allocation2 + $0xc] sm:$0xf] }
 0x118   : > { %v6671_v14 = vpack.c.bf16 %v651_v9, %v651_v9  ;;  %1116 = vst [vmem:[#allocation2 + $0x24] sm:$0xf] %v1115_v63  ;;  %v834_v16 = vshrl.u32 %v6670_v12, 16  ;;  %v837_v17 = vshll.u32 %v6670_v12, 16  ;;  %v654_v31 = vmax.f32 %v560_v62, 0.0  ;;  %v7830_v4 = vld [vmem:[%s9909_s3 + $0x88] sm:$0xff]  }
 0x119   : > { %v817_v18 = vshrl.u32 %v6668_v39, 16  ;;  %v820_v19 = vshll.u32 %v6668_v39, 16  ;;  %v860_v23 = vshrl.u32 %v6673_v13, 16  ;;  %v863_v24 = vshll.u32 %v6673_v13, 16  ;;  %v7164_v28 = vpop.f32.mrb[12].mxu0 }
 0x11a   : > { %v843_v25 = vshrl.u32 %v6671_v14, 16  ;;  %v846_v27 = vshll.u32 %v6671_v14, 16  ;;  %v836_v29 = vrot.slane %v834_v16, 7  ;;  %v652_v32 = vmax.f32 %v552_v15, 0.0  ;;  %v564_v33 = vpop.f32.mrb[13].mxu0 }
 0x11b   : > { %v819_v30 = vrot.slane %v817_v18, 7  ;;  %v8167_v34 = vrot.slane %v860_v23, 7  ;;  %v573_v37 = vadd.f32 %v7164_v28, %v8106_v44  ;;  %v565_v38 = vadd.f32 %v8106_v44, %v564_v33  ;;  %v7165_v40 = vpop.f32.mrb[14].mxu0  ;;  %v1219_v3 = vld [vmem:[#allocation2 + $0x1c] sm:$0xf] }
 0x11c   : > { %v8169_v36 = vrot.slane %v843_v25, 7  ;;  %v839_v41 = vor.u32 %v837_v17, %v836_v29  ;;  %v841_v45 = vrot.slane %v836_v29, 4  ;;  %v567_v49 = vpop.f32.mrb[15].mxu0  ;;  %v6672_v2 = vpack.c.bf16 %v652_v32, %v652_v32  ;;  %v1216_v9 = vld [vmem:[#allocation2 + $0x10] sm:$0xf] }
 0x11d   : > { %v822_v46 = vor.u32 %v820_v19, %v819_v30  ;;  %v824_v47 = vrot.slane %v819_v30, 4  ;;  %v865_v50 = vor.u32 %v863_v24, %v8167_v34  ;;  %v866_v51 = vrot.slane %v8167_v34, 4  ;;  %v1217_v11 = vld [vmem:[#allocation2 + $0x14] sm:$0xf]  ;;  %v1132_v14 = vld [vmem:[#allocation2 + $0x44] sm:$0x1] }
 0x11e   : > { %v848_v52 = vor.u32 %v846_v27, %v8169_v36  ;;  %v849_v53 = vrot.slane %v8169_v36, 4  ;;  %v840_v56 = vsel %vm8126_vm6, %v832_v1, %v839_v41  ;;  %v1126_v57 = vsel %vm8132_vm7, %v841_v45, %v1125_v21  ;;  %v1218_v19 = vld [vmem:[#allocation2 + $0x18] sm:$0xf]  ;;  %v1139_v23 = vld [vmem:[#allocation2 + $0x50] sm:$0x1] }
 0x11f   : > { %v823_v58 = vsel %vm8126_vm6, %v815_v7, %v822_v46  ;;  %v1119_v59 = vsel %vm8132_vm7, %v824_v47, %v1118_v22  ;;  %1124 = vst [vmem:[#allocation2 + $0x34] sm:$0xf] %v840_v56  ;;  %1127 = vst [vmem:[#allocation2 + $0x38] sm:$0x1] %v1126_v57  ;;  %v1136_v60 = vsel %vm8119_vm5, %v865_v50, %v1135_v35  ;;  %v657_v5 = vmax.f32 %v573_v37, 0.0  ;;  %v7833_v35 = vld [vmem:[%s9909_s3 + $0x90] sm:$0xff]  }
 0x120   : > { %1117 = vst [vmem:[#allocation2 + $0x28] sm:$0xf] %v823_v58  ;;  %1120 = vst [vmem:[#allocation2 + $0x2c] sm:$0x1] %v1119_v59  ;;  %v1129_v0 = vsel %vm8119_vm5, %v848_v52, %v1128_v48  ;;  %v6674_v1 = vpack.c.bf16 %v654_v31, %v654_v31  ;;  %v655_v6 = vmax.f32 %v565_v38, 0.0  ;;  %v8192_v7 = vcombine.low %v1214_v54, %v1215_v55  ;;  %v7838_v36 = vld [vmem:[%s9909_s3 + $0x98] sm:$0xff]  }
 0x121   : > { %1137 = vst [vmem:[#allocation2 + $0x48] sm:$0xf] %v1136_v60  ;;  %1130 = vst [vmem:[#allocation2 + $0x3c] sm:$0xf] %v1129_v0  ;;  %v576_v8 = vadd.f32 %v7165_v40, %v8106_v44  ;;  %v851_v62 = vshrl.u32 %v6672_v2, 16  ;;  %v854_v63 = vshll.u32 %v6672_v2, 16  ;;  %v6677_v15 = vpack.c.bf16 %v657_v5, %v657_v5 }
 0x122   : > { %v868_v12 = vshrl.u32 %v6674_v1, 16  ;;  %v871_v39 = vshll.u32 %v6674_v1, 16  ;;  %v8195_v13 = vpop.f32.mrb[16].mxu0  ;;  %v6675_v16 = vpack.c.bf16 %v655_v6, %v655_v6  ;;  %7199 = vmatmul.mubr.bf16.vlgmr.msra.gmra.mrb[0].mxu1 %v8192_v7  ;;  %v568_v18 = vadd.f32 %v8106_v44, %v567_v49  ;;  %v1149_v54 = vld [vmem:[#allocation2 + $0x60] sm:$0xf] }
 0x123   : > { %v658_v17 = vmax.f32 %v576_v8, 0.0  ;;  %v8199_v21 = vpop.f32.mrb[17].mxu0  ;;  %v853_v24 = vrot.slane %v851_v62, 7  ;;  %7311 = vmatpush3.bf16.msra.mxu1 %v8094_v42  ;;  %v8202_v25 = vcombine.low %v1216_v9, %v1217_v11  ;;  %v8204_v27 = vcombine.low %v1218_v19, %v1219_v3  ;;  %v1142_v55 = vld [vmem:[#allocation2 + $0x54] sm:$0xf] }
 0x124   : > { %v870_v22 = vrot.slane %v868_v12, 7  ;;  %v8206_v28 = vpop.f32.mrb[18].mxu0  ;;  %v894_v29 = vshrl.u32 %v6677_v15, 16  ;;  %v897_v30 = vshll.u32 %v6677_v15, 16  ;;  %v877_v31 = vshrl.u32 %v6675_v16, 16  ;;  %7312 = vmatprep.subr.bf16.mxu1 %v7830_v4 }
 0x125   : > { %9998 = vst [vmem:[#allocation4_spill] sm:$0xff] %v8204_v27  ;;  %v880_v32 = vshll.u32 %v6675_v16, 16  ;;  %v8208_v33 = vpop.f32.mrb[19].mxu0  ;;  %v856_v38 = vor.u32 %v854_v63, %v853_v24  ;;  %v858_v40 = vrot.slane %v853_v24, 4  ;;  %7202 = vmatprep.mubr.bf16.mxu1 %v8202_v25  ;;  %v6678_v46 = vpack.c.bf16 %v658_v17, %v658_v17  ;;  %v1221_v0 = vld [vmem:[#allocation2 + $0x24] sm:$0xf] }
 0x126   : > { %v873_v37 = vor.u32 %v871_v39, %v870_v22  ;;  %v875_v42 = vrot.slane %v870_v22, 4  ;;  %v896_v41 = vrot.slane %v894_v29, 7  ;;  %v8214_v45 = vrot.slane %v877_v31, 7  ;;  %v8244_v6 = vld [vmem:[#allocation2 + $0x20] sm:$0xf] }
 0x127   : > { %v656_v47 = vmax.f32 %v568_v18, 0.0  ;;  %v857_v50 = vsel %vm8126_vm6, %v849_v53, %v856_v38  ;;  %v1133_v52 = vsel %vm8132_vm7, %v858_v40, %v1132_v14  ;;  %7313 = vmatpush3.bf16.msra.mxu1 %v7830_v4  ;;  %v902_v53 = vshrl.u32 %v6678_v46, 16  ;;  %v1153_v63 = vld [vmem:[#allocation2 + $0x68] sm:$0x1] }
 0x128   : > { %v874_v48 = vsel %vm8126_vm6, %v866_v51, %v873_v37  ;;  %v1140_v49 = vsel %vm8132_vm7, %v875_v42, %v1139_v23  ;;  %1131 = vst [vmem:[#allocation2 + $0x40] sm:$0xf] %v857_v50  ;;  %1134 = vst [vmem:[#allocation2 + $0x44] sm:$0x1] %v1133_v52  ;;  %v899_v34 = vor.u32 %v897_v30, %v896_v41  ;;  %v900_v51 = vrot.slane %v896_v41, 4  ;;  %v7853_v40 = vld [vmem:[%s9909_s3 + $0xc8] sm:$0xff]  }
 0x129   : > { %1138 = vst [vmem:[#allocation2 + $0x4c] sm:$0xf] %v874_v48  ;;  %1141 = vst [vmem:[#allocation2 + $0x50] sm:$0x1] %v1140_v49  ;;  %v882_v56 = vor.u32 %v880_v32, %v8214_v45  ;;  %v883_v57 = vrot.slane %v8214_v45, 4  ;;  %7314 = vmatprep.subr.bf16.mxu1 %v7833_v35  ;;  %v905_v58 = vshll.u32 %v6678_v46, 16  ;;  %v6676_v59 = vpack.c.bf16 %v656_v47, %v656_v47 }
 0x12a   : > { %v8233_v60 = vcombine.low %v1217_v11, %v1218_v19  ;;  %v8235_v1 = vpop.f32.mrb[20].mxu0  ;;  %v1150_v2 = vsel %vm8119_vm5, %v899_v34, %v1149_v54  ;;  %v1777_v4 = vshll.u32 %v8192_v7, 16  ;;  %v1781_v5 = vshrl.u32 %v8192_v7, 16  ;;  %7203 = vmatmul.mubr.bf16.gmra.mrb[4].mxu1 %v8204_v27  ;;  %v7841_v19 = vld [vmem:[%s9909_s3 + $0xa0] sm:$0xff]   ;;  %v1146_v30 = vld [vmem:[#allocation2 + $0x5c] sm:$0x1] }
 0x12b   : > { %v1143_v3 = vsel %vm8119_vm5, %v882_v56, %v1142_v55  ;;  %v8246_v8 = vpop.f32.mrb[21].mxu0  ;;  %1151 = vst [vmem:[#allocation2 + $0x60] sm:$0xf] %v1150_v2  ;;  %v904_v9 = vrot.slane %v902_v53, 7  ;;  %v885_v11 = vshrl.u32 %v6676_v59, 16  ;;  %v888_v12 = vshll.u32 %v6676_v59, 16  ;;  %7315 = vmatpush3.bf16.msra.mxu1 %v7833_v35 }
 0x12c   : > { %9999 = vst [vmem:[#allocation5_spill] sm:$0xff] %v8233_v60  ;;  %1144 = vst [vmem:[#allocation2 + $0x54] sm:$0xf] %v1143_v3  ;;  %v1785_v39 = vshll.u32 %v8202_v25, 16  ;;  %v8249_v62 = vpop.f32.mrb[22].mxu0  ;;  %v1779_v14 = vrot.slane %v1777_v4, 1  ;;  %v589_v15 = vadd.f32 %v8195_v13, %v8106_v44  ;;  %v581_v16 = vadd.f32 %v8106_v44, %v8199_v21  ;;  %7316 = vmatprep.subr.bf16.mxu1 %v7838_v36 }
 0x12d   : > { %v8256_v17 = vcombine.low %v8244_v6, %v1221_v0  ;;  %v8258_v18 = vpop.f32.mrb[23].mxu0  ;;  %v907_v22 = vor.u32 %v905_v58, %v904_v9  ;;  %v909_v23 = vrot.slane %v904_v9, 4  ;;  %v887_v24 = vrot.slane %v885_v11, 7  ;;  %v7846_v47 = vld [vmem:[%s9909_s3 + $0xa8] sm:$0xff]   ;;  %v7854_v3 = vld [vmem:[%s9909_s3 + $0xd0] sm:$0xff]  }
 0x12e   : > { %v1787_v29 = vrot.slane %v1785_v39, 1  ;;  %v1780_v13 = vsel %vm1768_vm8, %v8157_v61, %v1779_v14  ;;  %v1783_v31 = vor.u32 %v1781_v5, %v1779_v14  ;;  %v661_v21 = vmax.f32 %v589_v15, 0.0  ;;  %v8285_v54 = vld [vmem:[#allocation2 + $0x28] sm:$0xf]  ;;  %v8287_v55 = vld [vmem:[#allocation2 + $0x2c] sm:$0xf] }
 0x12f   : > { %10000 = vst [vmem:[#allocation6_spill] sm:$0xff] %v8256_v17  ;;  %v659_v32 = vmax.f32 %v581_v16, 0.0  ;;  %7206 = vmatprep.mubr.bf16.mxu1 %v8256_v17  ;;  %v908_v35 = vsel %vm8126_vm6, %v900_v51, %v907_v22  ;;  %v1154_v37 = vsel %vm8132_vm7, %v909_v23, %v1153_v63  ;;  %v890_v42 = vor.u32 %v888_v12, %v887_v24  ;;  %v1156_v12 = vld [vmem:[#allocation2 + $0x6c] sm:$0xf]  ;;  %v7850_v16 = vld [vmem:[%s9909_s3 + $0xb0] sm:$0xff]  }
 0x130   : > { %v892_v38 = vrot.slane %v887_v24, 4  ;;  %7262 = vmatprep.mubr.bf16.mxu0 %v1780_v13  ;;  %7317 = vmatpush3.bf16.msra.mxu1 %v7838_v36  ;;  %1152 = vst [vmem:[#allocation2 + $0x64] sm:$0xf] %v908_v35  ;;  %1155 = vst [vmem:[#allocation2 + $0x68] sm:$0x1] %v1154_v37  ;;  %v1788_v61 = vsel %vm1768_vm8, %v1783_v31, %v1787_v29  ;;  %v6681_v41 = vpack.c.bf16 %v661_v21, %v661_v21 }
 0x131   : > { %v6679_v45 = vpack.c.bf16 %v659_v32, %v659_v32  ;;  %v1789_v46 = vshrl.u32 %v8202_v25, 16  ;;  %7318 = vmatprep.subr.bf16.mxu1 %v7841_v19  ;;  %v891_v48 = vsel %vm8126_vm6, %v883_v57, %v890_v42  ;;  %7263 = vmatmul.mubr.bf16.vlgmr.msra.gmra.mrb[32].mxu0 %v1788_v61  ;;  %v1793_v50 = vshll.u32 %v8204_v27, 16  ;;  %10001 = vst [vmem:[#allocation7_spill] sm:$0xff] %v8287_v55  ;;  %v8289_v34 = vpop.f32.mrb[24].mxu0  ;;  %v8325_v32 = vld [vmem:[#allocation2 + $0x30] sm:$0xf] }
 0x132   : > { %v1147_v49 = vsel %vm8132_vm7, %v892_v38, %v1146_v30  ;;  %v592_v52 = vadd.f32 %v8206_v28, %v8106_v44  ;;  %1145 = vst [vmem:[#allocation2 + $0x58] sm:$0xf] %v891_v48  ;;  %v928_v51 = vshrl.u32 %v6681_v41, 16  ;;  %v931_v56 = vshll.u32 %v6681_v41, 16  ;;  %v8291_v53 = vpop.f32.mrb[25].mxu0  ;;  %7375 = vmatpush3.bf16.msra.mxu0 %v8100_v43  ;;  %10003 = vst [vmem:[#allocation9_spill] sm:$0xff] %v8325_v32 }
 0x133   : > { %1148 = vst [vmem:[#allocation2 + $0x5c] sm:$0x1] %v1147_v49  ;;  %v911_v57 = vshrl.u32 %v6679_v45, 16  ;;  %v914_v36 = vshll.u32 %v6679_v45, 16  ;;  %v1791_v58 = vor.u32 %v1789_v46, %v1787_v29  ;;  %v1795_v59 = vrot.slane %v1793_v50, 1  ;;  %v8296_v2 = vpop.f32.mrb[26].mxu0  ;;  %7376 = vmatprep.subr.bf16.mxu0 %v7853_v40 }
 0x134   : > { %v662_v0 = vmax.f32 %v592_v52, 0.0  ;;  %v584_v28 = vadd.f32 %v8106_v44, %v8208_v33  ;;  %7319 = vmatpush3.bf16.msra.mxu1 %v7841_v19  ;;  %v8301_v4 = vrot.slane %v928_v51, 7  ;;  %v1797_v43 = vshrl.u32 %v8204_v27, 16  ;;  %v8307_v11 = vpop.f32.mrb[27].mxu0  ;;  %v1163_v33 = vld [vmem:[#allocation2 + $0x78] sm:$0xf] }
 0x135   : > { %v8303_v5 = vrot.slane %v911_v57, 7  ;;  %v1801_v9 = vshll.u32 %v8256_v17, 16  ;;  %7320 = vmatprep.subr.bf16.mxu1 %v7846_v47  ;;  %v1796_v39 = vsel %vm1768_vm8, %v1791_v58, %v1795_v59  ;;  %v8312_v15 = vcombine.low %v8285_v54, %v8287_v55  ;;  %v7858_v29 = vld [vmem:[%s9909_s3 + $0xd8] sm:$0xff]   ;;  %v8327_v35 = vld [vmem:[#allocation2 + $0x34] sm:$0xf] }
 0x136   : > { %v6682_v63 = vpack.c.bf16 %v662_v0, %v662_v0  ;;  %v660_v14 = vmax.f32 %v584_v28, 0.0  ;;  %v933_v19 = vor.u32 %v931_v56, %v8301_v4  ;;  %v934_v22 = vrot.slane %v8301_v4, 4  ;;  %7266 = vmatprep.mubr.bf16.mxu0 %v1796_v39  ;;  %7377 = vmatpush3.bf16.msra.mxu0 %v7853_v40  ;;  %v7857_v48 = vld [vmem:[%s9909_s3 + $0xb8] sm:$0xff]   ;;  %v1167_v49 = vld [vmem:[#allocation2 + $0x80] sm:$0x1] }
 0x137   : > { %10002 = vst [vmem:[#allocation8_spill] sm:$0xff] %v8312_v15  ;;  %v916_v23 = vor.u32 %v914_v36, %v8303_v5  ;;  %v917_v24 = vrot.slane %v8303_v5, 4  ;;  %v1799_v21 = vor.u32 %v1797_v43, %v1795_v59  ;;  %7207 = vmatmul.mubr.bf16.gmra.mrb[8].mxu1 %v8312_v15  ;;  %7378 = vmatprep.subr.bf16.mxu0 %v7854_v3  ;;  %v1803_v38 = vrot.slane %v1801_v9, 1  ;;  %v7859_v28 = vld [vmem:[%s9909_s3 + $0xe0] sm:$0xff]   ;;  %v1160_v4 = vld [vmem:[#allocation2 + $0x74] sm:$0x1] }
 0x138   : > { %v936_v30 = vshrl.u32 %v6682_v63, 16  ;;  %v939_v13 = vshll.u32 %v6682_v63, 16  ;;  %v6680_v31 = vpack.c.bf16 %v660_v14, %v660_v14  ;;  %v1164_v37 = vsel %vm8119_vm5, %v933_v19, %v1163_v33  ;;  %7321 = vmatpush3.bf16.msra.mxu1 %v7846_v47 }
 0x139   : > { %v1157_v42 = vsel %vm8119_vm5, %v916_v23, %v1156_v12  ;;  %v1805_v40 = vshrl.u32 %v8256_v17, 16  ;;  %1165 = vst [vmem:[#allocation2 + $0x78] sm:$0xf] %v1164_v37  ;;  %v1809_v46 = vshll.u32 %v8312_v15, 16  ;;  %7322 = vmatprep.subr.bf16.mxu1 %v7850_v16  ;;  %v8339_v50 = vsel %vm1768_vm8, %v1799_v21, %v1803_v38  ;;  %v8347_v56 = vpop.f32.mrb[28].mxu0  ;;  %v7861_v37 = vld [vmem:[%s9909_s3 + $0xe8] sm:$0xff]  }
 0x13a   : > { %1158 = vst [vmem:[#allocation2 + $0x6c] sm:$0xf] %v1157_v42  ;;  %v938_v61 = vrot.slane %v936_v30, 7  ;;  %v919_v41 = vshrl.u32 %v6680_v31, 16  ;;  %v922_v45 = vshll.u32 %v6680_v31, 16  ;;  %10004 = vst [vmem:[#allocation10_spill] sm:$0xff] %v8339_v50  ;;  %v8343_v47 = vcombine.low %v8325_v32, %v8327_v35  ;;  %7379 = vmatpush3.bf16.msra.mxu0 %v7854_v3 }
 0x13b   : > { %v1807_v52 = vor.u32 %v1805_v40, %v1803_v38  ;;  %v605_v51 = vadd.f32 %v8235_v1, %v8106_v44  ;;  %7267 = vmatmul.mubr.bf16.gmra.mrb[36].mxu0 %v8339_v50  ;;  %v1811_v59 = vrot.slane %v1809_v46, 1  ;;  %v8350_v0 = vpop.f32.mrb[29].mxu0  ;;  %7380 = vmatprep.subr.bf16.mxu0 %v7858_v29  ;;  %v597_v3 = vadd.f32 %v8106_v44, %v8246_v8  ;;  %v8373_v8 = vld [vmem:[%s9909_s3 + $0x100] sm:$0xff]   ;;  %v8378_v23 = vld [vmem:[#allocation2 + $0x3c] sm:$0xf] }
 0x13c   : > { %10005 = vst [vmem:[#allocation11_spill] sm:$0xff] %v8343_v47  ;;  %v941_v57 = vor.u32 %v939_v13, %v938_v61  ;;  %v943_v36 = vrot.slane %v938_v61, 4  ;;  %v921_v58 = vrot.slane %v919_v41, 7  ;;  %7210 = vmatprep.mubr.bf16.mxu1 %v8343_v47  ;;  %v608_v43 = vadd.f32 %v8249_v62, %v8106_v44  ;;  %v8362_v33 = vpop.f32.mrb[30].mxu0  ;;  %7323 = vmatpush3.bf16.msra.mxu1 %v7850_v16 }
 0x13d   : > { %v665_v1 = vmax.f32 %v605_v51, 0.0  ;;  %v600_v9 = vadd.f32 %v8106_v44, %v8258_v18  ;;  %v8368_v19 = vpop.f32.mrb[31].mxu0  ;;  %7324 = vmatprep.subr.bf16.mxu1 %v7857_v48  ;;  %10006 = vst [vmem:[#allocation12_spill] sm:$0xff] %v8373_v8  ;;  %v8376_v62 = vsel %vm1768_vm8, %v1807_v52, %v1811_v59  ;;  %v663_v16 = vmax.f32 %v597_v3, 0.0 }
 0x13e   : > { %v942_v12 = vsel %vm8126_vm6, %v934_v22, %v941_v57  ;;  %v1168_v39 = vsel %vm8132_vm7, %v943_v36, %v1167_v49  ;;  %v924_v63 = vor.u32 %v922_v45, %v921_v58  ;;  %v926_v14 = vrot.slane %v921_v58, 4  ;;  %10007 = vst [vmem:[#allocation13_spill] sm:$0xff] %v8376_v62  ;;  %7381 = vmatpush3.bf16.msra.mxu0 %v7858_v29  ;;  %v1177_v49 = vld [vmem:[#allocation2 + $0x90] sm:$0xf]  ;;  %v1170_v36 = vld [vmem:[#allocation2 + $0x84] sm:$0xf] }
 0x13f   : > { %1166 = vst [vmem:[#allocation2 + $0x7c] sm:$0xf] %v942_v12  ;;  %1169 = vst [vmem:[#allocation2 + $0x80] sm:$0x1] %v1168_v39  ;;  %v6685_v18 = vpack.c.bf16 %v665_v1, %v665_v1  ;;  %v666_v22 = vmax.f32 %v608_v43, 0.0  ;;  %7270 = vmatprep.mubr.bf16.mxu0 %v8376_v62  ;;  %v664_v31 = vmax.f32 %v600_v9, 0.0  ;;  %7382 = vmatprep.subr.bf16.mxu0 %v7859_v28 }
 0x140   : > { %v925_v30 = vsel %vm8126_vm6, %v917_v24, %v924_v63  ;;  %v1161_v13 = vsel %vm8132_vm7, %v926_v14, %v1160_v4  ;;  %v1813_v21 = vshrl.u32 %v8312_v15, 16  ;;  %v6683_v42 = vpack.c.bf16 %v663_v16, %v663_v16  ;;  %v8391_v24 = vld [vmem:[#allocation2 + $0x38] sm:$0xf]  ;;  %7325 = vmatpush3.bf16.msra.mxu1 %v7857_v48  ;;  %v8400_v12 = vld [vmem:[#allocation2 + $0x40] sm:$0xf]  ;;  %v7863_v39 = vld [vmem:[%s9909_s3 + $0xf0] sm:$0xff]  }
 0x141   : > { %1159 = vst [vmem:[#allocation2 + $0x70] sm:$0xf] %v925_v30  ;;  %1162 = vst [vmem:[#allocation2 + $0x74] sm:$0x1] %v1161_v13  ;;  %v962_v29 = vshrl.u32 %v6685_v18, 16  ;;  %v965_v5 = vshll.u32 %v6685_v18, 16  ;;  %v6686_v38 = vpack.c.bf16 %v666_v22, %v666_v22  ;;  %v6684_v40 = vpack.c.bf16 %v664_v31, %v664_v31  ;;  %7438 = vmatprep.subr.bf16.mxu1 %v8373_v8 }
 0x142   : > { %v1815_v61 = vor.u32 %v1813_v21, %v1811_v59  ;;  %v1817_v41 = vshll.u32 %v8343_v47, 16  ;;  %v8396_v45 = vcombine.low %v8391_v24, %v8378_v23  ;;  %v945_v52 = vshrl.u32 %v6683_v42, 16  ;;  %7383 = vmatpush3.bf16.msra.mxu0 %v7859_v28  ;;  %v8410_v16 = vld [vmem:[#allocation2 + $0x44] sm:$0xf]  ;;  %v1181_v21 = vld [vmem:[#allocation2 + $0x98] sm:$0x1] }
 0x143   : > { %v964_v46 = vrot.slane %v962_v29, 7  ;;  %v948_v51 = vshll.u32 %v6683_v42, 16  ;;  %v970_v57 = vshrl.u32 %v6686_v38, 16  ;;  %v973_v58 = vshll.u32 %v6686_v38, 16  ;;  %7384 = vmatprep.subr.bf16.mxu0 %v7861_v37  ;;  %v1174_v29 = vld [vmem:[#allocation2 + $0x8c] sm:$0x1] }
 0x144   : > { %10008 = vst [vmem:[#allocation14_spill] sm:$0xff] %v8396_v45  ;;  %v953_v4 = vshrl.u32 %v6684_v40, 16  ;;  %v956_v48 = vshll.u32 %v6684_v40, 16  ;;  %v1819_v1 = vrot.slane %v1817_v41, 1  ;;  %7211 = vmatmul.mubr.bf16.gmra.mrb[12].mxu1 %v8396_v45  ;;  %v947_v43 = vrot.slane %v945_v52, 7 }
 0x145   : > { %v967_v59 = vor.u32 %v965_v5, %v964_v46  ;;  %v968_v3 = vrot.slane %v964_v46, 4  ;;  %v972_v9 = vrot.slane %v970_v57, 7  ;;  %v1821_v14 = vshrl.u32 %v8343_v47, 16  ;;  %v8417_v41 = vld [vmem:[#allocation2 + $0x4c] sm:$0xf] }
 0x146   : > { %v955_v63 = vrot.slane %v953_v4, 7  ;;  %v8406_v28 = vsel %vm1768_vm8, %v1815_v61, %v1819_v1  ;;  %v1825_v18 = vshll.u32 %v8396_v45, 16  ;;  %v950_v30 = vor.u32 %v948_v51, %v947_v43  ;;  %v8415_v61 = vld [vmem:[#allocation2 + $0x48] sm:$0xf]  ;;  %7385 = vmatpush3.bf16.msra.mxu0 %v7861_v37  ;;  %v8427_v57 = vld [vmem:[#allocation2 + $0x54] sm:$0xf] }
 0x147   : > { %10009 = vst [vmem:[#allocation15_spill] sm:$0xff] %v8406_v28  ;;  %v1178_v22 = vsel %vm8119_vm5, %v967_v59, %v1177_v49  ;;  %v951_v13 = vrot.slane %v947_v43, 4  ;;  %v975_v31 = vor.u32 %v973_v58, %v972_v9  ;;  %7271 = vmatmul.mubr.bf16.gmra.mrb[40].mxu0 %v8406_v28  ;;  %v977_v5 = vrot.slane %v972_v9, 4  ;;  %7386 = vmatprep.subr.bf16.mxu0 %v7863_v39  ;;  %v7866_v58 = vld [vmem:[%s9909_s3 + $0xf8] sm:$0xff]   ;;  %v8450_v9 = vld [vmem:[#allocation2 + $0x50] sm:$0xf] }
 0x148   : > { %1179 = vst [vmem:[#allocation2 + $0x90] sm:$0xf] %v1178_v22  ;;  %v958_v42 = vor.u32 %v956_v48, %v955_v63  ;;  %v960_v38 = vrot.slane %v955_v63, 4  ;;  %v1823_v40 = vor.u32 %v1821_v14, %v1819_v1  ;;  %v1171_v46 = vsel %vm8119_vm5, %v950_v30, %v1170_v36 }
 0x149   : > { %v976_v49 = vsel %vm8126_vm6, %v968_v3, %v975_v31  ;;  %v1827_v52 = vrot.slane %v1825_v18, 1  ;;  %v8425_v51 = vcombine.low %v8400_v12, %v8410_v16  ;;  %1172 = vst [vmem:[#allocation2 + $0x84] sm:$0xf] %v1171_v46  ;;  %v1182_v37 = vsel %vm8132_vm7, %v977_v5, %v1181_v21  ;;  %v8472_v46 = vld [vmem:[#allocation2 + $0x58] sm:$0xf] }
 0x14a   : > { %1180 = vst [vmem:[#allocation2 + $0x94] sm:$0xf] %v976_v49  ;;  %v959_v36 = vsel %vm8126_vm6, %v951_v13, %v958_v42  ;;  %v1175_v4 = vsel %vm8132_vm7, %v960_v38, %v1174_v29  ;;  %v1829_v48 = vshrl.u32 %v8396_v45, 16  ;;  %1183 = vst [vmem:[#allocation2 + $0x98] sm:$0x1] %v1182_v37  ;;  %v621_v3 = vadd.f32 %v8289_v34, %v8106_v44 }
 0x14b   : > { %10010 = vst [vmem:[#allocation16_spill] sm:$0xff] %v8425_v51  ;;  %1173 = vst [vmem:[#allocation2 + $0x88] sm:$0xf] %v959_v36  ;;  %v8440_v1 = vsel %vm1768_vm8, %v1823_v40, %v1827_v52  ;;  %7214 = vmatprep.mubr.bf16.mxu1 %v8425_v51  ;;  %v1833_v59 = vshll.u32 %v8425_v51, 16  ;;  %v8448_v43 = vcombine.low %v8415_v61, %v8417_v41  ;;  %v1837_v14 = vshrl.u32 %v8425_v51, 16 }
 0x14c   : > { %1176 = vst [vmem:[#allocation2 + $0x8c] sm:$0x1] %v1175_v4  ;;  %10011 = vst [vmem:[#allocation17_spill] sm:$0xff] %v8440_v1  ;;  %7274 = vmatprep.mubr.bf16.mxu0 %v8440_v1  ;;  %v1831_v63 = vor.u32 %v1829_v48, %v1827_v52  ;;  %v613_v18 = vadd.f32 %v8106_v44, %v8291_v53  ;;  %v8458_v22 = vcombine.low %v8450_v9, %v8427_v57  ;;  %v8475_v36 = vld [vmem:[#allocation2 + $0x5c] sm:$0xf] }
 0x14d   : > { %7387 = vmatpush3.bf16.msra.mxu0 %v7863_v39  ;;  %v1835_v34 = vrot.slane %v1833_v59, 1  ;;  %v669_v30 = vmax.f32 %v621_v3, 0.0  ;;  %7215 = vmatmul.mubr.bf16.gmra.mrb[16].mxu1 %v8448_v43  ;;  %v1841_v13 = vshll.u32 %v8448_v43, 16  ;;  %v624_v31 = vadd.f32 %v8296_v2, %v8106_v44  ;;  %v1191_v59 = vld [vmem:[#allocation2 + $0xa8] sm:$0xf] }
 0x14e   : > { %10012 = vst [vmem:[#allocation18_spill] sm:$0xff] %v8458_v22  ;;  %7388 = vmatprep.subr.bf16.mxu0 %v7866_v58  ;;  %v667_v21 = vmax.f32 %v613_v18, 0.0  ;;  %7218 = vmatprep.mubr.bf16.mxu1 %v8458_v22  ;;  %v616_v53 = vadd.f32 %v8106_v44, %v8307_v11  ;;  %v1845_v29 = vshrl.u32 %v8448_v43, 16  ;;  %v1849_v39 = vshll.u32 %v8458_v22, 16 }
 0x14f   : > { %v8470_v5 = vsel %vm1768_vm8, %v1831_v63, %v1835_v34  ;;  %v6689_v42 = vpack.c.bf16 %v669_v30, %v669_v30  ;;  %v1839_v38 = vor.u32 %v1837_v14, %v1835_v34  ;;  %v1843_v40 = vrot.slane %v1841_v13, 1 }
 0x150   : > { %10013 = vst [vmem:[#allocation19_spill] sm:$0xff] %v8470_v5  ;;  %7275 = vmatmul.mubr.bf16.gmra.mrb[44].mxu0 %v8470_v5  ;;  %v6687_v2 = vpack.c.bf16 %v667_v21, %v667_v21  ;;  %v670_v49 = vmax.f32 %v624_v31, 0.0  ;;  %v668_v52 = vmax.f32 %v616_v53, 0.0  ;;  %v1851_v37 = vrot.slane %v1849_v39, 1  ;;  %v8489_v21 = vld [vmem:[#allocation2 + $0x60] sm:$0xf] }
 0x151   : > { %v996_v44 = vshrl.u32 %v6689_v42, 16  ;;  %v999_v11 = vshll.u32 %v6689_v42, 16  ;;  %v8478_v4 = vsel %vm1768_vm8, %v1839_v38, %v1843_v40  ;;  %v1847_v48 = vor.u32 %v1845_v29, %v1843_v40  ;;  %7389 = vmatpush3.bf16.msra.mxu0 %v7866_v58  ;;  %v8494_v58 = vld [vmem:[%s9909_s3 + $0x140] sm:$0xff]  }
 0x152   : > { %10014 = vst [vmem:[#allocation20_spill] sm:$0xff] %v8478_v4  ;;  %7278 = vmatprep.mubr.bf16.mxu0 %v8478_v4  ;;  %v979_v3 = vshrl.u32 %v6687_v2, 16  ;;  %v982_v63 = vshll.u32 %v6687_v2, 16  ;;  %v6690_v14 = vpack.c.bf16 %v670_v49, %v670_v49  ;;  %v6688_v18 = vpack.c.bf16 %v668_v52, %v668_v52  ;;  %10017 = vst [vmem:[#allocation23_spill] sm:$0xff] %v8494_v58  ;;  %v8496_v38 = vld [vmem:[#allocation2 + $0x64] sm:$0xf] }
 0x153   : > { %v998_v34 = vrot.slane %v996_v44, 7  ;;  %v8482_v30 = vsel %vm1768_vm8, %v1847_v48, %v1851_v37  ;;  %v8486_v13 = vcombine.low %v8472_v46, %v8475_v36  ;;  %v1853_v31 = vshrl.u32 %v8458_v22, 16  ;;  %v1184_v49 = vld [vmem:[#allocation2 + $0x9c] sm:$0xf]  ;;  %7502 = vmatprep.subr.bf16.mxu0 %v8494_v58 }
 0x154   : > { %10015 = vst [vmem:[#allocation21_spill] sm:$0xff] %v8482_v30  ;;  %v981_v53 = vrot.slane %v979_v3, 7  ;;  %v1004_v29 = vshrl.u32 %v6690_v14, 16  ;;  %v1007_v39 = vshll.u32 %v6690_v14, 16  ;;  %v987_v42 = vshrl.u32 %v6688_v18, 16 }
 0x155   : > { %10016 = vst [vmem:[#allocation22_spill] sm:$0xff] %v8486_v13  ;;  %v1001_v40 = vor.u32 %v999_v11, %v998_v34  ;;  %v1002_v2 = vrot.slane %v998_v34, 4  ;;  %v990_v52 = vshll.u32 %v6688_v18, 16  ;;  %7219 = vmatmul.mubr.bf16.gmra.mrb[20].mxu1 %v8486_v13  ;;  %v1855_v44 = vor.u32 %v1853_v31, %v1851_v37  ;;  %v1195_v14 = vld [vmem:[#allocation2 + $0xb0] sm:$0x1] }
 0x156   : > { %v984_v48 = vor.u32 %v982_v63, %v981_v53  ;;  %v985_v4 = vrot.slane %v981_v53, 4  ;;  %v1006_v5 = vrot.slane %v1004_v29, 7  ;;  %v989_v1 = vrot.slane %v987_v42, 7  ;;  %v7933_v37 = vld [vmem:[%s9908_s2] ss:$0 sm:$0xff] }
 0x157   : > { %v1192_v3 = vsel %vm8119_vm5, %v1001_v40, %v1191_v59  ;;  %v1857_v28 = vshll.u32 %v8486_v13, 16  ;;  %v8505_v11 = vcombine.low %v8489_v21, %v8496_v38  ;;  %v637_v18 = vadd.f32 %v7933_v37, %v8347_v56  ;;  %v1188_v53 = vld [vmem:[#allocation2 + $0xa4] sm:$0x1] }
 0x158   : > { %1193 = vst [vmem:[#allocation2 + $0xa8] sm:$0xf] %v1192_v3  ;;  %v1185_v63 = vsel %vm8119_vm5, %v984_v48, %v1184_v49  ;;  %v1009_v34 = vor.u32 %v1007_v39, %v1006_v5  ;;  %v1011_v31 = vrot.slane %v1006_v5, 4  ;;  %v992_v59 = vor.u32 %v990_v52, %v989_v1  ;;  %7279 = vmatmul.mubr.bf16.gmra.mrb[48].mxu0 %v8482_v30  ;;  %v8523_v52 = vld [vmem:[#allocation2 + $0x6c] sm:$0xf] }
 0x159   : > { %10018 = vst [vmem:[#allocation24_spill] sm:$0xff] %v8505_v11  ;;  %1186 = vst [vmem:[#allocation2 + $0x9c] sm:$0xf] %v1185_v63  ;;  %v994_v29 = vrot.slane %v989_v1, 4  ;;  %v1859_v42 = vrot.slane %v1857_v28, 1  ;;  %7222 = vmatprep.mubr.bf16.mxu1 %v8505_v11  ;;  %v673_v40 = vmax.f32 %v637_v18, 0.0  ;;  %v629_v62 = vadd.f32 %v7933_v37, %v8350_v0 }
 0x15a   : > { %v1010_v56 = vsel %vm8126_vm6, %v1002_v2, %v1009_v34  ;;  %v1196_v49 = vsel %vm8132_vm7, %v1011_v31, %v1195_v14  ;;  %v993_v5 = vsel %vm8126_vm6, %v985_v4, %v992_v59  ;;  %v640_v39 = vadd.f32 %v7933_v37, %v8362_v33  ;;  %v8534_v14 = vld [vmem:[#allocation2 + $0x68] sm:$0xf] }
 0x15b   : > { %1194 = vst [vmem:[#allocation2 + $0xac] sm:$0xf] %v1010_v56  ;;  %1197 = vst [vmem:[#allocation2 + $0xb0] sm:$0x1] %v1196_v49  ;;  %v1189_v28 = vsel %vm8132_vm7, %v994_v29, %v1188_v53  ;;  %v8528_v0 = vsel %vm1768_vm8, %v1855_v44, %v1859_v42  ;;  %v6693_v1 = vpack.c.bf16 %v673_v40, %v673_v40  ;;  %v671_v2 = vmax.f32 %v629_v62, 0.0 }
 0x15c   : > { %1187 = vst [vmem:[#allocation2 + $0xa0] sm:$0xf] %v993_v5  ;;  %10019 = vst [vmem:[#allocation25_spill] sm:$0xff] %v8528_v0  ;;  %7282 = vmatprep.mubr.bf16.mxu0 %v8528_v0  ;;  %v674_v48 = vmax.f32 %v640_v39, 0.0  ;;  %v632_v4 = vadd.f32 %v7933_v37, %v8368_v19  ;;  %v1861_v33 = vshrl.u32 %v8486_v13, 16  ;;  %v1865_v3 = vshll.u32 %v8505_v11, 16 }
 0x15d   : > { %1190 = vst [vmem:[#allocation2 + $0xa4] sm:$0x1] %v1189_v28  ;;  %v1030_v18 = vshrl.u32 %v6693_v1, 16  ;;  %v1033_v63 = vshll.u32 %v6693_v1, 16  ;;  %v6691_v34 = vpack.c.bf16 %v671_v2, %v671_v2  ;;  %v8538_v44 = vcombine.low %v8534_v14, %v8523_v52  ;;  %v1205_v40 = vld [vmem:[#allocation2 + $0xc0] sm:$0xf] }
 0x15e   : > { %v6694_v62 = vpack.c.bf16 %v674_v48, %v674_v48  ;;  %v672_v31 = vmax.f32 %v632_v4, 0.0  ;;  %v1863_v59 = vor.u32 %v1861_v33, %v1859_v42  ;;  %v1867_v53 = vrot.slane %v1865_v3, 1  ;;  %v1198_v49 = vld [vmem:[#allocation2 + $0xb4] sm:$0xf]  ;;  %v8548_v3 = vld [vmem:[#allocation2 + $0x78] sm:$0xf] }
 0x15f   : > { %10020 = vst [vmem:[#allocation26_spill] sm:$0xff] %v8538_v44  ;;  %v1032_v29 = vrot.slane %v1030_v18, 7  ;;  %v1013_v19 = vshrl.u32 %v6691_v34, 16  ;;  %v1016_v37 = vshll.u32 %v6691_v34, 16  ;;  %7223 = vmatmul.mubr.bf16.gmra.mrb[24].mxu1 %v8538_v44  ;;  %v1869_v56 = vshrl.u32 %v8505_v11, 16 }
 0x160   : > { %v1038_v5 = vshrl.u32 %v6694_v62, 16  ;;  %v1041_v39 = vshll.u32 %v6694_v62, 16  ;;  %v6692_v28 = vpack.c.bf16 %v672_v31, %v672_v31  ;;  %v8543_v1 = vsel %vm1768_vm8, %v1863_v59, %v1867_v53  ;;  %v8545_v2 = vld [vmem:[#allocation2 + $0x74] sm:$0xf]  ;;  %v8550_v18 = vld [vmem:[#allocation2 + $0x7c] sm:$0xf] }
 0x161   : > { %10021 = vst [vmem:[#allocation27_spill] sm:$0xff] %v8543_v1  ;;  %v1035_v48 = vor.u32 %v1033_v63, %v1032_v29  ;;  %v1036_v42 = vrot.slane %v1032_v29, 4  ;;  %v1015_v4 = vrot.slane %v1013_v19, 7  ;;  %7283 = vmatmul.mubr.bf16.gmra.mrb[52].mxu0 %v8543_v1  ;;  %v1871_v33 = vor.u32 %v1869_v56, %v1867_v53  ;;  %v8553_v31 = vld [vmem:[#allocation2 + $0x70] sm:$0xf] }
 0x162   : > { %v1040_v34 = vrot.slane %v1038_v5, 7  ;;  %v1021_v0 = vshrl.u32 %v6692_v28, 16  ;;  %v1024_v30 = vshll.u32 %v6692_v28, 16  ;;  %v1873_v62 = vshll.u32 %v8538_v44, 16  ;;  %v1209_v19 = vld [vmem:[#allocation2 + $0xc8] sm:$0x1] }
 0x163   : > { %v1206_v59 = vsel %vm8119_vm5, %v1035_v48, %v1205_v40  ;;  %v1018_v63 = vor.u32 %v1016_v37, %v1015_v4  ;;  %v1019_v29 = vrot.slane %v1015_v4, 4  ;;  %v8559_v53 = vcombine.low %v8553_v31, %v8545_v2  ;;  %v1202_v11 = vld [vmem:[#allocation2 + $0xbc] sm:$0x1]  ;;  %v8570_v4 = vld [vmem:[#allocation2 + $0x84] sm:$0xf] }
 0x164   : > { %1207 = vst [vmem:[#allocation2 + $0xc0] sm:$0xf] %v1206_v59  ;;  %v1043_v56 = vor.u32 %v1041_v39, %v1040_v34  ;;  %v1045_v1 = vrot.slane %v1040_v34, 4  ;;  %v1023_v5 = vrot.slane %v1021_v0, 7  ;;  %v1875_v50 = vrot.slane %v1873_v62, 1 }
 0x165   : > { %10022 = vst [vmem:[#allocation28_spill] sm:$0xff] %v8559_v53  ;;  %v1199_v28 = vsel %vm8119_vm5, %v1018_v63, %v1198_v49  ;;  %7226 = vmatprep.mubr.bf16.mxu1 %v8559_v53  ;;  %v1877_v40 = vshrl.u32 %v8538_v44, 16  ;;  %v1881_v37 = vshll.u32 %v8559_v53, 16  ;;  %v8568_v48 = vcombine.low %v8548_v3, %v8550_v18  ;;  %v8576_v34 = vld [vmem:[#allocation2 + $0x80] sm:$0xf] }
 0x166   : > { %1200 = vst [vmem:[#allocation2 + $0xb4] sm:$0xf] %v1199_v28  ;;  %v1044_v0 = vsel %vm8126_vm6, %v1036_v42, %v1043_v56  ;;  %v1210_v10 = vsel %vm8132_vm7, %v1045_v1, %v1209_v19  ;;  %v1026_v49 = vor.u32 %v1024_v30, %v1023_v5  ;;  %v1028_v39 = vrot.slane %v1023_v5, 4  ;;  %v8578_v62 = vld [vmem:[#allocation2 + $0x8c] sm:$0xf] }
 0x167   : > { %10023 = vst [vmem:[#allocation29_spill] sm:$0xff] %v8568_v48  ;;  %1208 = vst [vmem:[#allocation2 + $0xc4] sm:$0xf] %v1044_v0  ;;  %v8581_v59 = vsel %vm1768_vm8, %v1871_v33, %v1875_v50  ;;  %v1879_v63 = vor.u32 %v1877_v40, %v1875_v50  ;;  %v1883_v44 = vrot.slane %v1881_v37, 1  ;;  %7227 = vmatmul.mubr.bf16.gmra.mrb[28].mxu1 %v8568_v48  ;;  %v1885_v42 = vshrl.u32 %v8559_v53, 16 }
 0x168   : > { %1211 = vst [vmem:[#allocation2 + $0xc8] sm:$0x1] %v1210_v10  ;;  %10024 = vst [vmem:[#allocation30_spill] sm:$0xff] %v8581_v59  ;;  %v8585_v56 = vld [vmem:[#allocation2 + $0x90] sm:$0xf]  ;;  %v1027_v30 = vsel %vm8126_vm6, %v1019_v29, %v1026_v49  ;;  %v1203_v19 = vsel %vm8132_vm7, %v1028_v39, %v1202_v11  ;;  %7286 = vmatprep.mubr.bf16.mxu0 %v8581_v59  ;;  %v1889_v33 = vshll.u32 %v8568_v48, 16 }
 0x169   : > { %v8587_v1 = vld [vmem:[#allocation2 + $0x94] sm:$0xf]  ;;  %v8597_v50 = vcombine.low %v8576_v34, %v8570_v4  ;;  %v8599_v5 = vld [vmem:[#allocation2 + $0x88] sm:$0xf]  ;;  %1201 = vst [vmem:[#allocation2 + $0xb8] sm:$0xf] %v1027_v30  ;;  %v8602_v28 = vsel %vm1768_vm8, %v1879_v63, %v1883_v44  ;;  %v1887_v20 = vor.u32 %v1885_v42, %v1883_v44 }
 0x16a   : > { %1204 = vst [vmem:[#allocation2 + $0xbc] sm:$0x1] %v1203_v19  ;;  %10026 = vst [vmem:[#allocation32_spill] sm:$0xff] %v8602_v28  ;;  %v1893_v29 = vshrl.u32 %v8568_v48, 16  ;;  %v8607_v26 = vcombine.low %v8599_v5, %v8578_v62  ;;  %7287 = vmatmul.mubr.bf16.gmra.mrb[56].mxu0 %v8602_v28  ;;  %v1891_v11 = vrot.slane %v1889_v33, 1  ;;  %v8615_v0 = vcombine.low %v8585_v56, %v8587_v1 }
 0x16b   : > { %10025 = vst [vmem:[#allocation31_spill] sm:$0xff] %v8597_v50  ;;  %7230 = vmatprep.mubr.bf16.mxu1 %v8597_v50  ;;  %v1897_v40 = vshll.u32 %v8597_v50, 16  ;;  %v1901_v37 = vshrl.u32 %v8597_v50, 16  ;;  %v8617_v44 = vld [vmem:[#allocation2 + $0x9c] sm:$0xf] }
 0x16c   : > { %10027 = vst [vmem:[#allocation33_spill] sm:$0xff] %v8607_v26  ;;  %10028 = vst [vmem:[#allocation34_spill] sm:$0xff] %v8615_v0  ;;  %v1905_v10 = vshll.u32 %v8607_v26, 16  ;;  %v8621_v49 = vsel %vm1768_vm8, %v1887_v20, %v1891_v11  ;;  %v8623_v63 = vld [vmem:[#allocation2 + $0x98] sm:$0xf]  ;;  %v1895_v42 = vor.u32 %v1893_v29, %v1891_v11  ;;  %v1913_v20 = vshll.u32 %v8615_v0, 16 }
 0x16d   : > { %10029 = vst [vmem:[#allocation35_spill] sm:$0xff] %v8621_v49  ;;  %v1899_v39 = vrot.slane %v1897_v40, 1  ;;  %7290 = vmatprep.mubr.bf16.mxu0 %v8621_v49  ;;  %v8628_v30 = vcombine.low %v8623_v63, %v8617_v44  ;;  %v8630_v19 = vld [vmem:[#allocation2 + $0xa4] sm:$0xf]  ;;  %v8632_v33 = vld [vmem:[#allocation2 + $0xa8] sm:$0xf] }
 0x16e   : > { %10031 = vst [vmem:[#allocation37_spill] sm:$0xff] %v8630_v19  ;;  %v8634_v28 = vld [vmem:[#allocation2 + $0xac] sm:$0xf]  ;;  %v1907_v50 = vrot.slane %v1905_v10, 1  ;;  %v8637_v40 = vld [vmem:[#allocation2 + $0xb4] sm:$0xf] }
 0x16f   : > { %10030 = vst [vmem:[#allocation36_spill] sm:$0xff] %v8628_v30  ;;  %10032 = vst [vmem:[#allocation38_spill] sm:$0xff] %v8634_v28  ;;  %v1903_v59 = vor.u32 %v1901_v37, %v1899_v39  ;;  %7231 = vmatmul.mubr.bf16.gmra.mrb[32].mxu1 %v8607_v26  ;;  %v8640_v49 = vld [vmem:[#allocation2 + $0xa0] sm:$0xf]  ;;  %v1909_v29 = vshrl.u32 %v8607_v26, 16  ;;  %v8650_v37 = vcombine.low %v8632_v33, %v8634_v28  ;;  %v1921_v53 = vshll.u32 %v8628_v30, 16 }
 0x170   : > { %10033 = vst [vmem:[#allocation39_spill] sm:$0xff] %v8637_v40  ;;  %7234 = vmatprep.mubr.bf16.mxu1 %v8615_v0  ;;  %v8646_v11 = vcombine.low %v8640_v49, %v8630_v19  ;;  %v8652_v10 = vld [vmem:[#allocation2 + $0xb0] sm:$0xf]  ;;  %v8655_v48 = vsel %vm1768_vm8, %v1895_v42, %v1899_v39  ;;  %v1915_v8 = vrot.slane %v1913_v20, 1  ;;  %v1917_v60 = vshrl.u32 %v8615_v0, 16 }
 0x171   : > { %10034 = vst [vmem:[#allocation40_spill] sm:$0xff] %v8652_v10  ;;  %10035 = vst [vmem:[#allocation41_spill] sm:$0xff] %v8655_v48  ;;  %v8660_v58 = vcombine.low %v8652_v10, %v8637_v40  ;;  %v8664_v26 = vsel %vm1768_vm8, %v1903_v59, %v1907_v50  ;;  %v8667_v13 = vld [vmem:[#allocation2 + $0xbc] sm:$0xf]  ;;  %v1911_v39 = vor.u32 %v1909_v29, %v1907_v50  ;;  %v1937_v22 = vshll.u32 %v8650_v37, 16 }
 0x172   : > { %7291 = vmatmul.mubr.bf16.gmra.mrb[60].mxu0 %v8655_v48  ;;  %10036 = vst [vmem:[#allocation42_spill] sm:$0xff] %v8664_v26  ;;  %10037 = vst [vmem:[#allocation43_spill] sm:$0xff] %v8667_v13  ;;  %v1929_v42 = vshll.u32 %v8646_v11, 16  ;;  %v8672_v28 = vld [vmem:[#allocation2 + $0xb8] sm:$0xf]  ;;  %v1923_v40 = vrot.slane %v1921_v53, 1  ;;  %v1919_v0 = vor.u32 %v1917_v60, %v1915_v8 }
 0x173   : > { %7294 = vmatprep.mubr.bf16.mxu0 %v8664_v26  ;;  %v1925_v48 = vshrl.u32 %v8628_v30, 16  ;;  %v1945_v59 = vshll.u32 %v8660_v58, 16  ;;  %v8678_v20 = vcombine.low %v8672_v28, %v8667_v13  ;;  %v1933_v50 = vshrl.u32 %v8646_v11, 16  ;;  %v8689_v60 = vld [vmem:[#allocation2 + $0xc0] sm:$0xf] }
 0x174   : > { %v8683_v29 = vsel %vm1768_vm8, %v1911_v39, %v1915_v8  ;;  %v1931_v26 = vrot.slane %v1929_v42, 1  ;;  %v1939_v53 = vrot.slane %v1937_v22, 1  ;;  %v1941_v10 = vshrl.u32 %v8650_v37, 16  ;;  %v7934_v8 = vld [vmem:[#allocation2] sm:$0xff]  }
 0x175   : > { %10038 = vst [vmem:[#allocation44_spill] sm:$0xff] %v8683_v29  ;;  %v1927_v55 = vor.u32 %v1925_v48, %v1923_v40  ;;  %v1947_v32 = vrot.slane %v1945_v59, 1  ;;  %v1949_v19 = vshrl.u32 %v8660_v58, 16  ;;  %v1953_v13 = vshll.u32 %v8678_v20, 16 }
 0x176   : > { %v2424_v39 = vrot.slane %v7934_v8, 1  ;;  %v8697_v22 = vcombine.low %v8689_v60, %v8689_v60  ;;  %v1935_v48 = vor.u32 %v1933_v50, %v1931_v26  ;;  %v2425_v42 = vrot.slane %v8192_v7, 1 }
 0x177   : > { %7235 = vmatmul.mubr.bf16.gmra.mrb[36].mxu1 %v8628_v30  ;;  %v8693_v30 = vsel %vm1768_vm8, %v1919_v0, %v1923_v40  ;;  %v8703_v59 = vcombine.low %v8327_v35, %v8391_v24  ;;  %v1943_v0 = vor.u32 %v1941_v10, %v1939_v53  ;;  %v2427_v40 = vrot.slane %v8202_v25, 1 }
 0x178   : > { %7238 = vmatprep.mubr.bf16.mxu1 %v8646_v11  ;;  %10039 = vst [vmem:[#allocation45_spill] sm:$0xff] %v8693_v30  ;;  %v8712_v8 = vcombine.low %v8410_v16, %v8415_v61  ;;  %v8715_v50 = vsel %vm1768_vm8, %v1927_v55, %v1931_v26  ;;  %v1951_v7 = vor.u32 %v1949_v19, %v1947_v32  ;;  %v1961_v24 = vshll.u32 %v8697_v22, 16  ;;  %v7935_v61 = vld [vmem:[#allocation2 + $0xc] sm:$0xf] }
 0x179   : > { %10040 = vst [vmem:[#allocation46_spill] sm:$0xff] %v8715_v50  ;;  %v8719_v35 = vcombine.low %v8417_v41, %v8450_v9  ;;  %v8725_v25 = vcombine.low %v8427_v57, %v8472_v46  ;;  %v8733_v55 = vsel %vm1768_vm8, %v1935_v48, %v1939_v53  ;;  %v2426_v16 = vsel %vm2423_vm9, %v2424_v39, %v2425_v42  ;;  %v7936_v41 = vld [vmem:[#allocation2 + $0x10] sm:$0xf]  ;;  %v7937_v53 = vld [vmem:[#allocation2 + $0x1c] sm:$0xf] }
 0x17a   : > { %7295 = vmatmul.mubr.bf16.gmra.mrb[64].mxu0 %v8683_v29  ;;  %v8707_v29 = vcombine.low %v8378_v23, %v8400_v12  ;;  %v1957_v23 = vshrl.u32 %v8678_v20, 16  ;;  %v8729_v12 = vcombine.low %v8475_v36, %v8489_v21  ;;  %10041 = vst [vmem:[#allocation47_spill] sm:$0xff] %v8733_v55  ;;  %v8736_v9 = vcombine.low %v7935_v61, %v7936_v41  ;;  %v7938_v48 = vld [vmem:[#allocation2 + $0x24] sm:$0xf]  ;;  %v10054_v61 = vld [vmem:[#allocation39_spill] sm:$0xff] }
 0x17b   : > { %7298 = vmatprep.mubr.bf16.mxu0 %v8693_v30  ;;  %v1955_v30 = vrot.slane %v1953_v13, 1  ;;  %v8740_v13 = vcombine.low %v8496_v38, %v8534_v14  ;;  %v8744_v57 = vsel %vm1768_vm8, %v1943_v0, %v1947_v32  ;;  %v8747_v46 = vsel %vm2423_vm9, %v2425_v42, %v2427_v40 }
 0x17c   : > { %10042 = vst [vmem:[#allocation48_spill] sm:$0xff] %v8744_v57  ;;  %v2429_v36 = vrot.slane %v8204_v27, 1  ;;  %v8752_v21 = vcombine.low %v8523_v52, %v8553_v31  ;;  %v2431_v38 = vrot.slane %v8256_v17, 1  ;;  %v8760_v14 = vcombine.low %v8545_v2, %v8548_v3 }
 0x17d   : > { %v8755_v26 = vsel %vm1768_vm8, %v1951_v7, %v1955_v30  ;;  %v8764_v32 = vcombine.low %v8550_v18, %v8576_v34  ;;  %v8767_v19 = vor.u32 %v1957_v23, %v1955_v30  ;;  %v1963_v10 = vrot.slane %v1961_v24, 1  ;;  %v10050_v7 = vld [vmem:[#allocation40_spill] sm:$0xff]  ;;  %v10051_v23 = vld [vmem:[#allocation38_spill] sm:$0xff] }
 0x17e   : > { %10043 = vst [vmem:[#allocation49_spill] sm:$0xff] %v8755_v26  ;;  %v2433_v52 = vrot.slane %v8312_v15, 1  ;;  %v8772_v31 = vcombine.low %v8570_v4, %v8599_v5  ;;  %v8776_v2 = vcombine.low %v7937_v53, %v8244_v6  ;;  %v2435_v3 = vrot.slane %v8343_v47, 1  ;;  %v10057_v53 = vld [vmem:[#allocation18_spill] sm:$0xff]  ;;  %v10061_v15 = vld [vmem:[#allocation12_spill] sm:$0xff] }
 0x17f   : > { %7239 = vmatmul.mubr.bf16.gmra.mrb[40].mxu1 %v8650_v37  ;;  %10044 = vst [vmem:[#allocation50_spill] sm:$0xff] %v8767_v19  ;;  %v2437_v18 = vrot.slane %v8396_v45, 1  ;;  %v8782_v34 = vcombine.low %v8578_v62, %v8585_v56  ;;  %v2430_v30 = vsel %vm2423_vm9, %v2427_v40, %v2429_v36  ;;  %v2439_v39 = vrot.slane %v8425_v51, 1  ;;  %v10046_v56 = vld [vmem:[#allocation37_spill] sm:$0xff] }
 0x180   : > { %7242 = vmatprep.mubr.bf16.mxu1 %v8660_v58  ;;  %v8788_v4 = vcombine.low %v8587_v1, %v8623_v63  ;;  %v8792_v6 = vcombine.low %v8617_v44, %v8640_v49  ;;  %v8795_v5 = vsel %vm2423_vm9, %v2429_v36, %v2431_v38  ;;  %v8798_v42 = vcombine.low %v7938_v48, %v8285_v54  ;;  %v10048_v44 = vld [vmem:[#allocation9_spill] sm:$0xff]  ;;  %v10049_v49 = vld [vmem:[#allocation7_spill] sm:$0xff] }
 0x181   : > { %10045 = vst [vmem:[#allocation51_spill] sm:$0xff] %v8795_v5  ;;  %v9958_v62 = vrot.slane %v8448_v43, 1  ;;  %v8803_v0 = vcombine.low %v10046_v56, %v8632_v33  ;;  %v1964_v1 = vsel %vm1768_vm8, %v8767_v19, %v1963_v10  ;;  %v8808_v63 = vsel %vm2423_vm9, %v2431_v38, %v2433_v52  ;;  %v10055_v36 = vld [vmem:[#allocation43_spill] sm:$0xff]  ;;  %v10058_v56 = vld [vmem:[#allocation22_spill] sm:$0xff] }
 0x182   : > { %7299 = vmatmul.mubr.bf16.gmra.mrb[68].mxu0 %v8715_v50  ;;  %10047 = vst [vmem:[#allocation37_spill] sm:$0xff] %v8808_v63  ;;  %v8812_v40 = vcombine.low %v10049_v49, %v10048_v44  ;;  %v8816_v54 = vcombine.low %v10051_v23, %v10050_v7  ;;  %v8820_v24 = vsel %vm2423_vm9, %v2433_v52, %v2435_v3  ;;  %v3423_v44 = vshll.u32 %v8736_v9, 16  ;;  %v10060_v49 = vld [vmem:[#allocation5_spill] sm:$0xff] }
 0x183   : > { %7302 = vmatprep.mubr.bf16.mxu0 %v8733_v55  ;;  %10052 = vst [vmem:[#allocation9_spill] sm:$0xff] %v8820_v24  ;;  %v8823_v33 = vsel %vm2423_vm9, %v2435_v3, %v2437_v18  ;;  %v8827_v41 = vcombine.low %v10054_v61, %v8672_v28  ;;  %v8831_v38 = vcombine.low %v10055_v36, %v8689_v60  ;;  %v3421_v28 = vshrl.u32 %v8736_v9, 16  ;;  %v7868_v50 = vld [vmem:[%s9909_s3 + $0x108] sm:$0xff]  }
 0x184   : > { %10053 = vst [vmem:[#allocation7_spill] sm:$0xff] %v8823_v33  ;;  %v8834_v10 = vsel %vm2423_vm9, %v2437_v18, %v2439_v39  ;;  %v8842_v3 = vsel %vm2423_vm9, %v2439_v39, %v9958_v62  ;;  %v3428_v7 = vshll.u32 %v10060_v49, 16  ;;  %v3425_v18 = vrot.slane %v3423_v44, 1 }
 0x185   : > { %10056 = vst [vmem:[#allocation40_spill] sm:$0xff] %v8834_v10  ;;  %10059 = vst [vmem:[#allocation38_spill] sm:$0xff] %v8842_v3  ;;  %v3436_v23 = vshll.u32 %v8776_v2, 16  ;;  %v4074_v61 = vrot.slane %v8736_v9, 1  ;;  %v4075_v36 = vrot.slane %v10060_v49, 1  ;;  %v3440_v39 = vshrl.u32 %v8776_v2, 16 }
 0x186   : > { %v3430_v52 = vrot.slane %v3428_v7, 1  ;;  %v3444_v62 = vshll.u32 %v8798_v42, 16  ;;  %v4077_v48 = vrot.slane %v8776_v2, 1  ;;  %v3426_v19 = vor.u32 %v3425_v18, %v3421_v28 }
 0x187   : > { %7243 = vmatmul.mubr.bf16.gmra.mrb[44].mxu1 %v8678_v20  ;;  %v3438_v55 = vrot.slane %v3436_v23, 1  ;;  %v3448_v44 = vshrl.u32 %v8798_v42, 16  ;;  %v3452_v45 = vshll.u32 %v8812_v40, 16  ;;  %v4079_v18 = vrot.slane %v8798_v42, 1 }
 0x188   : > { %7326 = vmatprep.mubr.bf16.mxu1 %v2426_v16  ;;  %v3432_v16 = vshrl.u32 %v10060_v49, 16  ;;  %v8863_v7 = vsel %vm2423_vm9, %v4075_v36, %v4077_v48  ;;  %v8867_v47 = vsel %vm1768_vm8, %v3426_v19, %v3430_v52  ;;  %v3456_v23 = vshrl.u32 %v8812_v40, 16 }
 0x189   : > { %v3442_v28 = vor.u32 %v3440_v39, %v3438_v55  ;;  %v4081_v39 = vrot.slane %v8812_v40, 1  ;;  %v3484_v27 = vshll.u32 %v8719_v35, 16 }
 0x18a   : > { %7303 = vmatmul.mubr.bf16.gmra.mrb[72].mxu0 %v8744_v57  ;;  %v8856_v57 = vsel %vm2423_vm9, %v4074_v61, %v4075_v36  ;;  %v3434_v51 = vor.u32 %v3432_v16, %v3430_v52  ;;  %v3460_v36 = vshll.u32 %v8703_v59, 16  ;;  %v8881_v52 = vsel %vm2423_vm9, %v4077_v48, %v4079_v18 }
 0x18b   : > { %7306 = vmatprep.mubr.bf16.mxu0 %v8755_v26  ;;  %v3446_v26 = vrot.slane %v3444_v62, 1  ;;  %v3454_v62 = vrot.slane %v3452_v45, 1  ;;  %v7872_v45 = vld [vmem:[%s9909_s3 + $0x110] sm:$0xff]   ;;  %v4083_v48 = vrot.slane %v8703_v59, 1 }
 0x18c   : > { %v8873_v61 = vsel %vm1768_vm8, %v3434_v51, %v3438_v55  ;;  %v3462_v55 = vrot.slane %v3460_v36, 1  ;;  %v3480_v36 = vshrl.u32 %v8712_v8, 16 }
 0x18d   : > { %v3450_v16 = vor.u32 %v3448_v44, %v3446_v26  ;;  %v8878_v19 = vsel %vm1768_vm8, %v3442_v28, %v3446_v26  ;;  %v3468_v26 = vshll.u32 %v8707_v29, 16  ;;  %v3472_v44 = vshrl.u32 %v8707_v29, 16 }
 0x18e   : > { %v3476_v28 = vshll.u32 %v8712_v8, 16 }
 0x18f   : > { %7327 = vmatmul.mubr.bf16.vlgmr.msra.gmra.mrb[48].mxu1 %v8747_v46  ;;  %v3464_v46 = vshrl.u32 %v8703_v59, 16  ;;  %v8889_v51 = vsel %vm1768_vm8, %v3450_v16, %v3454_v62 }
 0x190   : > { %7439 = vmatpush3.bf16.msra.mxu1 %v10061_v15  ;;  %7330 = vmatprep.mubr.bf16.mxu1 %v2430_v30  ;;  %v3458_v15 = vor.u32 %v3456_v23, %v3454_v62  ;;  %v8893_v30 = vsel %vm2423_vm9, %v4079_v18, %v4081_v39  ;;  %v3470_v23 = vrot.slane %v3468_v26, 1  ;;  %v4085_v62 = vrot.slane %v8707_v29, 1 }
 0x191   : > { %7440 = vmatprep.subr.bf16.mxu1 %v7868_v50  ;;  %10062 = vst [vmem:[#allocation39_spill] sm:$0xff] %v8893_v30  ;;  %v3466_v16 = vor.u32 %v3464_v46, %v3462_v55  ;;  %v3478_v18 = vrot.slane %v3476_v28, 1  ;;  %v3486_v26 = vrot.slane %v3484_v27, 1  ;;  %v3488_v28 = vshrl.u32 %v8719_v35, 16  ;;  %v7891_v27 = vld [vmem:[%s9909_s3 + $0x148] sm:$0xff]  }
 0x192   : > { %7307 = vmatmul.mubr.bf16.gmra.mrb[76].mxu0 %v1964_v1  ;;  %v8900_v17 = vsel %vm1768_vm8, %v3458_v15, %v3462_v55  ;;  %v8904_v1 = vsel %vm2423_vm9, %v4081_v39, %v4083_v48  ;;  %v3474_v46 = vor.u32 %v3472_v44, %v3470_v23  ;;  %v8915_v55 = vsel %vm2423_vm9, %v4083_v48, %v4085_v62 }
 0x193   : > { %7390 = vmatprep.mubr.bf16.mxu0 %v8736_v9  ;;  %10063 = vst [vmem:[#allocation43_spill] sm:$0xff] %v8904_v1  ;;  %v7876_v9 = vld [vmem:[%s9909_s3 + $0x118] sm:$0xff]   ;;  %v8912_v15 = vsel %vm1768_vm8, %v3466_v16, %v3470_v23  ;;  %10064 = vst [vmem:[#allocation22_spill] sm:$0xff] %v8915_v55  ;;  %v3482_v39 = vor.u32 %v3480_v36, %v3478_v18  ;;  %v3492_v1 = vshll.u32 %v8725_v25, 16  ;;  %v4089_v44 = vrot.slane %v8719_v35, 1 }
 0x194   : > { %7441 = vmatpush3.bf16.msra.mxu1 %v7868_v50  ;;  %v4087_v50 = vrot.slane %v8712_v8, 1  ;;  %v8922_v30 = vsel %vm1768_vm8, %v3474_v46, %v3478_v18  ;;  %v3496_v48 = vshrl.u32 %v8725_v25, 16  ;;  %v3490_v36 = vor.u32 %v3488_v28, %v3486_v26  ;;  %v10069_v55 = vld [vmem:[#allocation23_spill] sm:$0xff] }
 0x195   : > { %7442 = vmatprep.subr.bf16.mxu1 %v7872_v45  ;;  %10065 = vst [vmem:[#allocation5_spill] sm:$0xff] %v8922_v30  ;;  %v8934_v23 = vsel %vm1768_vm8, %v3482_v39, %v3486_v26  ;;  %v3494_v18 = vrot.slane %v3492_v1, 1  ;;  %v3500_v46 = vshll.u32 %v8729_v12, 16  ;;  %v4093_v28 = vrot.slane %v8729_v12, 1 }
 0x196   : > { %v8925_v16 = vsel %vm2423_vm9, %v4085_v62, %v4087_v50  ;;  %10067 = vst [vmem:[#allocation52_spill] sm:$0xff] %v8934_v23  ;;  %v7880_v62 = vld [vmem:[%s9909_s3 + $0x120] sm:$0xff]   ;;  %v3512_v23 = vshrl.u32 %v8740_v13, 16  ;;  %v3516_v30 = vshll.u32 %v8752_v21, 16 }
 0x197   : > { %7331 = vmatmul.mubr.bf16.gmra.mrb[52].mxu1 %v8795_v5  ;;  %10066 = vst [vmem:[#allocation12_spill] sm:$0xff] %v8925_v16  ;;  %v8941_v5 = vsel %vm2423_vm9, %v4087_v50, %v4089_v44  ;;  %v3508_v16 = vshll.u32 %v8740_v13, 16  ;;  %v8948_v1 = vsel %vm1768_vm8, %v3490_v36, %v3494_v18  ;;  %v3498_v39 = vor.u32 %v3496_v48, %v3494_v18 }
 0x198   : > { %7334 = vmatprep.mubr.bf16.mxu1 %v8808_v63  ;;  %7443 = vmatpush3.bf16.msra.mxu1 %v7872_v45  ;;  %10068 = vst [vmem:[#allocation53_spill] sm:$0xff] %v8941_v5  ;;  %v4091_v45 = vrot.slane %v8725_v25, 1  ;;  %v3504_v63 = vshrl.u32 %v8729_v12, 16  ;;  %v3502_v26 = vrot.slane %v3500_v46, 1  ;;  %v3520_v18 = vshrl.u32 %v8752_v21, 16 }
 0x199   : > { %7444 = vmatprep.subr.bf16.mxu1 %v7876_v9  ;;  %v3510_v5 = vrot.slane %v3508_v16, 1  ;;  %v7893_v16 = vld [vmem:[%s9909_s3 + $0x150] sm:$0xff]  }
 0x19a   : > { %7391 = vmatmul.mubr.bf16.vlgmr.msra.gmra.mrb[80].mxu0 %v10060_v49  ;;  %v8954_v50 = vsel %vm2423_vm9, %v4089_v44, %v4091_v45  ;;  %v8959_v49 = vsel %vm1768_vm8, %v3498_v39, %v3502_v26  ;;  %v3506_v48 = vor.u32 %v3504_v63, %v3502_v26  ;;  %v8962_v36 = vsel %vm2423_vm9, %v4091_v45, %v4093_v28 }
 0x19b   : > { %7394 = vmatprep.mubr.bf16.mxu0 %v8776_v2  ;;  %7503 = vmatpush3.bf16.msra.mxu0 %v10069_v55  ;;  %10070 = vst [vmem:[#allocation23_spill] sm:$0xff] %v8954_v50  ;;  %10071 = vst [vmem:[#allocation54_spill] sm:$0xff] %v8962_v36  ;;  %v4095_v2 = vrot.slane %v8740_v13, 1  ;;  %v7884_v55 = vld [vmem:[%s9909_s3 + $0x128] sm:$0xff]   ;;  %v3518_v44 = vrot.slane %v3516_v30, 1  ;;  %v3524_v63 = vshll.u32 %v8760_v14, 16 }
 0x19c   : > { %7445 = vmatpush3.bf16.msra.mxu1 %v7876_v9  ;;  %7504 = vmatprep.subr.bf16.mxu0 %v7891_v27  ;;  %v3514_v9 = vor.u32 %v3512_v23, %v3510_v5  ;;  %v8974_v46 = vsel %vm1768_vm8, %v3506_v48, %v3510_v5  ;;  %v4097_v39 = vrot.slane %v8752_v21, 1  ;;  %v3528_v26 = vshrl.u32 %v8760_v14, 16  ;;  %v7896_v5 = vld [vmem:[%s9909_s3 + $0x158] sm:$0xff]  }
 0x19d   : > { %7446 = vmatprep.subr.bf16.mxu1 %v7880_v62  ;;  %v8977_v45 = vsel %vm2423_vm9, %v4093_v28, %v4095_v2  ;;  %v3522_v30 = vor.u32 %v3520_v18, %v3518_v44  ;;  %v3526_v36 = vrot.slane %v3524_v63, 1  ;;  %v3532_v50 = vshll.u32 %v8764_v32, 16 }
 0x19e   : > { %10072 = vst [vmem:[#allocation55_spill] sm:$0xff] %v8977_v45  ;;  %v8983_v23 = vsel %vm1768_vm8, %v3514_v9, %v3518_v44  ;;  %v8991_v28 = vsel %vm2423_vm9, %v4095_v2, %v4097_v39  ;;  %v4099_v48 = vrot.slane %v8760_v14, 1  ;;  %v3540_v9 = vshll.u32 %v8772_v31, 16  ;;  %v7889_v44 = vld [vmem:[%s9909_s3 + $0x130] sm:$0xff]  }
 0x19f   : > { %7335 = vmatmul.mubr.bf16.gmra.mrb[56].mxu1 %v8820_v24  ;;  %7505 = vmatpush3.bf16.msra.mxu0 %v7891_v27  ;;  %10073 = vst [vmem:[#allocation56_spill] sm:$0xff] %v8991_v28  ;;  %v3536_v27 = vshrl.u32 %v8764_v32, 16  ;;  %v3530_v18 = vor.u32 %v3528_v26, %v3526_v36  ;;  %v3534_v63 = vrot.slane %v3532_v50, 1  ;;  %v4101_v2 = vrot.slane %v8764_v32, 1 }
 0x1a0   : > { %7338 = vmatprep.mubr.bf16.mxu1 %v8823_v33  ;;  %7447 = vmatpush3.bf16.msra.mxu1 %v7880_v62  ;;  %v9000_v62 = vsel %vm1768_vm8, %v3522_v30, %v3526_v36  ;;  %v9005_v33 = vsel %vm2423_vm9, %v4097_v39, %v4099_v48  ;;  %v3542_v24 = vrot.slane %v3540_v9, 1  ;;  %v3544_v28 = vshrl.u32 %v8772_v31, 16 }
 0x1a1   : > { %7448 = vmatprep.subr.bf16.mxu1 %v7884_v55  ;;  %7506 = vmatprep.subr.bf16.mxu0 %v7893_v16  ;;  %10074 = vst [vmem:[#allocation57_spill] sm:$0xff] %v9005_v33  ;;  %v3548_v45 = vshll.u32 %v8782_v34, 16  ;;  %v9011_v30 = vsel %vm1768_vm8, %v3530_v18, %v3534_v63  ;;  %v3538_v36 = vor.u32 %v3536_v27, %v3534_v63  ;;  %v3552_v9 = vshrl.u32 %v8782_v34, 16 }
 0x1a2   : > { %7395 = vmatmul.mubr.bf16.gmra.mrb[84].mxu0 %v8798_v42  ;;  %v9014_v50 = vsel %vm2423_vm9, %v4099_v48, %v4101_v2  ;;  %v4103_v42 = vrot.slane %v8772_v31, 1  ;;  %v3546_v39 = vor.u32 %v3544_v28, %v3542_v24  ;;  %v3556_v33 = vshll.u32 %v8788_v4, 16 }
 0x1a3   : > { %7398 = vmatprep.mubr.bf16.mxu0 %v8812_v40  ;;  %7507 = vmatpush3.bf16.msra.mxu0 %v7893_v16  ;;  %10075 = vst [vmem:[#allocation58_spill] sm:$0xff] %v9014_v50  ;;  %v3550_v26 = vrot.slane %v3548_v45, 1  ;;  %v7895_v40 = vld [vmem:[%s9909_s3 + $0x138] sm:$0xff]   ;;  %v7898_v16 = vld [vmem:[%s9909_s3 + $0x160] sm:$0xff]   ;;  %v9026_v48 = vsel %vm1768_vm8, %v3538_v36, %v3542_v24  ;;  %v4105_v45 = vrot.slane %v8782_v34, 1  ;;  %v3560_v28 = vshrl.u32 %v8788_v4, 16 }
 0x1a4   : > { %7449 = vmatpush3.bf16.msra.mxu1 %v7884_v55  ;;  %7508 = vmatprep.subr.bf16.mxu0 %v7896_v5  ;;  %v9029_v55 = vsel %vm2423_vm9, %v4101_v2, %v4103_v42  ;;  %v3558_v63 = vrot.slane %v3556_v33, 1  ;;  %v3564_v50 = vshll.u32 %v8792_v6, 16  ;;  %v4107_v2 = vrot.slane %v8788_v4, 1  ;;  %v7900_v33 = vld [vmem:[%s9909_s3 + $0x168] sm:$0xff]  }
 0x1a5   : > { %7450 = vmatprep.subr.bf16.mxu1 %v7889_v44  ;;  %10076 = vst [vmem:[#allocation59_spill] sm:$0xff] %v9029_v55  ;;  %v9034_v27 = vsel %vm1768_vm8, %v3546_v39, %v3550_v26  ;;  %v3554_v18 = vor.u32 %v3552_v9, %v3550_v26  ;;  %v9039_v24 = vsel %vm2423_vm9, %v4103_v42, %v4105_v45  ;;  %v3568_v36 = vshrl.u32 %v8792_v6, 16  ;;  %v9055_v9 = vld [vmem:[%s9909_s3 + $0x180] sm:$0xff]  }
 0x1a6   : > { %10077 = vst [vmem:[#allocation60_spill] sm:$0xff] %v9039_v24  ;;  %v3572_v55 = vshll.u32 %v8803_v0, 16  ;;  %v3566_v26 = vrot.slane %v3564_v50, 1  ;;  %v4109_v42 = vrot.slane %v8792_v6, 1  ;;  %v4111_v24 = vrot.slane %v8803_v0, 1 }
 0x1a7   : > { %7339 = vmatmul.mubr.bf16.gmra.mrb[60].mxu1 %v8834_v10  ;;  %7509 = vmatpush3.bf16.msra.mxu0 %v7896_v5  ;;  %v9049_v39 = vsel %vm1768_vm8, %v3554_v18, %v3558_v63  ;;  %v3562_v5 = vor.u32 %v3560_v28, %v3558_v63  ;;  %v3576_v10 = vshrl.u32 %v8803_v0, 16  ;;  %v3580_v18 = vshll.u32 %v8816_v54, 16 }
 0x1a8   : > { %7342 = vmatprep.mubr.bf16.mxu1 %v8842_v3  ;;  %7451 = vmatpush3.bf16.msra.mxu1 %v7889_v44  ;;  %10078 = vst [vmem:[#allocation61_spill] sm:$0xff] %v9049_v39  ;;  %v9058_v44 = vsel %vm2423_vm9, %v4105_v45, %v4107_v2  ;;  %v3574_v3 = vrot.slane %v3572_v55, 1  ;;  %v3570_v28 = vor.u32 %v3568_v36, %v3566_v26  ;;  %v3588_v39 = vshll.u32 %v8827_v41, 16 }
 0x1a9   : > { %7452 = vmatprep.subr.bf16.mxu1 %v7895_v40  ;;  %7510 = vmatprep.subr.bf16.mxu0 %v7898_v16  ;;  %10079 = vst [vmem:[#allocation62_spill] sm:$0xff] %v9058_v44  ;;  %v9064_v50 = vsel %vm1768_vm8, %v3562_v5, %v3566_v26  ;;  %v9067_v63 = vsel %vm2423_vm9, %v4107_v2, %v4109_v42  ;;  %v3582_v55 = vrot.slane %v3580_v18, 1  ;;  %v3584_v44 = vshrl.u32 %v8816_v54, 16 }
 0x1aa   : > { %7399 = vmatmul.mubr.bf16.gmra.mrb[88].mxu0 %v8703_v59  ;;  %10080 = vst [vmem:[#allocation63_spill] sm:$0xff] %v9067_v63  ;;  %v3578_v45 = vor.u32 %v3576_v10, %v3574_v3  ;;  %v7902_v59 = vld [vmem:[%s9909_s3 + $0x170] sm:$0xff]   ;;  %v9077_v2 = vsel %vm1768_vm8, %v3570_v28, %v3574_v3  ;;  %v9080_v36 = vsel %vm2423_vm9, %v4109_v42, %v4111_v24  ;;  %v3592_v10 = vshrl.u32 %v8827_v41, 16 }
 0x1ab   : > { %7402 = vmatprep.mubr.bf16.mxu0 %v8707_v29  ;;  %7511 = vmatpush3.bf16.msra.mxu0 %v7898_v16  ;;  %10081 = vst [vmem:[#allocation64_spill] sm:$0xff] %v9080_v36  ;;  %v4113_v29 = vrot.slane %v8816_v54, 1  ;;  %v3590_v5 = vrot.slane %v3588_v39, 1  ;;  %v3596_v26 = vshll.u32 %v8831_v38, 16  ;;  %v10082_v18 = vrot.slane %v10057_v53, 1 }
 0x1ac   : > { %7453 = vmatpush3.bf16.msra.mxu1 %v7895_v40  ;;  %7512 = vmatprep.subr.bf16.mxu0 %v7900_v33  ;;  %v9086_v16 = vsel %vm1768_vm8, %v3578_v45, %v3582_v55  ;;  %v3586_v40 = vor.u32 %v3584_v44, %v3582_v55  ;;  %v10083_v3 = vrot.slane %v8448_v43, 1  ;;  %v10085_v28 = vrot.slane %v10058_v56, 1  ;;  %v9108_v44 = vld [vmem:[#allocation2 + $0xc4] sm:$0xf] }
 0x1ad   : > { %7566 = vmatprep.subr.bf16.mxu1 %v9055_v9  ;;  %v10086_v36 = vmov %v10082_v18  ;;  %v9104_v45 = vsel %vm2423_vm9, %v4111_v24, %v4113_v29  ;;  %v4115_v39 = vrot.slane %v8827_v41, 1  ;;  %v9979_v53 = vrot.slane %v8831_v38, 1  ;;  %v7904_v24 = vld [vmem:[%s9909_s3 + $0x178] sm:$0xff]  }
 0x1ae   : > { %v9094_v42 = vsel %vm2423_vm9, %v10083_v3, %v10082_v18  ;;  %v9101_v63 = vsel %vm2423_vm9, %v10086_v36, %v10085_v28  ;;  %v9111_v55 = vsel %vm1768_vm8, %v3586_v40, %v3590_v5  ;;  %v3594_v18 = vor.u32 %v3592_v10, %v3590_v5  ;;  %v10088_v5 = vld [vmem:[#allocation24_spill] sm:$0xff] }
 0x1af   : > { %10084 = vst [vmem:[#allocation65_spill] sm:$0xff] %v9094_v42  ;;  %10087 = vst [vmem:[#allocation66_spill] sm:$0xff] %v9101_v63  ;;  %7343 = vmatmul.mubr.bf16.gmra.mrb[64].mxu1 %v9094_v42  ;;  %7513 = vmatpush3.bf16.msra.mxu0 %v7900_v33  ;;  %v9113_v3 = vrot.slane %v3596_v26, 1  ;;  %v9121_v36 = vsel %vm2423_vm9, %v4113_v29, %v4115_v39  ;;  %v9123_v33 = vld [vmem:[#allocation2 + $0xcc] sm:$0xf]  ;;  %v9132_v10 = vsel %vm2423_vm9, %v4115_v39, %v9979_v53 }
 0x1b0   : > { %7346 = vmatprep.mubr.bf16.mxu1 %v9101_v63  ;;  %7514 = vmatprep.subr.bf16.mxu0 %v7902_v59  ;;  %v2447_v26 = vrot.slane %v10088_v5, 1  ;;  %v9136_v28 = vld [vmem:[#allocation2 + $0xc8] sm:$0xf]  ;;  %v9140_v29 = vcombine.low %v8689_v60, %v9108_v44  ;;  %v10090_v63 = vld [vmem:[#allocation26_spill] sm:$0xff]  ;;  %v10092_v39 = vrot.slane %v10058_v56, 1 }
 0x1b1   : > { %v9127_v40 = vsel %vm1768_vm8, %v3594_v18, %v9113_v3  ;;  %v2449_v18 = vrot.slane %v10090_v63, 1  ;;  %v9146_v42 = vcombine.low %v9136_v28, %v9123_v33 }
 0x1b2   : > { %7403 = vmatmul.mubr.bf16.gmra.mrb[92].mxu0 %v8712_v8  ;;  %10089 = vst [vmem:[#allocation24_spill] sm:$0xff] %v9140_v29  ;;  %v9151_v8 = vld [vmem:[%s9909_s3 + $0x1c0] sm:$0xff]   ;;  %v9156_v60 = vsel %vm2423_vm9, %v10092_v39, %v2447_v26 }
 0x1b3   : > { %7406 = vmatprep.mubr.bf16.mxu0 %v8719_v35  ;;  %7515 = vmatpush3.bf16.msra.mxu0 %v7902_v59  ;;  %10091 = vst [vmem:[#allocation26_spill] sm:$0xff] %v9146_v42  ;;  %10093 = vst [vmem:[#allocation67_spill] sm:$0xff] %v9156_v60  ;;  %v9160_v35 = vsel %vm2423_vm9, %v2447_v26, %v2449_v18  ;;  %v10095_v59 = vld [vmem:[#allocation28_spill] sm:$0xff]  ;;  %v10096_v42 = vld [vmem:[#allocation29_spill] sm:$0xff] }
 0x1b4   : > { %7516 = vmatprep.subr.bf16.mxu0 %v7904_v24  ;;  %10094 = vst [vmem:[#allocation68_spill] sm:$0xff] %v9160_v35  ;;  %v2451_v53 = vrot.slane %v10095_v59, 1  ;;  %v2453_v29 = vrot.slane %v10096_v42, 1 }
 0x1b6   : > { %v9169_v39 = vsel %vm2423_vm9, %v2449_v18, %v2451_v53  ;;  %v9173_v26 = vsel %vm2423_vm9, %v2451_v53, %v2453_v29  ;;  %v10101_v53 = vld [vmem:[#allocation34_spill] sm:$0xff] }
 0x1b7   : > { %7347 = vmatmul.mubr.bf16.gmra.mrb[68].mxu1 %v9156_v60  ;;  %7517 = vmatpush3.bf16.msra.mxu0 %v7904_v24  ;;  %10097 = vst [vmem:[#allocation28_spill] sm:$0xff] %v9169_v39  ;;  %10098 = vst [vmem:[#allocation29_spill] sm:$0xff] %v9173_v26  ;;  %v10099_v24 = vld [vmem:[#allocation31_spill] sm:$0xff] }
 0x1b8   : > { %7350 = vmatprep.mubr.bf16.mxu1 %v9160_v35  ;;  %7630 = vmatprep.subr.bf16.mxu0 %v9151_v8  ;;  %v10100_v35 = vld [vmem:[#allocation33_spill] sm:$0xff] }
 0x1ba   : > { %7407 = vmatmul.mubr.bf16.gmra.mrb[96].mxu0 %v8725_v25  ;;  %v2455_v25 = vrot.slane %v10099_v24, 1 }
 0x1bb   : > { %7410 = vmatprep.mubr.bf16.mxu0 %v8729_v12  ;;  %v2457_v12 = vrot.slane %v10100_v35, 1 }
 0x1bc   : > { %v9181_v60 = vsel %vm2423_vm9, %v2453_v29, %v2455_v25 }
 0x1bd   : > { %v9185_v18 = vsel %vm2423_vm9, %v2455_v25, %v2457_v12 }
 0x1bf   : > { %7351 = vmatmul.mubr.bf16.gmra.mrb[72].mxu1 %v9169_v39 }
 0x1c0   : > { %7354 = vmatprep.mubr.bf16.mxu1 %v9173_v26  ;;  %v10102_v26 = vld [vmem:[#allocation36_spill] sm:$0xff] }
 0x1c2   : > { %7411 = vmatmul.mubr.bf16.gmra.mrb[100].mxu0 %v8740_v13  ;;  %v2459_v13 = vrot.slane %v10101_v53, 1 }
 0x1c3   : > { %7414 = vmatprep.mubr.bf16.mxu0 %v8752_v21  ;;  %v2461_v21 = vrot.slane %v10102_v26, 1 }
 0x1c4   : > { %v9193_v39 = vsel %vm2423_vm9, %v2457_v12, %v2459_v13 }
 0x1c5   : > { %v9197_v29 = vsel %vm2423_vm9, %v2459_v13, %v2461_v21 }
 0x1c6   : > { %10103 = vst [vmem:[#allocation31_spill] sm:$0xff] %v9197_v29 }
 0x1c7   : > { %7355 = vmatmul.mubr.bf16.gmra.mrb[76].mxu1 %v9181_v60 }
 0x1c8   : > { %7358 = vmatprep.mubr.bf16.mxu1 %v9185_v18 }
 0x1ca   : > { %7415 = vmatmul.mubr.bf16.gmra.mrb[104].mxu0 %v8760_v14  ;;  %v2463_v14 = vrot.slane %v8646_v11, 1 }
 0x1cb   : > { %7418 = vmatprep.mubr.bf16.mxu0 %v8764_v32  ;;  %v2465_v32 = vrot.slane %v8650_v37, 1 }
 0x1cc   : > { %v9205_v25 = vsel %vm2423_vm9, %v2461_v21, %v2463_v14 }
 0x1cd   : > { %10104 = vst [vmem:[#allocation33_spill] sm:$0xff] %v9205_v25  ;;  %v9209_v12 = vsel %vm2423_vm9, %v2463_v14, %v2465_v32  ;;  %v7905_v14 = vld [vmem:[%s9909_s3 + $0x188] sm:$0xff]  }
 0x1ce   : > { %10105 = vst [vmem:[#allocation34_spill] sm:$0xff] %v9209_v12 }
 0x1cf   : > { %7359 = vmatmul.mubr.bf16.gmra.mrb[80].mxu1 %v9193_v39 }
 0x1d0   : > { %7362 = vmatprep.mubr.bf16.mxu1 %v9197_v29  ;;  %v10140_v29 = vld [vmem:[#allocation18_spill] sm:$0xff] }
 0x1d2   : > { %7419 = vmatmul.mubr.bf16.gmra.mrb[108].mxu0 %v8772_v31  ;;  %v2467_v31 = vrot.slane %v8660_v58, 1 }
 0x1d3   : > { %7422 = vmatprep.mubr.bf16.mxu0 %v8782_v34  ;;  %v9216_v34 = vrot.slane %v8678_v20, 1 }
 0x1d4   : > { %v9219_v13 = vsel %vm2423_vm9, %v2465_v32, %v2467_v31 }
 0x1d5   : > { %10106 = vst [vmem:[#allocation36_spill] sm:$0xff] %v9216_v34  ;;  %10107 = vst [vmem:[#allocation69_spill] sm:$0xff] %v9219_v13  ;;  %v9224_v21 = vsel %vm2423_vm9, %v2467_v31, %v9216_v34  ;;  %v7911_v31 = vld [vmem:[%s9909_s3 + $0x1b0] sm:$0xff]  }
 0x1d6   : > { %10108 = vst [vmem:[#allocation70_spill] sm:$0xff] %v9224_v21 }
 0x1d7   : > { %7363 = vmatmul.mubr.bf16.gmra.mrb[84].mxu1 %v9205_v25 }
 0x1d8   : > { %7366 = vmatprep.mubr.bf16.mxu1 %v9209_v12 }
 0x1da   : > { %7423 = vmatmul.mubr.bf16.gmra.mrb[112].mxu0 %v8788_v4  ;;  %v2471_v4 = vrot.slane %v8697_v22, 1  ;;  %v9241_v22 = vcombine.low %v9108_v44, %v9136_v28 }
 0x1db   : > { %7426 = vmatprep.mubr.bf16.mxu0 %v8792_v6 }
 0x1dc   : > { %v2472_v6 = vsel %vm2423_vm9, %v9216_v34, %v2471_v4  ;;  %v10110_v4 = vld [vmem:[#allocation39_spill] sm:$0xff] }
 0x1df   : > { %7367 = vmatmul.mubr.bf16.gmra.mrb[88].mxu1 %v9219_v13 }
 0x1e0   : > { %7370 = vmatprep.mubr.bf16.mxu1 %v9224_v21 }
 0x1e2   : > { %7427 = vmatmul.mubr.bf16.gmra.mrb[116].mxu0 %v8803_v0  ;;  %v7907_v0 = vld [vmem:[%s9909_s3 + $0x198] sm:$0xff]  }
 0x1e3   : > { %7430 = vmatprep.mubr.bf16.mxu0 %v8816_v54 }
 0x1e7   : > { %7371 = vmatmul.mubr.bf16.gmra.mrb[92].mxu1 %v2472_v6 }
 0x1e8   : > { %7454 = vmatprep.mubr.bf16.mxu1 %v8867_v47  ;;  %v7906_v47 = vld [vmem:[%s9909_s3 + $0x190] sm:$0xff]  }
 0x1ea   : > { %7431 = vmatmul.mubr.bf16.gmra.mrb[120].mxu0 %v8827_v41 }
 0x1eb   : > { %7434 = vmatprep.mubr.bf16.mxu0 %v8831_v38 }
 0x1ef   : > { %7455 = vmatmul.mubr.bf16.vlgmr.msra.gmra.mrb[96].mxu1 %v8873_v61 }
 0x1f0   : > { %7567 = vmatpush3.bf16.msra.mxu1 %v9055_v9  ;;  %7458 = vmatprep.mubr.bf16.mxu1 %v8878_v19  ;;  %v7912_v19 = vld [vmem:[%s9909_s3 + $0x1c8] sm:$0xff]  }
 0x1f1   : > { %7568 = vmatprep.subr.bf16.mxu1 %v7905_v14 }
 0x1f2   : > { %7435 = vmatmul.mubr.bf16.gmra.mrb[124].mxu0 %v9241_v22 }
 0x1f3   : > { %7518 = vmatprep.mubr.bf16.mxu0 %v8856_v57  ;;  %v7908_v57 = vld [vmem:[%s9909_s3 + $0x1a0] sm:$0xff]  }
 0x1f4   : > { %7569 = vmatpush3.bf16.msra.mxu1 %v7905_v14  ;;  %v7914_v14 = vld [vmem:[%s9909_s3 + $0x1b8] sm:$0xff]  }
 0x1f5   : > { %7570 = vmatprep.subr.bf16.mxu1 %v7906_v47  ;;  %v7200_v54 = vpop.f32.mrb[0].mxu1 }
 0x1f6   : > { %v1509_v41 = vpop.f32.mrb[1].mxu1  ;;  %v10112_v54 = vld [vmem:[#allocation52_spill] sm:$0xff] }
 0x1f7   : > { %7459 = vmatmul.mubr.bf16.gmra.mrb[100].mxu1 %v8889_v51  ;;  %v7201_v61 = vpop.f32.mrb[2].mxu1  ;;  %v7913_v51 = vld [vmem:[%s9909_s3 + $0x1d0] sm:$0xff]  }
 0x1f8   : > { %7462 = vmatprep.mubr.bf16.mxu1 %v8900_v17  ;;  %7571 = vmatpush3.bf16.msra.mxu1 %v7906_v47  ;;  %v1512_v9 = vpop.f32.mrb[3].mxu1  ;;  %v7909_v17 = vld [vmem:[%s9909_s3 + $0x1a8] sm:$0xff]   ;;  %v7916_v47 = vld [vmem:[%s9909_s3 + $0x1e0] sm:$0xff]  }
 0x1f9   : > { %7572 = vmatprep.subr.bf16.mxu1 %v7907_v0 }
 0x1fa   : > { %7519 = vmatmul.mubr.bf16.vlgmr.msra.gmra.mrb[128].mxu0 %v8863_v7  ;;  %v10109_v7 = vld [vmem:[#allocation5_spill] sm:$0xff] }
 0x1fb   : > { %7522 = vmatprep.mubr.bf16.mxu0 %v8881_v52  ;;  %7631 = vmatpush3.bf16.msra.mxu0 %v9151_v8  ;;  %v7915_v8 = vld [vmem:[%s9909_s3 + $0x1d8] sm:$0xff]  }
 0x1fc   : > { %7573 = vmatpush3.bf16.msra.mxu1 %v7907_v0  ;;  %7632 = vmatprep.subr.bf16.mxu0 %v7912_v19 }
 0x1fd   : > { %7574 = vmatprep.subr.bf16.mxu1 %v7908_v57  ;;  %v7204_v44 = vpop.f32.mrb[4].mxu1 }
 0x1fe   : > { %v1525_v28 = vpop.f32.mrb[5].mxu1 }
 0x1ff   : > { %7463 = vmatmul.mubr.bf16.gmra.mrb[104].mxu1 %v8912_v15  ;;  %7633 = vmatpush3.bf16.msra.mxu0 %v7912_v19  ;;  %v7205_v52 = vpop.f32.mrb[6].mxu1  ;;  %v10111_v15 = vld [vmem:[#allocation43_spill] sm:$0xff] }
 0x200   : > { %7466 = vmatprep.mubr.bf16.mxu1 %v10109_v7  ;;  %7575 = vmatpush3.bf16.msra.mxu1 %v7908_v57  ;;  %v1528_v32 = vpop.f32.mrb[7].mxu1  ;;  %v7918_v7 = vld [vmem:[%s9909_s3 + $0x1e8] sm:$0xff]  }
 0x201   : > { %7576 = vmatprep.subr.bf16.mxu1 %v7909_v17  ;;  %7634 = vmatprep.subr.bf16.mxu0 %v7913_v51 }
 0x202   : > { %7523 = vmatmul.mubr.bf16.gmra.mrb[132].mxu0 %v10110_v4 }
 0x203   : > { %7526 = vmatprep.mubr.bf16.mxu0 %v10111_v15  ;;  %7635 = vmatpush3.bf16.msra.mxu0 %v7913_v51 }
 0x204   : > { %7577 = vmatpush3.bf16.msra.mxu1 %v7909_v17  ;;  %7636 = vmatprep.subr.bf16.mxu0 %v7915_v8  ;;  %v7264_v6 = vpop.f32.mrb[32].mxu0 }
 0x205   : > { %7578 = vmatprep.subr.bf16.mxu1 %v7911_v31  ;;  %v2071_v0 = vpop.f32.mrb[33].mxu0 }
 0x206   : > { %v9287_v19 = vadd.f32 %v2071_v0, %v1509_v41  ;;  %v7265_v57 = vpop.f32.mrb[34].mxu0  ;;  %v9300_v41 = vld [vmem:[%s9909_s3 + $0x200] sm:$0xff]  }
 0x207   : > { %7467 = vmatmul.mubr.bf16.gmra.mrb[108].mxu1 %v10112_v54  ;;  %7637 = vmatpush3.bf16.msra.mxu0 %v7915_v8  ;;  %v9290_v17 = vadd.f32 %v7265_v57, %v7201_v61  ;;  %v2074_v51 = vpop.f32.mrb[35].mxu0  ;;  %v10113_v8 = vld [vmem:[#allocation22_spill] sm:$0xff] }
 0x208   : > { %7470 = vmatprep.mubr.bf16.mxu1 %v8948_v1  ;;  %7579 = vmatpush3.bf16.msra.mxu1 %v7911_v31  ;;  %v9295_v32 = vadd.f32 %v2074_v51, %v1512_v9  ;;  %v10114_v1 = vld [vmem:[#allocation12_spill] sm:$0xff]  ;;  %v7919_v9 = vld [vmem:[%s9909_s3 + $0x1f0] sm:$0xff]  }
 0x209   : > { %7580 = vmatprep.subr.bf16.mxu1 %v7914_v14  ;;  %7638 = vmatprep.subr.bf16.mxu0 %v7916_v47  ;;  %v10115_v51 = vld [vmem:[#allocation53_spill] sm:$0xff] }
 0x20a   : > { %7527 = vmatmul.mubr.bf16.gmra.mrb[136].mxu0 %v10113_v8  ;;  %v7208_v61 = vpop.f32.mrb[8].mxu1 }
 0x20b   : > { %7530 = vmatprep.mubr.bf16.mxu0 %v10114_v1  ;;  %7639 = vmatpush3.bf16.msra.mxu0 %v7916_v47  ;;  %v1541_v31 = vpop.f32.mrb[9].mxu1  ;;  %v10116_v1 = vld [vmem:[#allocation23_spill] sm:$0xff] }
 0x20c   : > { %7581 = vmatpush3.bf16.msra.mxu1 %v7914_v14  ;;  %7640 = vmatprep.subr.bf16.mxu0 %v7918_v7  ;;  %v7209_v4 = vpop.f32.mrb[10].mxu1  ;;  %v7921_v14 = vld [vmem:[%s9909_s3 + $0x1f8] sm:$0xff]  }
 0x20d   : > { %7758 = vmatprep.subr.bf16.mxu1 %v9300_v41  ;;  %v1544_v15 = vpop.f32.mrb[11].mxu1  ;;  %v10118_v4 = vld [vmem:[#allocation55_spill] sm:$0xff] }
 0x20e   : > { %v7268_v6 = vpop.f32.mrb[36].mxu0 }
 0x20f   : > { %7471 = vmatmul.mubr.bf16.gmra.mrb[112].mxu1 %v8959_v49  ;;  %7641 = vmatpush3.bf16.msra.mxu0 %v7918_v7  ;;  %v9310_v0 = vadd.f32 %v7268_v6, %v7204_v44  ;;  %v2087_v47 = vpop.f32.mrb[37].mxu0  ;;  %v10117_v7 = vld [vmem:[#allocation54_spill] sm:$0xff] }
 0x210   : > { %7474 = vmatprep.mubr.bf16.mxu1 %v8974_v46  ;;  %7642 = vmatprep.subr.bf16.mxu0 %v7919_v9  ;;  %v9315_v54 = vadd.f32 %v2087_v47, %v1525_v28  ;;  %v7269_v57 = vpop.f32.mrb[38].mxu0 }
 0x211   : > { %v9318_v8 = vadd.f32 %v7269_v57, %v7205_v52  ;;  %v2090_v49 = vpop.f32.mrb[39].mxu0 }
 0x212   : > { %7531 = vmatmul.mubr.bf16.gmra.mrb[140].mxu0 %v10115_v51  ;;  %v10119_v51 = vld [vmem:[#allocation56_spill] sm:$0xff] }
 0x213   : > { %7534 = vmatprep.mubr.bf16.mxu0 %v10116_v1  ;;  %7643 = vmatpush3.bf16.msra.mxu0 %v7919_v9  ;;  %v10120_v1 = vld [vmem:[#allocation57_spill] sm:$0xff] }
 0x214   : > { %7644 = vmatprep.subr.bf16.mxu0 %v7921_v14 }
 0x217   : > { %7475 = vmatmul.mubr.bf16.gmra.mrb[116].mxu1 %v8983_v23  ;;  %v7212_v46 = vpop.f32.mrb[12].mxu1  ;;  %7645 = vmatpush3.bf16.msra.mxu0 %v7921_v14 }
 0x218   : > { %7478 = vmatprep.mubr.bf16.mxu1 %v9000_v62  ;;  %v1557_v44 = vpop.f32.mrb[13].mxu1  ;;  %7694 = vmatprep.subr.bf16.mxu0 %v9300_v41 }
 0x219   : > { %v7213_v28 = vpop.f32.mrb[14].mxu1 }
 0x21a   : > { %7535 = vmatmul.mubr.bf16.gmra.mrb[144].mxu0 %v10117_v7  ;;  %v7272_v31 = vpop.f32.mrb[40].mxu0  ;;  %v1560_v52 = vpop.f32.mrb[15].mxu1 }
 0x21b   : > { %7538 = vmatprep.mubr.bf16.mxu0 %v10118_v4  ;;  %v9326_v6 = vadd.f32 %v7272_v31, %v7208_v61  ;;  %v2103_v9 = vpop.f32.mrb[41].mxu0 }
 0x21c   : > { %v7273_v47 = vpop.f32.mrb[42].mxu0 }
 0x21d   : > { %v2106_v57 = vpop.f32.mrb[43].mxu0 }
 0x21e   : > { %v9328_v23 = vadd.f32 %v2106_v57, %v1544_v15 }
 0x21f   : > { %7479 = vmatmul.mubr.bf16.gmra.mrb[120].mxu1 %v9011_v30  ;;  %v10121_v30 = vld [vmem:[#allocation61_spill] sm:$0xff] }
 0x220   : > { %7482 = vmatprep.mubr.bf16.mxu1 %v9026_v48  ;;  %v7216_v62 = vpop.f32.mrb[16].mxu1 }
 0x221   : > { %v1573_v14 = vpop.f32.mrb[17].mxu1 }
 0x222   : > { %7539 = vmatmul.mubr.bf16.gmra.mrb[148].mxu0 %v10119_v51  ;;  %v7217_v49 = vpop.f32.mrb[18].mxu1  ;;  %v10122_v51 = vld [vmem:[#allocation58_spill] sm:$0xff] }
 0x223   : > { %7542 = vmatprep.mubr.bf16.mxu0 %v10120_v1  ;;  %v7276_v46 = vpop.f32.mrb[44].mxu0  ;;  %v1576_v7 = vpop.f32.mrb[19].mxu1 }
 0x224   : > { %v2119_v61 = vpop.f32.mrb[45].mxu0  ;;  %v10123_v46 = vld [vmem:[#allocation59_spill] sm:$0xff] }
 0x225   : > { %v9334_v31 = vadd.f32 %v2119_v61, %v1557_v44  ;;  %v7277_v4 = vpop.f32.mrb[46].mxu0 }
 0x226   : > { %v9336_v9 = vadd.f32 %v7277_v4, %v7213_v28  ;;  %v2122_v15 = vpop.f32.mrb[47].mxu0 }
 0x227   : > { %v9338_v47 = vadd.f32 %v2122_v15, %v1560_v52  ;;  %7483 = vmatmul.mubr.bf16.gmra.mrb[124].mxu1 %v9034_v27 }
 0x228   : > { %7486 = vmatprep.mubr.bf16.mxu1 %v10121_v30  ;;  %v7220_v48 = vpop.f32.mrb[20].mxu1  ;;  %v10124_v30 = vld [vmem:[#allocation60_spill] sm:$0xff] }
 0x229   : > { %v1589_v57 = vpop.f32.mrb[21].mxu1 }
 0x22a   : > { %7543 = vmatmul.mubr.bf16.gmra.mrb[152].mxu0 %v10122_v51  ;;  %v7221_v1 = vpop.f32.mrb[22].mxu1  ;;  %v10125_v51 = vld [vmem:[#allocation62_spill] sm:$0xff] }
 0x22b   : > { %7546 = vmatprep.mubr.bf16.mxu0 %v10123_v46  ;;  %v7280_v7 = vpop.f32.mrb[48].mxu0  ;;  %v1592_v44 = vpop.f32.mrb[23].mxu1 }
 0x22c   : > { %v9344_v61 = vadd.f32 %v7280_v7, %v7216_v62  ;;  %v2135_v28 = vpop.f32.mrb[49].mxu0 }
 0x22d   : > { %v9346_v4 = vadd.f32 %v2135_v28, %v1573_v14  ;;  %v7281_v52 = vpop.f32.mrb[50].mxu0 }
 0x22e   : > { %v9348_v15 = vadd.f32 %v7281_v52, %v7217_v49  ;;  %v2138_v27 = vpop.f32.mrb[51].mxu0 }
 0x22f   : > { %7487 = vmatmul.mubr.bf16.gmra.mrb[128].mxu1 %v9064_v50  ;;  %v3600_v50 = vshrl.u32 %v8831_v38, 16  ;;  %v10126_v27 = vld [vmem:[#allocation63_spill] sm:$0xff] }
 0x230   : > { %7490 = vmatprep.mubr.bf16.mxu1 %v9077_v2  ;;  %v3604_v2 = vshll.u32 %v9241_v22, 16 }
 0x232   : > { %7547 = vmatmul.mubr.bf16.gmra.mrb[156].mxu0 %v10124_v30  ;;  %v7224_v57 = vpop.f32.mrb[24].mxu1 }
 0x233   : > { %7550 = vmatprep.mubr.bf16.mxu0 %v10125_v51  ;;  %v1605_v1 = vpop.f32.mrb[25].mxu1  ;;  %v10127_v57 = vld [vmem:[#allocation64_spill] sm:$0xff]  ;;  %v3602_v51 = vor.u32 %v3600_v50, %v9113_v3 }
 0x234   : > { %v7284_v46 = vpop.f32.mrb[52].mxu0  ;;  %v7225_v62 = vpop.f32.mrb[26].mxu1 }
 0x235   : > { %v9354_v7 = vadd.f32 %v7284_v46, %v7220_v48  ;;  %v2151_v14 = vpop.f32.mrb[53].mxu0  ;;  %v1608_v28 = vpop.f32.mrb[27].mxu1  ;;  %v6517_v48 = vcombine.low %v9123_v33, %v9123_v33 }
 0x236   : > { %v7285_v34 = vpop.f32.mrb[54].mxu0 }
 0x237   : > { %v2154_v49 = vpop.f32.mrb[55].mxu0  ;;  %7491 = vmatmul.mubr.bf16.gmra.mrb[132].mxu1 %v9086_v16  ;;  %v3612_v21 = vshll.u32 %v6517_v48, 16 }
 0x238   : > { %v9358_v52 = vadd.f32 %v2154_v49, %v1592_v44  ;;  %7494 = vmatprep.mubr.bf16.mxu1 %v9111_v55  ;;  %v3606_v44 = vrot.slane %v3604_v2, 1  ;;  %v3608_v55 = vshrl.u32 %v9241_v22, 16 }
 0x23a   : > { %7551 = vmatmul.mubr.bf16.gmra.mrb[160].mxu0 %v10126_v27  ;;  %v7228_v30 = vpop.f32.mrb[28].mxu1  ;;  %v3607_v33 = vsel %vm1768_vm8, %v3602_v51, %v3606_v44  ;;  %v3610_v2 = vor.u32 %v3608_v55, %v3606_v44  ;;  %v10128_v44 = vld [vmem:[#allocation4_spill] sm:$0xff] }
 0x23b   : > { %7554 = vmatprep.mubr.bf16.mxu0 %v10127_v57  ;;  %v1621_v34 = vpop.f32.mrb[29].mxu1 }
 0x23c   : > { %v7229_v16 = vpop.f32.mrb[30].mxu1 }
 0x23d   : > { %v7288_v46 = vpop.f32.mrb[56].mxu0  ;;  %v1624_v14 = vpop.f32.mrb[31].mxu1 }
 0x23e   : > { %v2167_v49 = vpop.f32.mrb[57].mxu0  ;;  %v3614_v46 = vrot.slane %v3612_v21, 1 }
 0x23f   : > { %v9368_v13 = vadd.f32 %v2167_v49, %v1605_v1  ;;  %v7289_v27 = vpop.f32.mrb[58].mxu0  ;;  %7495 = vmatmul.mubr.bf16.gmra.mrb[136].mxu1 %v9127_v40 }
 0x240   : > { %v9372_v12 = vadd.f32 %v7289_v27, %v7225_v62  ;;  %v2170_v57 = vpop.f32.mrb[59].mxu0  ;;  %7498 = vmatprep.mubr.bf16.mxu1 %v3607_v33  ;;  %v3615_v62 = vsel %vm1768_vm8, %v3610_v2, %v3614_v46  ;;  %v4119_v27 = vrot.slane %v9241_v22, 1  ;;  %v4121_v46 = vrot.slane %v6517_v48, 1  ;;  %v7923_v48 = vld [vmem:[%s9909_s3 + $0x210] sm:$0xff]  }
 0x241   : > { %v9374_v3 = vadd.f32 %v2170_v57, %v1608_v28 }
 0x242   : > { %7555 = vmatmul.mubr.bf16.gmra.mrb[164].mxu0 %v9104_v45  ;;  %v7232_v50 = vpop.f32.mrb[32].mxu1 }
 0x243   : > { %7558 = vmatprep.mubr.bf16.mxu0 %v9121_v36  ;;  %v1637_v1 = vpop.f32.mrb[33].mxu1  ;;  %v10129_v36 = vrot.slane %v8831_v38, 1 }
 0x244   : > { %v7233_v14 = vpop.f32.mrb[34].mxu1 }
 0x245   : > { %v7292_v49 = vpop.f32.mrb[60].mxu0  ;;  %v1640_v25 = vpop.f32.mrb[35].mxu1 }
 0x246   : > { %v9378_v40 = vadd.f32 %v7292_v49, %v7228_v30  ;;  %v2183_v51 = vpop.f32.mrb[61].mxu0  ;;  %v4120_v30 = vsel %vm2423_vm9, %v10129_v36, %v4119_v27 }
 0x247   : > { %v9382_v28 = vadd.f32 %v2183_v51, %v1621_v34  ;;  %v7293_v33 = vpop.f32.mrb[62].mxu0  ;;  %7499 = vmatmul.mubr.bf16.gmra.mrb[140].mxu1 %v3615_v62  ;;  %v10131_v51 = vld [vmem:[#allocation8_spill] sm:$0xff] }
 0x248   : > { %v9384_v45 = vadd.f32 %v7293_v33, %v7229_v16  ;;  %v2186_v21 = vpop.f32.mrb[63].mxu0  ;;  %7582 = vmatprep.mubr.bf16.mxu1 %v10128_v44  ;;  %v7922_v16 = vld [vmem:[%s9909_s3 + $0x208] sm:$0xff]   ;;  %v4122_v33 = vsel %vm2423_vm9, %v4119_v27, %v4121_v46 }
 0x249   : > { %v10132_v21 = vld [vmem:[#allocation10_spill] sm:$0xff] }
 0x24a   : > { %7559 = vmatmul.mubr.bf16.gmra.mrb[168].mxu0 %v9132_v10  ;;  %v7236_v55 = vpop.f32.mrb[36].mxu1  ;;  %v10130_v10 = vld [vmem:[#allocation6_spill] sm:$0xff] }
 0x24b   : > { %7562 = vmatprep.mubr.bf16.mxu0 %v4120_v30  ;;  %v1653_v57 = vpop.f32.mrb[37].mxu1 }
 0x24c   : > { %v7237_v2 = vpop.f32.mrb[38].mxu1 }
 0x24d   : > { %v7296_v22 = vpop.f32.mrb[64].mxu0  ;;  %v1656_v34 = vpop.f32.mrb[39].mxu1 }
 0x24e   : > { %v9394_v1 = vadd.f32 %v7296_v22, %v7232_v50  ;;  %v2199_v14 = vpop.f32.mrb[65].mxu0 }
 0x24f   : > { %v7297_v49 = vpop.f32.mrb[66].mxu0  ;;  %7583 = vmatmul.mubr.bf16.vlgmr.msra.gmra.mrb[144].mxu1 %v10130_v10  ;;  %v10133_v14 = vld [vmem:[#allocation11_spill] sm:$0xff] }
 0x250   : > { %v2202_v38 = vpop.f32.mrb[67].mxu0  ;;  %7766 = vmatpush3.bf16.msra.mxu1 %v9300_v41  ;;  %7586 = vmatprep.mubr.bf16.mxu1 %v10131_v51 }
 0x251   : > { %v9399_v62 = vadd.f32 %v2202_v38, %v1640_v25  ;;  %7759 = vmatprep.subr.bf16.mxu1 %v7922_v16  ;;  %v7924_v25 = vld [vmem:[%s9909_s3 + $0x218] sm:$0xff]  }
 0x252   : > { %7563 = vmatmul.mubr.bf16.gmra.mrb[172].mxu0 %v4122_v33  ;;  %v7240_v50 = vpop.f32.mrb[40].mxu1  ;;  %v10134_v38 = vld [vmem:[#allocation14_spill] sm:$0xff]  ;;  %v7925_v33 = vld [vmem:[%s9909_s3 + $0x220] sm:$0xff]  }
 0x253   : > { %7646 = vmatprep.mubr.bf16.mxu0 %v10132_v21  ;;  %v1669_v44 = vpop.f32.mrb[41].mxu1  ;;  %v10135_v21 = vld [vmem:[#allocation13_spill] sm:$0xff] }
 0x254   : > { %v7241_v36 = vpop.f32.mrb[42].mxu1  ;;  %7767 = vmatpush3.bf16.msra.mxu1 %v7922_v16 }
 0x255   : > { %v7300_v30 = vpop.f32.mrb[68].mxu0  ;;  %v1672_v55 = vpop.f32.mrb[43].mxu1  ;;  %7760 = vmatprep.subr.bf16.mxu1 %v7923_v48 }
 0x256   : > { %v2215_v27 = vpop.f32.mrb[69].mxu0  ;;  %v10136_v30 = vld [vmem:[#allocation15_spill] sm:$0xff] }
 0x257   : > { %v9409_v22 = vadd.f32 %v2215_v27, %v1653_v57  ;;  %v7301_v46 = vpop.f32.mrb[70].mxu0  ;;  %7587 = vmatmul.mubr.bf16.gmra.mrb[148].mxu1 %v10133_v14 }
 0x258   : > { %v9412_v49 = vadd.f32 %v7301_v46, %v7237_v2  ;;  %v2218_v10 = vpop.f32.mrb[71].mxu0  ;;  %7590 = vmatprep.mubr.bf16.mxu1 %v10134_v38  ;;  %7768 = vmatpush3.bf16.msra.mxu1 %v7923_v48 }
 0x259   : > { %v9415_v51 = vadd.f32 %v2218_v10, %v1656_v34  ;;  %7761 = vmatprep.subr.bf16.mxu1 %v7924_v25  ;;  %v7926_v34 = vld [vmem:[%s9909_s3 + $0x228] sm:$0xff]  }
 0x25a   : > { %7647 = vmatmul.mubr.bf16.vlgmr.msra.gmra.mrb[176].mxu0 %v10135_v21  ;;  %v7244_v57 = vpop.f32.mrb[44].mxu1 }
 0x25b   : > { %7650 = vmatprep.mubr.bf16.mxu0 %v10136_v30  ;;  %v1685_v55 = vpop.f32.mrb[45].mxu1  ;;  %7695 = vmatpush3.bf16.msra.mxu0 %v9300_v41  ;;  %v10137_v30 = vld [vmem:[#allocation16_spill] sm:$0xff] }
 0x25c   : > { %v7245_v2 = vpop.f32.mrb[46].mxu1  ;;  %7769 = vmatpush3.bf16.msra.mxu1 %v7924_v25  ;;  %7696 = vmatprep.subr.bf16.mxu0 %v7922_v16 }
 0x25d   : > { %v7304_v27 = vpop.f32.mrb[72].mxu0  ;;  %v1688_v46 = vpop.f32.mrb[47].mxu1  ;;  %7762 = vmatprep.subr.bf16.mxu1 %v7925_v33  ;;  %v7927_v2 = vld [vmem:[%s9909_s3 + $0x230] sm:$0xff]  }
 0x25e   : > { %v9426_v14 = vadd.f32 %v7304_v27, %v7240_v50  ;;  %v2231_v10 = vpop.f32.mrb[73].mxu0  ;;  %v10138_v50 = vld [vmem:[#allocation17_spill] sm:$0xff]  ;;  %v10139_v27 = vld [vmem:[#allocation19_spill] sm:$0xff] }
 0x25f   : > { %v9428_v38 = vadd.f32 %v2231_v10, %v1669_v44  ;;  %v7305_v21 = vpop.f32.mrb[74].mxu0  ;;  %7591 = vmatmul.mubr.bf16.gmra.mrb[152].mxu1 %v10137_v30  ;;  %7697 = vmatpush3.bf16.msra.mxu0 %v7922_v16 }
 0x260   : > { %v9431_v41 = vadd.f32 %v7305_v21, %v7241_v36  ;;  %v2234_v55 = vpop.f32.mrb[75].mxu0  ;;  %7594 = vmatprep.mubr.bf16.mxu1 %v8448_v43  ;;  %7770 = vmatpush3.bf16.msra.mxu1 %v7925_v33 }
 0x261   : > { %7763 = vmatprep.subr.bf16.mxu1 %v7926_v34  ;;  %7698 = vmatprep.subr.bf16.mxu0 %v7923_v48  ;;  %v7930_v55 = vld [vmem:[%s9909_s3 + $0x238] sm:$0xff]  }
 0x262   : > { %7651 = vmatmul.mubr.bf16.gmra.mrb[180].mxu0 %v10138_v50  ;;  %v7328_v44 = vpop.f32.mrb[48].mxu1 }
 0x263   : > { %7654 = vmatprep.mubr.bf16.mxu0 %v10139_v27  ;;  %v2579_v10 = vpop.f32.mrb[49].mxu1  ;;  %7699 = vmatpush3.bf16.msra.mxu0 %v7923_v48 }
 0x264   : > { %v2818_v16 = vadd.f32 %v2579_v10, %v9287_v19  ;;  %v7329_v36 = vpop.f32.mrb[50].mxu1  ;;  %7771 = vmatpush3.bf16.msra.mxu1 %v7926_v34  ;;  %7700 = vmatprep.subr.bf16.mxu0 %v7924_v25  ;;  %v10141_v10 = vld [vmem:[#allocation20_spill] sm:$0xff] }
 0x265   : > { %v7308_v43 = vpop.f32.mrb[76].mxu0  ;;  %v2821_v21 = vadd.f32 %v7329_v36, %v9290_v17  ;;  %v2582_v30 = vpop.f32.mrb[51].mxu1  ;;  %7764 = vmatprep.subr.bf16.mxu1 %v7927_v2 }
 0x266   : > { %v9444_v50 = vadd.f32 %v7308_v43, %v7244_v57  ;;  %v2247_v44 = vpop.f32.mrb[77].mxu0  ;;  %v2819_v27 = vadd.f32 %v2582_v30, %v9295_v32  ;;  %v10142_v57 = vld [vmem:[#allocation21_spill] sm:$0xff] }
 0x267   : > { %v7309_v48 = vpop.f32.mrb[78].mxu0  ;;  %7595 = vmatmul.mubr.bf16.gmra.mrb[156].mxu1 %v10140_v29  ;;  %7701 = vmatpush3.bf16.msra.mxu0 %v7924_v25 }
 0x268   : > { %v2250_v19 = vpop.f32.mrb[79].mxu0  ;;  %7598 = vmatprep.mubr.bf16.mxu1 %v10058_v56  ;;  %7772 = vmatpush3.bf16.msra.mxu1 %v7927_v2 }
 0x269   : > { %v9449_v17 = vadd.f32 %v2250_v19, %v1688_v46  ;;  %7765 = vmatprep.subr.bf16.mxu1 %v7930_v55  ;;  %7702 = vmatprep.subr.bf16.mxu0 %v7925_v33 }
 0x26a   : > { %7655 = vmatmul.mubr.bf16.gmra.mrb[184].mxu0 %v10141_v10  ;;  %v7332_v36 = vpop.f32.mrb[52].mxu1 }
 0x26b   : > { %7658 = vmatprep.mubr.bf16.mxu0 %v10142_v57  ;;  %v2824_v43 = vadd.f32 %v7332_v36, %v9310_v0  ;;  %v2595_v32 = vpop.f32.mrb[53].mxu1  ;;  %7703 = vmatpush3.bf16.msra.mxu0 %v7925_v33  ;;  %v10143_v33 = vld [vmem:[#allocation25_spill] sm:$0xff] }
 0x26c   : > { %v2822_v29 = vadd.f32 %v2595_v32, %v9315_v54  ;;  %v7333_v25 = vpop.f32.mrb[54].mxu1  ;;  %7773 = vmatpush3.bf16.msra.mxu1 %v7930_v55  ;;  %7704 = vmatprep.subr.bf16.mxu0 %v7926_v34 }
 0x26d   : > { %v7392_v56 = vpop.f32.mrb[80].mxu0  ;;  %v2825_v46 = vadd.f32 %v7333_v25, %v9318_v8  ;;  %v2598_v30 = vpop.f32.mrb[55].mxu1  ;;  %v10144_v8 = vld [vmem:[#allocation27_spill] sm:$0xff] }
 0x26e   : > { %v3065_v44 = vpop.f32.mrb[81].mxu0 }
 0x26f   : > { %v9456_v48 = vadd.f32 %v3065_v44, %v2818_v16  ;;  %v7393_v19 = vpop.f32.mrb[82].mxu0  ;;  %7599 = vmatmul.mubr.bf16.gmra.mrb[160].mxu1 %v10088_v5  ;;  %7705 = vmatpush3.bf16.msra.mxu0 %v7926_v34 }
 0x270   : > { %v9459_v10 = vadd.f32 %v7393_v19, %v2821_v21  ;;  %v3068_v0 = vpop.f32.mrb[83].mxu0  ;;  %7602 = vmatprep.mubr.bf16.mxu1 %v10090_v63  ;;  %7706 = vmatprep.subr.bf16.mxu0 %v7927_v2  ;;  %v10146_v19 = vld [vmem:[#allocation32_spill] sm:$0xff] }
 0x271   : > { %v9462_v54 = vadd.f32 %v3068_v0, %v2819_v27 }
 0x272   : > { %7659 = vmatmul.mubr.bf16.gmra.mrb[188].mxu0 %v10143_v33  ;;  %v7336_v36 = vpop.f32.mrb[56].mxu1 }
 0x273   : > { %7662 = vmatprep.mubr.bf16.mxu0 %v10144_v8  ;;  %v2828_v16 = vadd.f32 %v7336_v36, %v9326_v6  ;;  %v2611_v57 = vpop.f32.mrb[57].mxu1  ;;  %7707 = vmatpush3.bf16.msra.mxu0 %v7927_v2  ;;  %v10145_v2 = vld [vmem:[#allocation30_spill] sm:$0xff] }
 0x274   : > { %v7337_v32 = vpop.f32.mrb[58].mxu1  ;;  %7708 = vmatprep.subr.bf16.mxu0 %v7930_v55 }
 0x275   : > { %v7396_v5 = vpop.f32.mrb[84].mxu0  ;;  %v2614_v34 = vpop.f32.mrb[59].mxu1  ;;  %v10147_v32 = vld [vmem:[#allocation35_spill] sm:$0xff] }
 0x276   : > { %v9467_v21 = vadd.f32 %v7396_v5, %v2824_v43  ;;  %v3081_v25 = vpop.f32.mrb[85].mxu0  ;;  %v2827_v63 = vadd.f32 %v2614_v34, %v9328_v23  ;;  %v10148_v5 = vld [vmem:[#allocation41_spill] sm:$0xff] }
 0x277   : > { %v9470_v27 = vadd.f32 %v3081_v25, %v2822_v29  ;;  %v7397_v56 = vpop.f32.mrb[86].mxu0  ;;  %7603 = vmatmul.mubr.bf16.gmra.mrb[164].mxu1 %v10095_v59  ;;  %7709 = vmatpush3.bf16.msra.mxu0 %v7930_v55 }
 0x278   : > { %v9473_v30 = vadd.f32 %v7397_v56, %v2825_v46  ;;  %v3084_v6 = vpop.f32.mrb[87].mxu0  ;;  %7606 = vmatprep.mubr.bf16.mxu1 %v10096_v42 }
 0x27a   : > { %7663 = vmatmul.mubr.bf16.gmra.mrb[192].mxu0 %v10145_v2  ;;  %v7340_v44 = vpop.f32.mrb[60].mxu1 }
 0x27b   : > { %7666 = vmatprep.mubr.bf16.mxu0 %v10146_v19  ;;  %v2627_v43 = vpop.f32.mrb[61].mxu1  ;;  %v10149_v19 = vld [vmem:[#allocation42_spill] sm:$0xff] }
 0x27c   : > { %v2830_v0 = vadd.f32 %v2627_v43, %v9334_v31  ;;  %v7341_v23 = vpop.f32.mrb[62].mxu1  ;;  %v10150_v43 = vld [vmem:[#allocation44_spill] sm:$0xff] }
 0x27d   : > { %v7400_v29 = vpop.f32.mrb[88].mxu0  ;;  %v2833_v33 = vadd.f32 %v7341_v23, %v9336_v9  ;;  %v2630_v36 = vpop.f32.mrb[63].mxu1 }
 0x27e   : > { %v9480_v59 = vadd.f32 %v7400_v29, %v2828_v16  ;;  %v3097_v55 = vpop.f32.mrb[89].mxu0  ;;  %v2831_v46 = vadd.f32 %v2630_v36, %v9338_v47 }
 0x27f   : > { %v7401_v8 = vpop.f32.mrb[90].mxu0  ;;  %7607 = vmatmul.mubr.bf16.gmra.mrb[168].mxu1 %v10099_v24 }
 0x280   : > { %v3100_v42 = vpop.f32.mrb[91].mxu0  ;;  %7610 = vmatprep.mubr.bf16.mxu1 %v10100_v35 }
 0x281   : > { %v9485_v57 = vadd.f32 %v3100_v42, %v2827_v63 }
 0x282   : > { %7667 = vmatmul.mubr.bf16.gmra.mrb[196].mxu0 %v10147_v32  ;;  %v7344_v31 = vpop.f32.mrb[64].mxu1 }
 0x283   : > { %7670 = vmatprep.mubr.bf16.mxu0 %v10148_v5  ;;  %v2836_v9 = vadd.f32 %v7344_v31, %v9344_v61  ;;  %v2643_v16 = vpop.f32.mrb[65].mxu1  ;;  %v10152_v31 = vld [vmem:[#allocation46_spill] sm:$0xff] }
 0x284   : > { %v2834_v34 = vadd.f32 %v2643_v16, %v9346_v4  ;;  %v7345_v25 = vpop.f32.mrb[66].mxu1 }
 0x285   : > { %v7404_v47 = vpop.f32.mrb[92].mxu0  ;;  %v2837_v56 = vadd.f32 %v7345_v25, %v9348_v15  ;;  %v2646_v24 = vpop.f32.mrb[67].mxu1 }
 0x286   : > { %v3113_v6 = vpop.f32.mrb[93].mxu0 }
 0x287   : > { %v9492_v2 = vadd.f32 %v3113_v6, %v2830_v0  ;;  %v7405_v35 = vpop.f32.mrb[94].mxu0  ;;  %7611 = vmatmul.mubr.bf16.gmra.mrb[172].mxu1 %v10101_v53 }
 0x288   : > { %v9495_v63 = vadd.f32 %v7405_v35, %v2833_v33  ;;  %v3116_v44 = vpop.f32.mrb[95].mxu0  ;;  %7614 = vmatprep.mubr.bf16.mxu1 %v10102_v26  ;;  %v10153_v35 = vld [vmem:[#allocation47_spill] sm:$0xff] }
 0x289   : > { %v9498_v61 = vadd.f32 %v3116_v44, %v2831_v46  ;;  %v10154_v44 = vld [vmem:[#allocation48_spill] sm:$0xff] }
 0x28a   : > { %7671 = vmatmul.mubr.bf16.gmra.mrb[200].mxu0 %v10149_v19  ;;  %v7348_v4 = vpop.f32.mrb[68].mxu1 }
 0x28b   : > { %7674 = vmatprep.mubr.bf16.mxu0 %v10150_v43  ;;  %v2840_v15 = vadd.f32 %v7348_v4, %v9354_v7  ;;  %v2659_v23 = vpop.f32.mrb[69].mxu1  ;;  %v10151_v7 = vld [vmem:[#allocation45_spill] sm:$0xff] }
 0x28c   : > { %v7349_v0 = vpop.f32.mrb[70].mxu1 }
 0x28d   : > { %v7408_v29 = vpop.f32.mrb[96].mxu0  ;;  %v2662_v36 = vpop.f32.mrb[71].mxu1 }
 0x28e   : > { %v9503_v55 = vadd.f32 %v7408_v29, %v2836_v9  ;;  %v3129_v53 = vpop.f32.mrb[97].mxu0  ;;  %v2839_v33 = vadd.f32 %v2662_v36, %v9358_v52  ;;  %v10156_v29 = vld [vmem:[#allocation26_spill] sm:$0xff] }
 0x28f   : > { %v9506_v8 = vadd.f32 %v3129_v53, %v2834_v34  ;;  %v7409_v26 = vpop.f32.mrb[98].mxu0  ;;  %7615 = vmatmul.mubr.bf16.gmra.mrb[176].mxu1 %v8646_v11  ;;  %v5037_v36 = vshll.u32 %v10156_v29, 16  ;;  %v9530_v53 = vld [vmem:[#allocation2 + $0xd0] sm:$0xff]  }
 0x290   : > { %v9509_v46 = vadd.f32 %v7409_v26, %v2837_v56  ;;  %v3132_v42 = vpop.f32.mrb[99].mxu0  ;;  %7618 = vmatprep.mubr.bf16.mxu1 %v8650_v37 }
 0x292   : > { %7675 = vmatmul.mubr.bf16.gmra.mrb[204].mxu0 %v10151_v7  ;;  %v7352_v32 = vpop.f32.mrb[72].mxu1 }
 0x293   : > { %7678 = vmatprep.mubr.bf16.mxu0 %v10152_v31  ;;  %v2675_v5 = vpop.f32.mrb[73].mxu1  ;;  %v10157_v32 = vld [vmem:[#allocation49_spill] sm:$0xff]  ;;  %v10158_v31 = vld [vmem:[#allocation50_spill] sm:$0xff] }
 0x294   : > { %v2842_v9 = vadd.f32 %v2675_v5, %v9368_v13  ;;  %v7353_v16 = vpop.f32.mrb[74].mxu1 }
 0x295   : > { %v7412_v52 = vpop.f32.mrb[100].mxu0  ;;  %v2845_v34 = vadd.f32 %v7353_v16, %v9372_v12  ;;  %v2678_v25 = vpop.f32.mrb[75].mxu1  ;;  %v5039_v16 = vrot.slane %v5037_v36, 1 }
 0x296   : > { %v9516_v47 = vadd.f32 %v7412_v52, %v2840_v15  ;;  %v3145_v11 = vpop.f32.mrb[101].mxu0  ;;  %v2843_v56 = vadd.f32 %v2678_v25, %v9374_v3  ;;  %v10155_v3 = vld [vmem:[#allocation24_spill] sm:$0xff]  ;;  %v5041_v52 = vshrl.u32 %v10156_v29, 16 }
 0x297   : > { %v7413_v24 = vpop.f32.mrb[102].mxu0  ;;  %7619 = vmatmul.mubr.bf16.gmra.mrb[180].mxu1 %v8660_v58  ;;  %v5029_v15 = vshll.u32 %v10155_v3, 16 }
 0x298   : > { %v3148_v37 = vpop.f32.mrb[103].mxu0  ;;  %7622 = vmatprep.mubr.bf16.mxu1 %v8678_v20  ;;  %v9547_v24 = vld [vmem:[#allocation2 + $0xd8] ss:$0 sps:$4 sm:$0xff]  }
 0x299   : > { %v9521_v6 = vadd.f32 %v3148_v37, %v2839_v33  ;;  %v5031_v42 = vrot.slane %v5029_v15, 1  ;;  %v5043_v15 = vor.u32 %v5041_v52, %v5039_v16  ;;  %v5053_v36 = vshll.u32 %v9547_v24, 16 }
 0x29a   : > { %7679 = vmatmul.mubr.bf16.gmra.mrb[208].mxu0 %v10153_v35  ;;  %v7356_v13 = vpop.f32.mrb[76].mxu1 }
 0x29b   : > { %7682 = vmatprep.mubr.bf16.mxu0 %v10154_v44  ;;  %v2848_v12 = vadd.f32 %v7356_v13, %v9378_v40  ;;  %v2691_v19 = vpop.f32.mrb[77].mxu1  ;;  %v5032_v5 = vsel %vm1768_vm8, %v10158_v31, %v5031_v42  ;;  %v5055_v31 = vrot.slane %v5053_v36, 1 }
 0x29c   : > { %v2846_v4 = vadd.f32 %v2691_v19, %v9382_v28  ;;  %v7357_v43 = vpop.f32.mrb[78].mxu1 }
 0x29d   : > { %v7416_v23 = vpop.f32.mrb[104].mxu0  ;;  %v2849_v58 = vadd.f32 %v7357_v43, %v9384_v45  ;;  %v2694_v0 = vpop.f32.mrb[79].mxu1  ;;  %v5033_v45 = vshrl.u32 %v10155_v3, 16 }
 0x29e   : > { %v3161_v20 = vpop.f32.mrb[105].mxu0 }
 0x29f   : > { %v9532_v33 = vadd.f32 %v3161_v20, %v2842_v9  ;;  %v7417_v26 = vpop.f32.mrb[106].mxu0  ;;  %7623 = vmatmul.mubr.bf16.gmra.mrb[184].mxu1 %v10155_v3  ;;  %v5035_v13 = vor.u32 %v5033_v45, %v5031_v42  ;;  %v10159_v42 = vld [vmem:[#allocation40_spill] sm:$0xff] }
 0x2a0   : > { %v9535_v40 = vadd.f32 %v7417_v26, %v2845_v34  ;;  %v3164_v28 = vpop.f32.mrb[107].mxu0  ;;  %7626 = vmatprep.mubr.bf16.mxu1 %v10156_v29  ;;  %v5045_v34 = vshll.u32 %v9530_v53, 16 }
 0x2a1   : > { %v9538_v7 = vadd.f32 %v3164_v28, %v2843_v56 }
 0x2a2   : > { %7683 = vmatmul.mubr.bf16.gmra.mrb[212].mxu0 %v10157_v32  ;;  %v7360_v9 = vpop.f32.mrb[80].mxu1  ;;  %v5047_v23 = vrot.slane %v5045_v34, 1 }
 0x2a3   : > { %7686 = vmatprep.mubr.bf16.mxu0 %v5032_v5  ;;  %v2852_v25 = vadd.f32 %v7360_v9, %v9394_v1  ;;  %v2707_v11 = vpop.f32.mrb[81].mxu1  ;;  %v5049_v1 = vshrl.u32 %v9530_v53, 16 }
 0x2a4   : > { %v7361_v56 = vpop.f32.mrb[82].mxu1 }
 0x2a5   : > { %v7420_v37 = vpop.f32.mrb[108].mxu0  ;;  %v2710_v35 = vpop.f32.mrb[83].mxu1  ;;  %v5051_v32 = vor.u32 %v5049_v1, %v5047_v23 }
 0x2a6   : > { %v9549_v44 = vadd.f32 %v7420_v37, %v2848_v12  ;;  %v3177_v19 = vpop.f32.mrb[109].mxu0  ;;  %v2851_v43 = vadd.f32 %v2710_v35, %v9399_v62  ;;  %v5040_v12 = vsel %vm1768_vm8, %v5035_v13, %v5039_v16  ;;  %v5048_v62 = vsel %vm1768_vm8, %v5043_v15, %v5047_v23  ;;  %v10160_v13 = vld [vmem:[#allocation38_spill] sm:$0xff]  ;;  %v10161_v15 = vld [vmem:[#allocation65_spill] sm:$0xff] }
 0x2a7   : > { %v9552_v0 = vadd.f32 %v3177_v19, %v2846_v4  ;;  %v7421_v20 = vpop.f32.mrb[110].mxu0  ;;  %7627 = vmatmul.mubr.bf16.gmra.mrb[188].mxu1 %v9530_v53  ;;  %v5056_v35 = vsel %vm1768_vm8, %v5051_v32, %v5055_v31  ;;  %v10164_v31 = vld [vmem:[#allocation67_spill] sm:$0xff] }
 0x2a8   : > { %v9557_v26 = vadd.f32 %v7421_v20, %v2849_v58  ;;  %v3180_v28 = vpop.f32.mrb[111].mxu0  ;;  %7718 = vmatprep.mubr.bf16.mxu1 %v10159_v42  ;;  %v10162_v20 = vld [vmem:[#allocation51_spill] sm:$0xff] }
 0x2aa   : > { %7687 = vmatmul.mubr.bf16.gmra.mrb[216].mxu0 %v5040_v12  ;;  %v7364_v45 = vpop.f32.mrb[84].mxu1 }
 0x2ab   : > { %7690 = vmatprep.mubr.bf16.mxu0 %v5048_v62  ;;  %v2723_v4 = vpop.f32.mrb[85].mxu1 }
 0x2ac   : > { %v2854_v5 = vadd.f32 %v2723_v4, %v9409_v22  ;;  %v7365_v9 = vpop.f32.mrb[86].mxu1 }
 0x2ad   : > { %v7424_v52 = vpop.f32.mrb[112].mxu0  ;;  %v2857_v58 = vadd.f32 %v7365_v9, %v9412_v49  ;;  %v2726_v34 = vpop.f32.mrb[87].mxu1  ;;  %v10165_v9 = vld [vmem:[#allocation37_spill] sm:$0xff] }
 0x2ae   : > { %v9564_v11 = vadd.f32 %v7424_v52, %v2852_v25  ;;  %v3193_v56 = vpop.f32.mrb[113].mxu0  ;;  %v2855_v16 = vadd.f32 %v2726_v34, %v9415_v51  ;;  %v10166_v52 = vld [vmem:[#allocation9_spill] sm:$0xff] }
 0x2af   : > { %v7425_v37 = vpop.f32.mrb[114].mxu0  ;;  %7719 = vmatmul.mubr.bf16.vlgmr.msra.gmra.mrb[192].mxu1 %v10160_v13 }
 0x2b0   : > { %v3196_v19 = vpop.f32.mrb[115].mxu0  ;;  %7722 = vmatprep.mubr.bf16.mxu1 %v10161_v15  ;;  %v10167_v15 = vld [vmem:[#allocation68_spill] sm:$0xff] }
 0x2b1   : > { %v9570_v23 = vadd.f32 %v3196_v19, %v2851_v43  ;;  %v10163_v43 = vld [vmem:[#allocation66_spill] sm:$0xff] }
 0x2b2   : > { %7691 = vmatmul.mubr.bf16.gmra.mrb[220].mxu0 %v5056_v35  ;;  %v7368_v22 = vpop.f32.mrb[88].mxu1 }
 0x2b3   : > { %7710 = vmatprep.mubr.bf16.mxu0 %v10162_v20  ;;  %v2860_v49 = vadd.f32 %v7368_v22, %v9426_v14  ;;  %v2739_v25 = vpop.f32.mrb[89].mxu1 }
 0x2b4   : > { %v2858_v1 = vadd.f32 %v2739_v25, %v9428_v38  ;;  %v7369_v51 = vpop.f32.mrb[90].mxu1  ;;  %v10168_v25 = vld [vmem:[#allocation28_spill] sm:$0xff] }
 0x2b5   : > { %v7428_v36 = vpop.f32.mrb[116].mxu0  ;;  %v2861_v28 = vadd.f32 %v7369_v51, %v9431_v41  ;;  %v2742_v42 = vpop.f32.mrb[91].mxu1 }
 0x2b6   : > { %v3209_v12 = vpop.f32.mrb[117].mxu0 }
 0x2b7   : > { %v9576_v62 = vadd.f32 %v3209_v12, %v2854_v5  ;;  %v7429_v45 = vpop.f32.mrb[118].mxu0  ;;  %7723 = vmatmul.mubr.bf16.gmra.mrb[196].mxu1 %v10163_v43 }
 0x2b8   : > { %v9579_v4 = vadd.f32 %v7429_v45, %v2857_v58  ;;  %v3212_v32 = vpop.f32.mrb[119].mxu0  ;;  %7726 = vmatprep.mubr.bf16.mxu1 %v10164_v31  ;;  %v10170_v31 = vld [vmem:[#allocation29_spill] sm:$0xff] }
 0x2b9   : > { %v9582_v14 = vadd.f32 %v3212_v32, %v2855_v16 }
 0x2ba   : > { %7711 = vmatmul.mubr.bf16.vlgmr.msra.gmra.mrb[224].mxu0 %v10165_v9  ;;  %v7372_v38 = vpop.f32.mrb[92].mxu1 }
 0x2bb   : > { %7714 = vmatprep.mubr.bf16.mxu0 %v10166_v52  ;;  %v2864_v41 = vadd.f32 %v7372_v38, %v9444_v50  ;;  %v2755_v34 = vpop.f32.mrb[93].mxu1  ;;  %v10169_v50 = vld [vmem:[#allocation7_spill] sm:$0xff] }
 0x2bc   : > { %v7373_v5 = vpop.f32.mrb[94].mxu1 }
 0x2bd   : > { %v7432_v56 = vpop.f32.mrb[120].mxu0  ;;  %v2758_v37 = vpop.f32.mrb[95].mxu1 }
 0x2be   : > { %v9587_v35 = vadd.f32 %v7432_v56, %v2860_v49  ;;  %v3225_v58 = vpop.f32.mrb[121].mxu0  ;;  %v2863_v13 = vadd.f32 %v2758_v37, %v9449_v17 }
 0x2bf   : > { %v9590_v19 = vadd.f32 %v3225_v58, %v2858_v1  ;;  %v7433_v16 = vpop.f32.mrb[122].mxu0  ;;  %7727 = vmatmul.mubr.bf16.gmra.mrb[200].mxu1 %v10167_v15 }
 0x2c0   : > { %v9593_v22 = vadd.f32 %v7433_v16, %v2861_v28  ;;  %v3228_v20 = vpop.f32.mrb[123].mxu0  ;;  %7730 = vmatprep.mubr.bf16.mxu1 %v10168_v25 }
 0x2c2   : > { %7715 = vmatmul.mubr.bf16.gmra.mrb[228].mxu0 %v10169_v50  ;;  %v7456_v51 = vpop.f32.mrb[96].mxu1 }
 0x2c3   : > { %v3722_v36 = vpop.f32.mrb[97].mxu1 }
 0x2c4   : > { %v3961_v49 = vadd.f32 %v3722_v36, %v9456_v48  ;;  %v7457_v42 = vpop.f32.mrb[98].mxu1 }
 0x2c5   : > { %v7436_v12 = vpop.f32.mrb[124].mxu0  ;;  %v3964_v17 = vadd.f32 %v7457_v42, %v9459_v10  ;;  %v3725_v1 = vpop.f32.mrb[99].mxu1 }
 0x2c6   : > { %v9599_v45 = vadd.f32 %v7436_v12, %v2864_v41  ;;  %v3241_v43 = vpop.f32.mrb[125].mxu0  ;;  %v3962_v28 = vadd.f32 %v3725_v1, %v9462_v54  ;;  %v10171_v12 = vld [vmem:[#allocation31_spill] sm:$0xff]  ;;  %v10172_v1 = vld [vmem:[#allocation33_spill] sm:$0xff] }
 0x2c7   : > { %v7437_v32 = vpop.f32.mrb[126].mxu0  ;;  %7731 = vmatmul.mubr.bf16.gmra.mrb[204].mxu1 %v10170_v31 }
 0x2c8   : > { %v3244_v9 = vpop.f32.mrb[127].mxu0  ;;  %7734 = vmatprep.mubr.bf16.mxu1 %v9181_v60 }
 0x2c9   : > { %v9604_v38 = vadd.f32 %v3244_v9, %v2863_v13 }
 0x2ca   : > { %v7460_v52 = vpop.f32.mrb[100].mxu1 }
 0x2cb   : > { %v3967_v48 = vadd.f32 %v7460_v52, %v9467_v21  ;;  %v3738_v34 = vpop.f32.mrb[101].mxu1 }
 0x2cc   : > { %v3965_v10 = vadd.f32 %v3738_v34, %v9470_v27  ;;  %v7461_v5 = vpop.f32.mrb[102].mxu1 }
 0x2cd   : > { %v7520_v41 = vpop.f32.mrb[128].mxu0  ;;  %v3968_v56 = vadd.f32 %v7461_v5, %v9473_v30  ;;  %v3741_v37 = vpop.f32.mrb[103].mxu1  ;;  %v10173_v5 = vld [vmem:[#allocation34_spill] sm:$0xff] }
 0x2ce   : > { %v4229_v54 = vpop.f32.mrb[129].mxu0 }
 0x2cf   : > { %v9609_v58 = vadd.f32 %v4229_v54, %v3961_v49  ;;  %v7521_v16 = vpop.f32.mrb[130].mxu0  ;;  %7735 = vmatmul.mubr.bf16.gmra.mrb[208].mxu1 %v9185_v18 }
 0x2d0   : > { %v9612_v60 = vadd.f32 %v7521_v16, %v3964_v17  ;;  %v4232_v13 = vpop.f32.mrb[131].mxu0  ;;  %7738 = vmatprep.mubr.bf16.mxu1 %v9193_v39 }
 0x2d1   : > { %v9615_v21 = vadd.f32 %v4232_v13, %v3962_v28 }
 0x2d2   : > { %v7464_v15 = vpop.f32.mrb[104].mxu1 }
 0x2d3   : > { %v3971_v27 = vadd.f32 %v7464_v15, %v9480_v59  ;;  %v3754_v20 = vpop.f32.mrb[105].mxu1 }
 0x2d4   : > { %v7465_v25 = vpop.f32.mrb[106].mxu1 }
 0x2d5   : > { %v7524_v30 = vpop.f32.mrb[132].mxu0  ;;  %v3757_v50 = vpop.f32.mrb[107].mxu1 }
 0x2d6   : > { %v9618_v51 = vadd.f32 %v7524_v30, %v3967_v48  ;;  %v4245_v36 = vpop.f32.mrb[133].mxu0  ;;  %v3970_v49 = vadd.f32 %v3757_v50, %v9485_v57 }
 0x2d7   : > { %v9621_v18 = vadd.f32 %v4245_v36, %v3965_v10  ;;  %v7525_v42 = vpop.f32.mrb[134].mxu0  ;;  %7739 = vmatmul.mubr.bf16.gmra.mrb[212].mxu1 %v10171_v12  ;;  %v10175_v36 = vld [vmem:[#allocation70_spill] sm:$0xff] }
 0x2d8   : > { %v9624_v39 = vadd.f32 %v7525_v42, %v3968_v56  ;;  %v4248_v17 = vpop.f32.mrb[135].mxu0  ;;  %7742 = vmatprep.mubr.bf16.mxu1 %v10172_v1  ;;  %v10174_v56 = vld [vmem:[#allocation69_spill] sm:$0xff] }
 0x2d9   : > { %v5497_v17 = vrot.slane %v10156_v29, 1 }
 0x2da   : > { %v7468_v59 = vpop.f32.mrb[108].mxu1 }
 0x2db   : > { %v3770_v43 = vpop.f32.mrb[109].mxu1  ;;  %v5499_v59 = vrot.slane %v9530_v53, 1  ;;  %v5501_v53 = vrot.slane %v9547_v24, 1 }
 0x2dc   : > { %v3973_v28 = vadd.f32 %v3770_v43, %v9492_v2  ;;  %v7469_v32 = vpop.f32.mrb[110].mxu1 }
 0x2dd   : > { %v7528_v31 = vpop.f32.mrb[136].mxu0  ;;  %v3976_v9 = vadd.f32 %v7469_v32, %v9495_v63  ;;  %v3773_v52 = vpop.f32.mrb[111].mxu1  ;;  %v5495_v63 = vrot.slane %v10155_v3, 1  ;;  %v5500_v29 = vsel %vm2423_vm9, %v5497_v17, %v5499_v59 }
 0x2de   : > { %v9629_v57 = vadd.f32 %v7528_v31, %v3971_v27  ;;  %v4261_v48 = vpop.f32.mrb[137].mxu0  ;;  %v3974_v34 = vadd.f32 %v3773_v52, %v9498_v61 }
 0x2df   : > { %v7529_v10 = vpop.f32.mrb[138].mxu0  ;;  %7743 = vmatmul.mubr.bf16.gmra.mrb[216].mxu1 %v10173_v5  ;;  %v5498_v48 = vsel %vm2423_vm9, %v5495_v63, %v5497_v17 }
 0x2e0   : > { %v4264_v41 = vpop.f32.mrb[139].mxu0  ;;  %7746 = vmatprep.mubr.bf16.mxu1 %v10174_v56 }
 0x2e1   : > { %v9634_v37 = vadd.f32 %v4264_v41, %v3970_v49  ;;  %v10176_v49 = vld [vmem:[#allocation36_spill] sm:$0xff] }
 0x2e2   : > { %v7472_v54 = vpop.f32.mrb[112].mxu1  ;;  %v5496_v42 = vsel %vm2423_vm9, %v10176_v49, %v5495_v63 }
 0x2e3   : > { %v3979_v2 = vadd.f32 %v7472_v54, %v9503_v55  ;;  %v3786_v16 = vpop.f32.mrb[113].mxu1 }
 0x2e4   : > { %v3977_v13 = vadd.f32 %v3786_v16, %v9506_v8  ;;  %v7473_v15 = vpop.f32.mrb[114].mxu1 }
 0x2e5   : > { %v7532_v27 = vpop.f32.mrb[140].mxu0  ;;  %v3980_v61 = vadd.f32 %v7473_v15, %v9509_v46  ;;  %v3789_v20 = vpop.f32.mrb[115].mxu1 }
 0x2e6   : > { %v4277_v25 = vpop.f32.mrb[141].mxu0 }
 0x2e7   : > { %v9640_v30 = vadd.f32 %v4277_v25, %v3973_v28  ;;  %v7533_v50 = vpop.f32.mrb[142].mxu0  ;;  %7747 = vmatmul.mubr.bf16.gmra.mrb[220].mxu1 %v10175_v36 }
 0x2e8   : > { %v9645_v55 = vadd.f32 %v7533_v50, %v3976_v9  ;;  %v4280_v12 = vpop.f32.mrb[143].mxu0  ;;  %7750 = vmatprep.mubr.bf16.mxu1 %v5496_v42 }
 0x2e9   : > { %v9647_v3 = vadd.f32 %v4280_v12, %v3974_v34 }
 0x2ea   : > { %v7476_v8 = vpop.f32.mrb[116].mxu1 }
 0x2eb   : > { %v3983_v46 = vadd.f32 %v7476_v8, %v9516_v47  ;;  %v3802_v1 = vpop.f32.mrb[117].mxu1 }
 0x2ec   : > { %v7477_v43 = vpop.f32.mrb[118].mxu1 }
 0x2ed   : > { %v7536_v28 = vpop.f32.mrb[144].mxu0  ;;  %v3805_v32 = vpop.f32.mrb[119].mxu1 }
 0x2ee   : > { %v9652_v31 = vadd.f32 %v7536_v28, %v3979_v2  ;;  %v4293_v52 = vpop.f32.mrb[145].mxu0  ;;  %v3982_v9 = vadd.f32 %v3805_v32, %v9521_v6  ;;  %v5502_v6 = vsel %vm2423_vm9, %v5499_v59, %v5501_v53 }
 0x2ef   : > { %v9656_v34 = vadd.f32 %v4293_v52, %v3977_v13  ;;  %v7537_v10 = vpop.f32.mrb[146].mxu0  ;;  %7751 = vmatmul.mubr.bf16.gmra.mrb[224].mxu1 %v5498_v48 }
 0x2f0   : > { %v9659_v47 = vadd.f32 %v7537_v10, %v3980_v61  ;;  %v4296_v5 = vpop.f32.mrb[147].mxu0  ;;  %7754 = vmatprep.mubr.bf16.mxu1 %v5500_v29 }
 0x2f2   : > { %v7480_v41 = vpop.f32.mrb[120].mxu1 }
 0x2f3   : > { %v3818_v56 = vpop.f32.mrb[121].mxu1 }
 0x2f4   : > { %v3985_v54 = vadd.f32 %v3818_v56, %v9532_v33  ;;  %v7481_v2 = vpop.f32.mrb[122].mxu1 }
 0x2f5   : > { %v7540_v16 = vpop.f32.mrb[148].mxu0  ;;  %v3988_v63 = vadd.f32 %v7481_v2, %v9535_v40  ;;  %v3821_v13 = vpop.f32.mrb[123].mxu1 }
 0x2f6   : > { %v9665_v15 = vadd.f32 %v7540_v16, %v3983_v46  ;;  %v4309_v27 = vpop.f32.mrb[149].mxu0  ;;  %v3986_v61 = vadd.f32 %v3821_v13, %v9538_v7 }
 0x2f7   : > { %v7541_v20 = vpop.f32.mrb[150].mxu0  ;;  %7755 = vmatmul.mubr.bf16.gmra.mrb[228].mxu1 %v5502_v6 }
 0x2f8   : > { %v4312_v25 = vpop.f32.mrb[151].mxu0 }
 0x2f9   : > { %v9668_v24 = vadd.f32 %v4312_v25, %v3982_v9 }
 0x2fa   : > { %v7484_v50 = vpop.f32.mrb[124].mxu1 }
 0x2fb   : > { %v3991_v33 = vadd.f32 %v7484_v50, %v9549_v44  ;;  %v3834_v36 = vpop.f32.mrb[125].mxu1 }
 0x2fc   : > { %v3989_v49 = vadd.f32 %v3834_v36, %v9552_v0  ;;  %v7485_v42 = vpop.f32.mrb[126].mxu1 }
 0x2fd   : > { %v7544_v12 = vpop.f32.mrb[152].mxu0  ;;  %v3992_v40 = vadd.f32 %v7485_v42, %v9557_v26  ;;  %v3837_v8 = vpop.f32.mrb[127].mxu1 }
 0x2fe   : > { %v4325_v17 = vpop.f32.mrb[153].mxu0 }
 0x2ff   : > { %v9673_v46 = vadd.f32 %v4325_v17, %v3985_v54  ;;  %v7545_v7 = vpop.f32.mrb[154].mxu0 }
 0x300   : > { %v9675_v1 = vadd.f32 %v7545_v7, %v3988_v63  ;;  %v4328_v59 = vpop.f32.mrb[155].mxu0 }
 0x301   : > { %v9677_v43 = vadd.f32 %v4328_v59, %v3986_v61 }
 0x302   : > { %v7488_v28 = vpop.f32.mrb[128].mxu1 }
 0x303   : > { %v3995_v44 = vadd.f32 %v7488_v28, %v9564_v11  ;;  %v3850_v32 = vpop.f32.mrb[129].mxu1 }
 0x304   : > { %v7489_v52 = vpop.f32.mrb[130].mxu1 }
 0x305   : > { %v7548_v0 = vpop.f32.mrb[156].mxu0  ;;  %v3853_v9 = vpop.f32.mrb[131].mxu1 }
 0x306   : > { %v9680_v48 = vadd.f32 %v7548_v0, %v3991_v33  ;;  %v4341_v26 = vpop.f32.mrb[157].mxu0  ;;  %v3994_v10 = vadd.f32 %v3853_v9, %v9570_v23 }
 0x307   : > { %v9683_v29 = vadd.f32 %v4341_v26, %v3989_v49  ;;  %v7549_v5 = vpop.f32.mrb[158].mxu0 }
 0x308   : > { %v9685_v53 = vadd.f32 %v7549_v5, %v3992_v40  ;;  %v4344_v41 = vpop.f32.mrb[159].mxu0 }
 0x30a   : > { %v7492_v56 = vpop.f32.mrb[132].mxu1 }
 0x30b   : > { %v3866_v54 = vpop.f32.mrb[133].mxu1 }
 0x30c   : > { %v3997_v2 = vadd.f32 %v3866_v54, %v9576_v62  ;;  %v7493_v11 = vpop.f32.mrb[134].mxu1 }
 0x30d   : > { %v7552_v6 = vpop.f32.mrb[160].mxu0  ;;  %v4000_v16 = vadd.f32 %v7493_v11, %v9579_v4  ;;  %v3869_v63 = vpop.f32.mrb[135].mxu1 }
 0x30e   : > { %v9689_v13 = vadd.f32 %v7552_v6, %v3995_v44  ;;  %v4357_v27 = vpop.f32.mrb[161].mxu0  ;;  %v3998_v23 = vadd.f32 %v3869_v63, %v9582_v14 }
 0x30f   : > { %v7553_v61 = vpop.f32.mrb[162].mxu0 }
 0x310   : > { %v4360_v20 = vpop.f32.mrb[163].mxu0 }
 0x311   : > { %v9692_v25 = vadd.f32 %v4360_v20, %v3994_v10 }
 0x312   : > { %v7496_v50 = vpop.f32.mrb[136].mxu1 }
 0x313   : > { %v4003_v33 = vadd.f32 %v7496_v50, %v9587_v35  ;;  %v3882_v36 = vpop.f32.mrb[137].mxu1 }
 0x314   : > { %v4001_v62 = vadd.f32 %v3882_v36, %v9590_v19  ;;  %v7497_v49 = vpop.f32.mrb[138].mxu1 }
 0x315   : > { %v7556_v42 = vpop.f32.mrb[164].mxu0  ;;  %v4004_v4 = vadd.f32 %v7497_v49, %v9593_v22  ;;  %v3885_v12 = vpop.f32.mrb[139].mxu1 }
 0x316   : > { %v4373_v40 = vpop.f32.mrb[165].mxu0 }
 0x317   : > { %v9697_v8 = vadd.f32 %v4373_v40, %v3997_v2  ;;  %v7557_v17 = vpop.f32.mrb[166].mxu0 }
 0x318   : > { %v9699_v14 = vadd.f32 %v7557_v17, %v4000_v16  ;;  %v4376_v7 = vpop.f32.mrb[167].mxu0 }
 0x319   : > { %v9701_v59 = vadd.f32 %v4376_v7, %v3998_v23 }
 0x31a   : > { %v7500_v28 = vpop.f32.mrb[140].mxu1 }
 0x31b   : > { %v4007_v35 = vadd.f32 %v7500_v28, %v9599_v45  ;;  %v3898_v44 = vpop.f32.mrb[141].mxu1 }
 0x31c   : > { %v7501_v32 = vpop.f32.mrb[142].mxu1 }
 0x31d   : > { %v7560_v19 = vpop.f32.mrb[168].mxu0  ;;  %v3901_v52 = vpop.f32.mrb[143].mxu1 }
 0x31e   : > { %v9704_v0 = vadd.f32 %v7560_v19, %v4003_v33  ;;  %v4389_v22 = vpop.f32.mrb[169].mxu0  ;;  %v4006_v9 = vadd.f32 %v3901_v52, %v9604_v38 }
 0x31f   : > { %v9707_v26 = vadd.f32 %v4389_v22, %v4001_v62  ;;  %v7561_v10 = vpop.f32.mrb[170].mxu0 }
 0x320   : > { %v9709_v5 = vadd.f32 %v7561_v10, %v4004_v4  ;;  %v4392_v41 = vpop.f32.mrb[171].mxu0 }
 0x322   : > { %v7584_v56 = vpop.f32.mrb[144].mxu1 }
 0x323   : > { %v4673_v54 = vpop.f32.mrb[145].mxu1 }
 0x324   : > { %v4912_v2 = vadd.f32 %v4673_v54, %v9609_v58  ;;  %v7585_v45 = vpop.f32.mrb[146].mxu1 }
 0x325   : > { %v7564_v11 = vpop.f32.mrb[172].mxu0  ;;  %v4915_v6 = vadd.f32 %v7585_v45, %v9612_v60  ;;  %v4676_v16 = vpop.f32.mrb[147].mxu1 }
 0x326   : > { %v9713_v63 = vadd.f32 %v7564_v11, %v4007_v35  ;;  %v4405_v27 = vpop.f32.mrb[173].mxu0  ;;  %v4913_v38 = vadd.f32 %v4676_v16, %v9615_v21 }
 0x327   : > { %v7565_v23 = vpop.f32.mrb[174].mxu0 }
 0x328   : > { %v4408_v61 = vpop.f32.mrb[175].mxu0 }
 0x329   : > { %v9716_v20 = vadd.f32 %v4408_v61, %v4006_v9 }
 0x32a   : > { %v7588_v50 = vpop.f32.mrb[148].mxu1 }
 0x32b   : > { %v4918_v33 = vadd.f32 %v7588_v50, %v9618_v51  ;;  %v4689_v36 = vpop.f32.mrb[149].mxu1 }
 0x32c   : > { %v4916_v58 = vadd.f32 %v4689_v36, %v9621_v18  ;;  %v7589_v62 = vpop.f32.mrb[150].mxu1 }
 0x32d   : > { %v7648_v49 = vpop.f32.mrb[176].mxu0  ;;  %v4919_v60 = vadd.f32 %v7589_v62, %v9624_v39  ;;  %v4692_v42 = vpop.f32.mrb[151].mxu1 }
 0x32e   : > { %v5143_v4 = vpop.f32.mrb[177].mxu0 }
 0x32f   : > { %v9721_v12 = vadd.f32 %v5143_v4, %v4912_v2  ;;  %v7649_v40 = vpop.f32.mrb[178].mxu0 }
 0x330   : > { %v9723_v21 = vadd.f32 %v7649_v40, %v4915_v6  ;;  %v5146_v17 = vpop.f32.mrb[179].mxu0 }
 0x331   : > { %v9725_v7 = vadd.f32 %v5146_v17, %v4913_v38 }
 0x332   : > { %v7592_v28 = vpop.f32.mrb[152].mxu1 }
 0x333   : > { %v4922_v51 = vadd.f32 %v7592_v28, %v9629_v57  ;;  %v4705_v35 = vpop.f32.mrb[153].mxu1 }
 0x334   : > { %v7593_v44 = vpop.f32.mrb[154].mxu1 }
 0x335   : > { %v7652_v18 = vpop.f32.mrb[180].mxu0  ;;  %v4708_v32 = vpop.f32.mrb[155].mxu1 }
 0x336   : > { %v9728_v19 = vadd.f32 %v7652_v18, %v4918_v33  ;;  %v5159_v39 = vpop.f32.mrb[181].mxu0  ;;  %v4921_v52 = vadd.f32 %v4708_v32, %v9634_v37 }
 0x337   : > { %v9731_v22 = vadd.f32 %v5159_v39, %v4916_v58  ;;  %v7653_v9 = vpop.f32.mrb[182].mxu0 }
 0x338   : > { %v9733_v10 = vadd.f32 %v7653_v9, %v4919_v60  ;;  %v5162_v41 = vpop.f32.mrb[183].mxu0 }
 0x33a   : > { %v7596_v56 = vpop.f32.mrb[156].mxu1 }
 0x33b   : > { %v4721_v54 = vpop.f32.mrb[157].mxu1 }
 0x33c   : > { %v4924_v2 = vadd.f32 %v4721_v54, %v9640_v30  ;;  %v7597_v57 = vpop.f32.mrb[158].mxu1 }
 0x33d   : > { %v7656_v45 = vpop.f32.mrb[184].mxu0  ;;  %v4927_v11 = vadd.f32 %v7597_v57, %v9645_v55  ;;  %v4724_v6 = vpop.f32.mrb[159].mxu1 }
 0x33e   : > { %v9737_v16 = vadd.f32 %v7656_v45, %v4922_v51  ;;  %v5175_v27 = vpop.f32.mrb[185].mxu0  ;;  %v4925_v37 = vadd.f32 %v4724_v6, %v9647_v3 }
 0x33f   : > { %v7657_v38 = vpop.f32.mrb[186].mxu0 }
 0x340   : > { %v5178_v23 = vpop.f32.mrb[187].mxu0 }
 0x341   : > { %v9740_v61 = vadd.f32 %v5178_v23, %v4921_v52 }
 0x342   : > { %v7600_v50 = vpop.f32.mrb[160].mxu1 }
 0x343   : > { %v4930_v33 = vadd.f32 %v7600_v50, %v9652_v31  ;;  %v4737_v36 = vpop.f32.mrb[161].mxu1 }
 0x344   : > { %v4928_v30 = vadd.f32 %v4737_v36, %v9656_v34  ;;  %v7601_v58 = vpop.f32.mrb[162].mxu1 }
 0x345   : > { %v7660_v62 = vpop.f32.mrb[188].mxu0  ;;  %v4931_v55 = vadd.f32 %v7601_v58, %v9659_v47  ;;  %v4740_v49 = vpop.f32.mrb[163].mxu1 }
 0x346   : > { %v5191_v60 = vpop.f32.mrb[189].mxu0 }
 0x347   : > { %v9745_v42 = vadd.f32 %v5191_v60, %v4924_v2  ;;  %v7661_v4 = vpop.f32.mrb[190].mxu0 }
 0x348   : > { %v9747_v3 = vadd.f32 %v7661_v4, %v4927_v11  ;;  %v5194_v40 = vpop.f32.mrb[191].mxu0 }
 0x349   : > { %v9749_v17 = vadd.f32 %v5194_v40, %v4925_v37 }
 0x34a   : > { %v7604_v28 = vpop.f32.mrb[164].mxu1 }
 0x34b   : > { %v4934_v31 = vadd.f32 %v7604_v28, %v9665_v15  ;;  %v4753_v51 = vpop.f32.mrb[165].mxu1 }
 0x34c   : > { %v7605_v35 = vpop.f32.mrb[166].mxu1 }
 0x34d   : > { %v7664_v34 = vpop.f32.mrb[192].mxu0  ;;  %v4756_v44 = vpop.f32.mrb[167].mxu1 }
 0x34e   : > { %v9752_v18 = vadd.f32 %v7664_v34, %v4930_v33  ;;  %v5207_v47 = vpop.f32.mrb[193].mxu0  ;;  %v4933_v32 = vadd.f32 %v4756_v44, %v9668_v24 }
 0x34f   : > { %v9755_v39 = vadd.f32 %v5207_v47, %v4928_v30  ;;  %v7665_v52 = vpop.f32.mrb[194].mxu0 }
 0x350   : > { %v9757_v9 = vadd.f32 %v7665_v52, %v4931_v55  ;;  %v5210_v41 = vpop.f32.mrb[195].mxu0 }
 0x352   : > { %v7608_v56 = vpop.f32.mrb[168].mxu1 }
 0x353   : > { %v4769_v54 = vpop.f32.mrb[169].mxu1 }
 0x354   : > { %v4936_v2 = vadd.f32 %v4769_v54, %v9673_v46  ;;  %v7609_v15 = vpop.f32.mrb[170].mxu1 }
 0x355   : > { %v7668_v57 = vpop.f32.mrb[196].mxu0  ;;  %v4939_v45 = vadd.f32 %v7609_v15, %v9675_v1  ;;  %v4772_v11 = vpop.f32.mrb[171].mxu1 }
 0x356   : > { %v9761_v6 = vadd.f32 %v7668_v57, %v4934_v31  ;;  %v5223_v27 = vpop.f32.mrb[197].mxu0  ;;  %v4937_v24 = vadd.f32 %v4772_v11, %v9677_v43 }
 0x357   : > { %v7669_v37 = vpop.f32.mrb[198].mxu0 }
 0x358   : > { %v5226_v38 = vpop.f32.mrb[199].mxu0 }
 0x359   : > { %v9764_v23 = vadd.f32 %v5226_v38, %v4933_v32 }
 0x35a   : > { %v7612_v50 = vpop.f32.mrb[172].mxu1 }
 0x35b   : > { %v4942_v33 = vadd.f32 %v7612_v50, %v9680_v48  ;;  %v4785_v36 = vpop.f32.mrb[173].mxu1 }
 0x35c   : > { %v4940_v46 = vadd.f32 %v4785_v36, %v9683_v29  ;;  %v7613_v30 = vpop.f32.mrb[174].mxu1 }
 0x35d   : > { %v7672_v58 = vpop.f32.mrb[200].mxu0  ;;  %v4943_v1 = vadd.f32 %v7613_v30, %v9685_v53  ;;  %v4788_v62 = vpop.f32.mrb[175].mxu1 }
 0x35e   : > { %v5239_v55 = vpop.f32.mrb[201].mxu0 }
 0x35f   : > { %v9769_v49 = vadd.f32 %v5239_v55, %v4936_v2  ;;  %v7673_v60 = vpop.f32.mrb[202].mxu0 }
 0x360   : > { %v9771_v43 = vadd.f32 %v7673_v60, %v4939_v45  ;;  %v5242_v4 = vpop.f32.mrb[203].mxu0 }
 0x361   : > { %v9773_v40 = vadd.f32 %v5242_v4, %v4937_v24 }
 0x362   : > { %v7616_v28 = vpop.f32.mrb[176].mxu1 }
 0x363   : > { %v4946_v48 = vadd.f32 %v7616_v28, %v9689_v13  ;;  %v4801_v31 = vpop.f32.mrb[177].mxu1 }
 0x364   : > { %v7617_v51 = vpop.f32.mrb[178].mxu1 }
 0x365   : > { %v7676_v29 = vpop.f32.mrb[204].mxu0  ;;  %v4804_v35 = vpop.f32.mrb[179].mxu1 }
 0x366   : > { %v9776_v34 = vadd.f32 %v7676_v29, %v4942_v33  ;;  %v5255_v53 = vpop.f32.mrb[205].mxu0  ;;  %v4945_v44 = vadd.f32 %v4804_v35, %v9692_v25 }
 0x367   : > { %v9779_v47 = vadd.f32 %v5255_v53, %v4940_v46  ;;  %v7677_v32 = vpop.f32.mrb[206].mxu0 }
 0x368   : > { %v9781_v52 = vadd.f32 %v7677_v32, %v4943_v1  ;;  %v5258_v41 = vpop.f32.mrb[207].mxu0 }
 0x36a   : > { %v7620_v56 = vpop.f32.mrb[180].mxu1 }
 0x36b   : > { %v4817_v54 = vpop.f32.mrb[181].mxu1 }
 0x36c   : > { %v4948_v2 = vadd.f32 %v4817_v54, %v9697_v8  ;;  %v7621_v13 = vpop.f32.mrb[182].mxu1 }
 0x36d   : > { %v7680_v15 = vpop.f32.mrb[208].mxu0  ;;  %v4951_v57 = vadd.f32 %v7621_v13, %v9699_v14  ;;  %v4820_v45 = vpop.f32.mrb[183].mxu1 }
 0x36e   : > { %v9785_v11 = vadd.f32 %v7680_v15, %v4946_v48  ;;  %v5271_v27 = vpop.f32.mrb[209].mxu0  ;;  %v4949_v25 = vadd.f32 %v4820_v45, %v9701_v59 }
 0x36f   : > { %v7681_v24 = vpop.f32.mrb[210].mxu0 }
 0x370   : > { %v5274_v37 = vpop.f32.mrb[211].mxu0 }
 0x371   : > { %v9788_v38 = vadd.f32 %v5274_v37, %v4945_v44 }
 0x372   : > { %v7624_v50 = vpop.f32.mrb[184].mxu1 }
 0x373   : > { %v4954_v33 = vadd.f32 %v7624_v50, %v9704_v0  ;;  %v4833_v36 = vpop.f32.mrb[185].mxu1 }
 0x374   : > { %v4952_v8 = vadd.f32 %v4833_v36, %v9707_v26  ;;  %v7625_v46 = vpop.f32.mrb[186].mxu1 }
 0x375   : > { %v7684_v30 = vpop.f32.mrb[212].mxu0  ;;  %v4955_v14 = vadd.f32 %v7625_v46, %v9709_v5  ;;  %v4836_v58 = vpop.f32.mrb[187].mxu1 }
 0x376   : > { %v5287_v1 = vpop.f32.mrb[213].mxu0 }
 0x377   : > { %v9793_v62 = vadd.f32 %v5287_v1, %v4948_v2  ;;  %v7685_v55 = vpop.f32.mrb[214].mxu0 }
 0x378   : > { %v9795_v59 = vadd.f32 %v7685_v55, %v4951_v57  ;;  %v5290_v60 = vpop.f32.mrb[215].mxu0 }
 0x379   : > { %v9797_v4 = vadd.f32 %v5290_v60, %v4949_v25 }
 0x37a   : > { %v7628_v28 = vpop.f32.mrb[188].mxu1 }
 0x37b   : > { %v4958_v0 = vadd.f32 %v7628_v28, %v9713_v63  ;;  %v4849_v48 = vpop.f32.mrb[189].mxu1  ;;  %v9811_v63 = vld [vmem:[%s9910_s4] ss:$0 sm:$0xff] }
 0x37c   : > { %v7629_v31 = vpop.f32.mrb[190].mxu1 }
 0x37d   : > { %v7688_v26 = vpop.f32.mrb[216].mxu0  ;;  %v4852_v51 = vpop.f32.mrb[191].mxu1 }
 0x37e   : > { %v9800_v29 = vadd.f32 %v7688_v26, %v4954_v33  ;;  %v5303_v5 = vpop.f32.mrb[217].mxu0  ;;  %v4957_v35 = vadd.f32 %v4852_v51, %v9716_v20 }
 0x37f   : > { %v9803_v53 = vadd.f32 %v5303_v5, %v4952_v8  ;;  %v7689_v44 = vpop.f32.mrb[218].mxu0 }
 0x380   : > { %v9805_v32 = vadd.f32 %v7689_v44, %v4955_v14  ;;  %v5306_v41 = vpop.f32.mrb[219].mxu0 }
 0x382   : > { %v7720_v56 = vpop.f32.mrb[192].mxu1 }
 0x383   : > { %v5838_v54 = vadd.f32 %v7720_v56, %v9737_v16  ;;  %v5621_v2 = vpop.f32.mrb[193].mxu1 }
 0x384   : > { %v7721_v13 = vpop.f32.mrb[194].mxu1 }
 0x385   : > { %v7692_v15 = vpop.f32.mrb[220].mxu0  ;;  %v5624_v57 = vpop.f32.mrb[195].mxu1  ;;  %v5989_v27 = vadd.f32 %v9811_v63, %v5838_v54 }
 0x386   : > { %v9813_v20 = vadd.f32 %v7692_v15, %v4958_v0  ;;  %v5319_v45 = vpop.f32.mrb[221].mxu0  ;;  %v5837_v25 = vadd.f32 %v5624_v57, %v9740_v61 }
 0x387   : > { %v7693_v24 = vpop.f32.mrb[222].mxu0  ;;  %v6037_v33 = vmax.f32 %v5989_v27, 0.0 }
 0x388   : > { %v5322_v37 = vpop.f32.mrb[223].mxu0  ;;  %v5988_v16 = vadd.f32 %v9811_v63, %v5837_v25 }
 0x389   : > { %v9818_v50 = vadd.f32 %v5322_v37, %v4957_v35 }
 0x38a   : > { %v6036_v36 = vmax.f32 %v5988_v16, 0.0  ;;  %v7724_v8 = vpop.f32.mrb[196].mxu1 }
 0x38b   : > { %v5637_v46 = vpop.f32.mrb[197].mxu1 }
 0x38c   : > { %v6745_v30 = vpack.c.bf16 %v6037_v33, %v6036_v36  ;;  %v5840_v61 = vadd.f32 %v5637_v46, %v9745_v42  ;;  %v7725_v14 = vpop.f32.mrb[198].mxu1 }
 0x38d   : > { %v7712_v58 = vpop.f32.mrb[224].mxu0  ;;  %v5843_v1 = vadd.f32 %v7725_v14, %v9747_v3  ;;  %v5640_v55 = vpop.f32.mrb[199].mxu1 }
 0x38e   : > { %6809 = vst [vmem:[%s9825_s13 + $0x18] sm:$0xff] %v6745_v30   ;;  %v5589_v60 = vpop.f32.mrb[225].mxu0  ;;  %v5991_v28 = vadd.f32 %v9811_v63, %v5840_v61  ;;  %v5841_v0 = vadd.f32 %v5640_v55, %v9749_v17 }
 0x38f   : > { %v5828_v48 = vadd.f32 %v5589_v60, %v9721_v12  ;;  %v7713_v31 = vpop.f32.mrb[226].mxu0  ;;  %v5994_v12 = vadd.f32 %v9811_v63, %v5843_v1 }
 0x390   : > { %v5831_v26 = vadd.f32 %v7713_v31, %v9723_v21  ;;  %v5592_v51 = vpop.f32.mrb[227].mxu0  ;;  %v5992_v5 = vadd.f32 %v9811_v63, %v5841_v0  ;;  %v6039_v3 = vmax.f32 %v5991_v28, 0.0 }
 0x391   : > { %v5979_v42 = vadd.f32 %v9811_v63, %v5828_v48  ;;  %v5829_v35 = vadd.f32 %v5592_v51, %v9725_v7  ;;  %v6042_v46 = vmax.f32 %v5994_v12, 0.0 }
 0x392   : > { %v6040_v44 = vmax.f32 %v5992_v5, 0.0  ;;  %v7728_v41 = vpop.f32.mrb[200].mxu1  ;;  %v5982_v16 = vadd.f32 %v9811_v63, %v5831_v26 }
 0x393   : > { %v5980_v56 = vadd.f32 %v9811_v63, %v5829_v35  ;;  %v5846_v17 = vadd.f32 %v7728_v41, %v9752_v18  ;;  %v5653_v54 = vpop.f32.mrb[201].mxu1  ;;  %v6027_v15 = vmax.f32 %v5979_v42, 0.0 }
 0x394   : > { %v6750_v2 = vpack.c.bf16 %v6040_v44, %v6039_v3  ;;  %v5844_v21 = vadd.f32 %v5653_v54, %v9755_v39  ;;  %v7729_v13 = vpop.f32.mrb[202].mxu1  ;;  %v6030_v28 = vmax.f32 %v5982_v16, 0.0 }
 0x395   : > { %v6028_v57 = vmax.f32 %v5980_v56, 0.0  ;;  %v7716_v45 = vpop.f32.mrb[228].mxu0  ;;  %v5997_v7 = vadd.f32 %v9811_v63, %v5846_v17  ;;  %v5847_v27 = vadd.f32 %v7729_v13, %v9757_v9  ;;  %v5656_v25 = vpop.f32.mrb[203].mxu1 }
 0x396   : > { %6810 = vst [vmem:[%s9825_s13 + $0x20] sm:$0xff] %v6750_v2   ;;  %v5834_v24 = vadd.f32 %v7716_v45, %v9728_v19  ;;  %v5605_v18 = vpop.f32.mrb[229].mxu0  ;;  %v5995_v37 = vadd.f32 %v9811_v63, %v5844_v21 }
 0x397   : > { %v6730_v33 = vpack.c.bf16 %v6028_v57, %v6027_v15  ;;  %v5832_v39 = vadd.f32 %v5605_v18, %v9731_v22  ;;  %v7717_v36 = vpop.f32.mrb[230].mxu0  ;;  %v5998_v8 = vadd.f32 %v9811_v63, %v5847_v27  ;;  %v6045_v58 = vmax.f32 %v5997_v7, 0.0 }
 0x398   : > { %v5985_v30 = vadd.f32 %v9811_v63, %v5834_v24  ;;  %v5835_v9 = vadd.f32 %v7717_v36, %v9733_v10  ;;  %v6043_v61 = vmax.f32 %v5995_v37, 0.0  ;;  %v5608_v14 = vpop.f32.mrb[231].mxu0 }
 0x399   : > { %6731 = vst [vmem:[%s9825_s13] sm:$0xff] %v6730_v33   ;;  %v5983_v19 = vadd.f32 %v9811_v63, %v5832_v39  ;;  %v6046_v1 = vmax.f32 %v5998_v8, 0.0 }
 0x39a   : > { %v5986_v55 = vadd.f32 %v9811_v63, %v5835_v9  ;;  %v6755_v22 = vpack.c.bf16 %v6043_v61, %v6042_v46  ;;  %v7732_v60 = vpop.f32.mrb[204].mxu1  ;;  %v6033_v26 = vmax.f32 %v5985_v30, 0.0 }
 0x39b   : > { %v6031_v0 = vmax.f32 %v5983_v19, 0.0  ;;  %v6760_v48 = vpack.c.bf16 %v6046_v1, %v6045_v58  ;;  %v5850_v10 = vadd.f32 %v7732_v60, %v9761_v6  ;;  %v5669_v31 = vpop.f32.mrb[205].mxu1 }
 0x39c   : > { %v6034_v51 = vmax.f32 %v5986_v55, 0.0  ;;  %6811 = vst [vmem:[%s9825_s13 + $0x28] sm:$0xff] %v6755_v22   ;;  %v7733_v5 = vpop.f32.mrb[206].mxu1 }
 0x39d   : > { %v6735_v42 = vpack.c.bf16 %v6031_v0, %v6030_v28  ;;  %6812 = vst [vmem:[%s9825_s13 + $0x30] sm:$0xff] %v6760_v48   ;;  %v5672_v35 = vpop.f32.mrb[207].mxu1  ;;  %v6001_v44 = vadd.f32 %v9811_v63, %v5850_v10 }
 0x39e   : > { %v6740_v3 = vpack.c.bf16 %v6034_v51, %v6033_v26  ;;  %v5849_v41 = vadd.f32 %v5672_v35, %v9764_v23 }
 0x39f   : > { %6807 = vst [vmem:[%s9825_s13 + $0x8] sm:$0xff] %v6735_v42   ;;  %v6049_v17 = vmax.f32 %v6001_v44, 0.0 }
 0x3a0   : > { %6808 = vst [vmem:[%s9825_s13 + $0x10] sm:$0xff] %v6740_v3   ;;  %v6000_v56 = vadd.f32 %v9811_v63, %v5849_v41 }
 0x3a2   : > { %v6048_v6 = vmax.f32 %v6000_v56, 0.0  ;;  %v7736_v54 = vpop.f32.mrb[208].mxu1 }
 0x3a3   : > { %v5685_v12 = vpop.f32.mrb[209].mxu1 }
 0x3a4   : > { %v6765_v2 = vpack.c.bf16 %v6049_v17, %v6048_v6  ;;  %v5852_v21 = vadd.f32 %v5685_v12, %v9769_v49  ;;  %v7737_v13 = vpop.f32.mrb[210].mxu1 }
 0x3a5   : > { %v5855_v15 = vadd.f32 %v7737_v13, %v9771_v43  ;;  %v5688_v57 = vpop.f32.mrb[211].mxu1 }
 0x3a6   : > { %6813 = vst [vmem:[%s9825_s13 + $0x38] sm:$0xff] %v6765_v2   ;;  %v6003_v45 = vadd.f32 %v9811_v63, %v5852_v21  ;;  %v5853_v23 = vadd.f32 %v5688_v57, %v9773_v40 }
 0x3a7   : > { %v6006_v49 = vadd.f32 %v9811_v63, %v5855_v15 }
 0x3a8   : > { %v6004_v7 = vadd.f32 %v9811_v63, %v5853_v23  ;;  %v6051_v27 = vmax.f32 %v6003_v45, 0.0 }
 0x3aa   : > { %v6052_v25 = vmax.f32 %v6004_v7, 0.0  ;;  %v7740_v24 = vpop.f32.mrb[212].mxu1 }
 0x3ab   : > { %v5858_v18 = vadd.f32 %v7740_v24, %v9776_v34  ;;  %v5701_v37 = vpop.f32.mrb[213].mxu1  ;;  %v6054_v34 = vmax.f32 %v6006_v49, 0.0 }
 0x3ac   : > { %v6770_v16 = vpack.c.bf16 %v6052_v25, %v6051_v27  ;;  %v5856_v43 = vadd.f32 %v5701_v37, %v9779_v47  ;;  %v7741_v33 = vpop.f32.mrb[214].mxu1 }
 0x3ad   : > { %v6009_v39 = vadd.f32 %v9811_v63, %v5858_v18  ;;  %v5859_v36 = vadd.f32 %v7741_v33, %v9781_v52  ;;  %v5704_v40 = vpop.f32.mrb[215].mxu1 }
 0x3ae   : > { %6814 = vst [vmem:[%s9825_s13 + $0x40] sm:$0xff] %v6770_v16   ;;  %v6007_v8 = vadd.f32 %v9811_v63, %v5856_v43 }
 0x3af   : > { %v6010_v46 = vadd.f32 %v9811_v63, %v5859_v36  ;;  %v6057_v9 = vmax.f32 %v6009_v39, 0.0 }
 0x3b0   : > { %v6055_v30 = vmax.f32 %v6007_v8, 0.0 }
 0x3b1   : > { %v6058_v61 = vmax.f32 %v6010_v46, 0.0 }
 0x3b2   : > { %v6775_v14 = vpack.c.bf16 %v6055_v30, %v6054_v34  ;;  %v7744_v19 = vpop.f32.mrb[216].mxu1 }
 0x3b3   : > { %v6780_v47 = vpack.c.bf16 %v6058_v61, %v6057_v9  ;;  %v5862_v58 = vadd.f32 %v7744_v19, %v9785_v11  ;;  %v5717_v1 = vpop.f32.mrb[217].mxu1 }
 0x3b4   : > { %6815 = vst [vmem:[%s9825_s13 + $0x48] sm:$0xff] %v6775_v14   ;;  %v7745_v52 = vpop.f32.mrb[218].mxu1 }
 0x3b5   : > { %6816 = vst [vmem:[%s9825_s13 + $0x50] sm:$0xff] %v6780_v47   ;;  %v5720_v55 = vpop.f32.mrb[219].mxu1  ;;  %v6013_v22 = vadd.f32 %v9811_v63, %v5862_v58 }
 0x3b6   : > { %v5861_v60 = vadd.f32 %v5720_v55, %v9788_v38 }
 0x3b7   : > { %v6061_v0 = vmax.f32 %v6013_v22, 0.0 }
 0x3b8   : > { %v6012_v28 = vadd.f32 %v9811_v63, %v5861_v60 }
 0x3ba   : > { %v6060_v48 = vmax.f32 %v6012_v28, 0.0  ;;  %v7748_v10 = vpop.f32.mrb[220].mxu1 }
 0x3bb   : > { %v5733_v31 = vpop.f32.mrb[221].mxu1 }
 0x3bc   : > { %v6785_v26 = vpack.c.bf16 %v6061_v0, %v6060_v48  ;;  %v5864_v51 = vadd.f32 %v5733_v31, %v9793_v62  ;;  %v7749_v11 = vpop.f32.mrb[222].mxu1 }
 0x3bd   : > { %v5867_v5 = vadd.f32 %v7749_v11, %v9795_v59  ;;  %v5736_v42 = vpop.f32.mrb[223].mxu1 }
 0x3be   : > { %6817 = vst [vmem:[%s9825_s13 + $0x58] sm:$0xff] %v6785_v26   ;;  %v6015_v35 = vadd.f32 %v9811_v63, %v5864_v51  ;;  %v5865_v3 = vadd.f32 %v5736_v42, %v9797_v4 }
 0x3bf   : > { %v6018_v62 = vadd.f32 %v9811_v63, %v5867_v5 }
 0x3c0   : > { %v6016_v38 = vadd.f32 %v9811_v63, %v5865_v3  ;;  %v6063_v44 = vmax.f32 %v6015_v35, 0.0 }
 0x3c2   : > { %v6064_v41 = vmax.f32 %v6016_v38, 0.0  ;;  %v7752_v56 = vpop.f32.mrb[224].mxu1 }
 0x3c3   : > { %v5870_v17 = vadd.f32 %v7752_v56, %v9800_v29  ;;  %v5749_v6 = vpop.f32.mrb[225].mxu1  ;;  %v6066_v29 = vmax.f32 %v6018_v62, 0.0 }
 0x3c4   : > { %v6790_v54 = vpack.c.bf16 %v6064_v41, %v6063_v44  ;;  %v5868_v59 = vadd.f32 %v5749_v6, %v9803_v53  ;;  %v7753_v12 = vpop.f32.mrb[226].mxu1 }
 0x3c5   : > { %v6021_v2 = vadd.f32 %v9811_v63, %v5870_v17  ;;  %v5871_v21 = vadd.f32 %v7753_v12, %v9805_v32  ;;  %v5752_v4 = vpop.f32.mrb[227].mxu1 }
 0x3c6   : > { %6818 = vst [vmem:[%s9825_s13 + $0x60] sm:$0xff] %v6790_v54   ;;  %v6019_v13 = vadd.f32 %v9811_v63, %v5868_v59 }
 0x3c7   : > { %v6022_v15 = vadd.f32 %v9811_v63, %v5871_v21  ;;  %v6069_v45 = vmax.f32 %v6021_v2, 0.0 }
 0x3c8   : > { %v6067_v57 = vmax.f32 %v6019_v13, 0.0 }
 0x3c9   : > { %v6070_v23 = vmax.f32 %v6022_v15, 0.0 }
 0x3ca   : > { %v6795_v7 = vpack.c.bf16 %v6067_v57, %v6066_v29  ;;  %v7756_v53 = vpop.f32.mrb[228].mxu1 }
 0x3cb   : > { %v6800_v27 = vpack.c.bf16 %v6070_v23, %v6069_v45  ;;  %v5874_v25 = vadd.f32 %v7756_v53, %v9813_v20  ;;  %v5765_v24 = vpop.f32.mrb[229].mxu1 }
 0x3cc   : > { %6819 = vst [vmem:[%s9825_s13 + $0x68] sm:$0xff] %v6795_v7   ;;  %v7757_v32 = vpop.f32.mrb[230].mxu1 }
 0x3cd   : > { %6820 = vst [vmem:[%s9825_s13 + $0x70] sm:$0xff] %v6800_v27   ;;  %v5768_v18 = vpop.f32.mrb[231].mxu1  ;;  %v6025_v37 = vadd.f32 %v9811_v63, %v5874_v25 }
 0x3ce   : > { %v5873_v49 = vadd.f32 %v5768_v18, %v9818_v50 }
 0x3cf   : > { %v6073_v43 = vmax.f32 %v6025_v37, 0.0 }
 0x3d0   : > { %v6024_v16 = vadd.f32 %v9811_v63, %v5873_v49 }
 0x3d2   : > { %v6072_v33 = vmax.f32 %v6024_v16, 0.0 }
 0x3d4   : > { %v6805_v39 = vpack.c.bf16 %v6073_v43, %v6072_v33 }
 0x3d6   : > { %6821 = vst [vmem:[%s9825_s13 + $0x78] sm:$0xff] %v6805_v39  }
 0x3d7 PF: > { %s15_s18 = sadd.s32 1, %s7945_s18  }
 0x3d8   : > { %p12_p4 = scmp.ge.s32.totalorder %s15_s18, 4  }
 0x3da   :  { %14 = sbr.rel (!%p12_p4) target bundleno = 1 (0x1), region = 79 }

</bundles_post_ra>
